<compile_context>
chip_gen: v7x
topology: tpu7x:2x2x1
jax: 0.10.0
libtpu: 0.0.40
codegen_flags: <defaults>
</compile_context>

<pallas_src>
import functools

import jax
import jax.numpy as jnp
import numpy as np
from jax.experimental import pallas as pl
from jax.experimental.pallas import tpu as pltpu


def _round_up(x, m):
    return ((x + m - 1) // m) * m


def lsa_kernel(enc_ref, query_ref, cum_ref, chars_ref,
               wwt_ref, m2_ref, bias_ref, vblk_ref,
               scores_ref, newcum_ref, *, T):
    """One LSA step, fully in (B, Tp*D) flattened lane-dense layout."""
    B, Tp = scores_ref.shape

    enc = enc_ref[...].astype(jnp.float32)        # (B, Tp*D) encoder_seq_proj (flat)
    query = query_ref[...].astype(jnp.float32)    # (B, D)
    cum = cum_ref[...]                            # (B, Tp)   cumulative attention
    chars = chars_ref[...]                        # (B, Tp)   int32 tokens (0 = pad)

    # processed_query broadcast over time:   query @ (W^T tiled over t) -> (B, Tp*D)
    pq = jnp.dot(query, wwt_ref[...], preferred_element_type=jnp.float32)
    # Conv1d fused with L:   cumulative @ Toeplitz(conv)·L              -> (B, Tp*D)
    ploc = jnp.dot(cum, m2_ref[...], preferred_element_type=jnp.float32)

    # tanh(W q + enc + L conv(cum) + combined bias)
    h = jnp.tanh(pq + ploc + enc + bias_ref[...])                       # (B, Tp*D)

    # v-reduction as an MXU matmul against a block-diagonal v matrix    -> (B, Tp)
    u = jnp.dot(h, vblk_ref[...], preferred_element_type=jnp.float32)

    # multiplicative char mask (exactly as the torch module), then exclude the
    # lane padding (t >= T) from the softmax entirely.
    u = jnp.where(chars != 0, u, 0.0)
    lane = jax.lax.broadcasted_iota(jnp.int32, (B, Tp), 1)
    u = jnp.where(lane < T, u, jnp.float32(-1e30))

    # softmax over the (padded) time axis
    u = u - jnp.max(u, axis=1, keepdims=True)
    e = jnp.exp(u)
    scores = e * pl.reciprocal(jnp.sum(e, axis=1, keepdims=True), approx=False)

    scores_ref[...] = scores
    newcum_ref[...] = cum + scores        # cumulative += attention (aliased in place)


def prepare_lsa_params(params, T):
    """One-time constant preparation (hoisted out of the per-step decode loop)."""
    conv_w, conv_b, L_w, W_w, W_b, v_w = params   # torch layouts
    Fc, _, K = conv_w.shape
    D = L_w.shape[0]
    pad = (K - 1) // 2
    Tp = _round_up(T, 128)

    # Fused Toeplitz(conv)·L:  M2[s, t*D + d] = sum_f conv_w[f,0,s-t+pad] * L_w[d,f]
    s = jnp.arange(Tp)[:, None]
    t = jnp.arange(Tp)[None, :]
    k = s - t + pad
    valid = (k >= 0) & (k < K)
    w_kf = jnp.transpose(conv_w[:, 0, :])                                  # (K, Fc)
    band = jnp.where(valid[..., None], w_kf[jnp.clip(k, 0, K - 1)], 0.0)   # (Tp,Tp,Fc)
    M2 = jnp.einsum('stf,df->std', band, L_w).reshape(Tp, Tp * D)

    # W^T tiled over time; combined bias (W bias + conv bias pushed through L).
    Ww_tiled = jnp.tile(jnp.transpose(W_w), (1, Tp))                       # (D, Tp*D)
    bias_tiled = jnp.tile(W_b + L_w @ conv_b, (Tp,))[None, :]              # (1, Tp*D)

    # Block-diagonal v:  V[t*D + d, t'] = v[d] * (t == t')
    Vblk = (jnp.eye(Tp, dtype=jnp.float32)[:, None, :]
            * v_w[0][None, :, None]).reshape(Tp * D, Tp)                   # (Tp*D, Tp)

    return dict(T=T, Tp=Tp, D=D,
                Ww_tiled=Ww_tiled, M2=M2, bias=bias_tiled, Vblk=Vblk)


def prepare_lsa_inputs(prep, enc, chars):
    """One-time per-utterance prep: pad/flatten encoder projection and chars."""
    B, T, D = enc.shape
    Tp = prep['Tp']
    enc_flat = jnp.pad(enc.astype(jnp.float32),
                       ((0, 0), (0, Tp - T), (0, 0))).reshape(B, Tp * D)
    chars_p = jnp.pad(chars.astype(jnp.int32), ((0, 0), (0, Tp - T)))
    cum0 = jnp.zeros((B, Tp), jnp.float32)     # init_attention
    return enc_flat, chars_p, cum0


def lsa_step(prep, enc_flat, query, cum, chars_p):
    """One forward step.

    Returns (attention of shape (B, 1, T), new padded cumulative of shape (B, Tp)).
    NOTE: `cum` is aliased to the new-cumulative output; do not reuse it after
    this call.
    """
    B = query.shape[0]
    T, Tp = prep['T'], prep['Tp']
    scores, new_cum = pl.pallas_call(
        functools.partial(lsa_kernel, T=T),
        out_shape=(jax.ShapeDtypeStruct((B, Tp), jnp.float32),
                   jax.ShapeDtypeStruct((B, Tp), jnp.float32)),
        in_specs=[pl.BlockSpec(memory_space=pltpu.MemorySpace.VMEM)] * 8,
        out_specs=(pl.BlockSpec(memory_space=pltpu.MemorySpace.VMEM),
                   pl.BlockSpec(memory_space=pltpu.MemorySpace.VMEM)),
        input_output_aliases={2: 1},   # cumulative -> new cumulative (in place)
    )(enc_flat, query.astype(jnp.float32), cum, chars_p,
      prep['Ww_tiled'], prep['M2'], prep['bias'], prep['Vblk'])
    return scores[:, None, :T], new_cum       # (B, 1, T), (B, Tp)


def lsa_reference(enc, query, cumulative, chars, params):
    """Pure-JAX reference matching the PyTorch module semantics (unpadded)."""
    conv_w, conv_b, L_w, W_w, W_b, v_w = params
    K = conv_w.shape[-1]
    pad = (K - 1) // 2
    pq = query @ W_w.T + W_b                                        # (B, D)
    loc = cumulative[:, None, :]                                    # (B, 1, T)
    conv = jax.lax.conv_general_dilated(
        loc, conv_w, window_strides=(1,), padding=[(pad, pad)],
        dimension_numbers=('NCH', 'OIH', 'NCH'))                    # (B, Fc, T)
    conv = conv + conv_b[None, :, None]
    ploc = jnp.einsum('bft,df->btd', conv, L_w)                     # (B, T, D)
    u = jnp.einsum('btd,d->bt', jnp.tanh(pq[:, None, :] + enc + ploc), v_w[0])
    u = u * (chars != 0).astype(jnp.float32)
    scores = jax.nn.softmax(u, axis=1)
    return scores[:, None, :], cumulative + scores


if __name__ == "__main__":
    B, T, D = 2, 16, 32        # batch, encoder time steps, attn_dim
    K, Fc = 31, 32             # conv kernel size, conv filters

    key = jax.random.PRNGKey(0)
    ks = jax.random.split(key, 9)
    conv_w = jax.random.normal(ks[0], (Fc, 1, K), jnp.float32) * 0.1   # Conv1d weight
    conv_b = jax.random.normal(ks[1], (Fc,), jnp.float32) * 0.1        # Conv1d bias
    L_w = jax.random.normal(ks[2], (D, Fc), jnp.float32) * 0.1         # Linear(filters, attn_dim)
    W_w = jax.random.normal(ks[3], (D, D), jnp.float32) * 0.1          # Linear(attn_dim, attn_dim)
    W_b = jax.random.normal(ks[4], (D,), jnp.float32) * 0.1
    v_w = jax.random.normal(ks[5], (1, D), jnp.float32) * 0.1          # Linear(attn_dim, 1)
    params = (conv_w, conv_b, L_w, W_w, W_b, v_w)

    enc = jax.random.normal(ks[6], (B, T, D), jnp.float32)             # encoder_seq_proj
    query = jax.random.normal(ks[7], (B, D), jnp.float32)
    lengths = jnp.array([T, T - 4])
    chars = jnp.where(jnp.arange(T)[None, :] < lengths[:, None],
                      jax.random.randint(ks[8], (B, T), 1, 50), 0).astype(jnp.int32)

    # one-time prep (hoisted out of the decode loop)
    prep = prepare_lsa_params(params, T)
    enc_flat, chars_p, cum0 = prepare_lsa_inputs(prep, enc, chars)

    # --- step t = 0 (cumulative initialized to zeros, as in init_attention) ---
    attn0, cum1 = lsa_step(prep, enc_flat, query, cum0, chars_p)
    attn0_ref, cum1_ref = lsa_reference(enc, query, jnp.zeros((B, T), jnp.float32),
                                        chars, params)
    attn0_h = np.asarray(attn0)
    cum1_h = np.asarray(cum1)          # snapshot before cum1 is donated to step 1
    np.testing.assert_allclose(attn0_h, np.asarray(attn0_ref), rtol=1e-4, atol=1e-5)
    np.testing.assert_allclose(cum1_h[:, :T], np.asarray(cum1_ref), rtol=1e-4, atol=1e-5)

    # --- step t = 1 (cumulative carries the previous attention) ---
    attn1, cum2 = lsa_step(prep, enc_flat, query, cum1, chars_p)
    attn1_ref, cum2_ref = lsa_reference(enc, query, cum1_ref, chars, params)
    jax.block_until_ready((attn1, cum2))
    np.testing.assert_allclose(np.asarray(attn1), np.asarray(attn1_ref),
                               rtol=1e-4, atol=1e-5)
    np.testing.assert_allclose(np.asarray(cum2)[:, :T], np.asarray(cum2_ref),
                               rtol=1e-4, atol=1e-5)

    assert attn0_h.shape == (B, 1, T)
    print("KERNEL_OK")
</pallas_src>

<mosaic_0001>
module attributes {stable_mosaic.version = 11 : i64} {
  func.func @lsa_kernel(%arg0: memref<2x4096xf32, #tpu.memory_space<vmem>>, %arg1: memref<2x32xf32, #tpu.memory_space<vmem>>, %arg2: memref<2x128xf32, #tpu.memory_space<vmem>>, %arg3: memref<2x128xi32, #tpu.memory_space<vmem>>, %arg4: memref<32x4096xf32, #tpu.memory_space<vmem>>, %arg5: memref<128x4096xf32, #tpu.memory_space<vmem>>, %arg6: memref<1x4096xf32, #tpu.memory_space<vmem>>, %arg7: memref<4096x128xf32, #tpu.memory_space<vmem>>, %arg8: memref<2x128xf32, #tpu.memory_space<vmem>>, %arg9: memref<2x128xf32, #tpu.memory_space<vmem>>) attributes {dimension_semantics = [], scalar_prefetch = 0 : i64, scratch_operands = 0 : i64, tpu.core_type = #tpu.core_type<tc>} {
    %c0 = arith.constant 0 : index
    %c0_0 = arith.constant 0 : index
    %0 = vector.load %arg0[%c0, %c0_0] : memref<2x4096xf32, #tpu.memory_space<vmem>>, vector<2x4096xf32>
    %c0_1 = arith.constant 0 : index
    %c0_2 = arith.constant 0 : index
    %1 = vector.load %arg1[%c0_1, %c0_2] : memref<2x32xf32, #tpu.memory_space<vmem>>, vector<2x32xf32>
    %c0_3 = arith.constant 0 : index
    %c0_4 = arith.constant 0 : index
    %2 = vector.load %arg2[%c0_3, %c0_4] : memref<2x128xf32, #tpu.memory_space<vmem>>, vector<2x128xf32>
    %c0_5 = arith.constant 0 : index
    %c0_6 = arith.constant 0 : index
    %3 = vector.load %arg3[%c0_5, %c0_6] : memref<2x128xi32, #tpu.memory_space<vmem>>, vector<2x128xi32>
    %c0_7 = arith.constant 0 : index
    %c0_8 = arith.constant 0 : index
    %4 = vector.load %arg4[%c0_7, %c0_8] : memref<32x4096xf32, #tpu.memory_space<vmem>>, vector<32x4096xf32>
    %cst = arith.constant dense<0.000000e+00> : vector<2x4096xf32>
    %5 = tpu.matmul %1, %4, %cst {dimension_numbers = #tpu.dot_dimension_numbers<[1], [0], [0], [1], [0, 0, 1, 1], [], []>} : vector<2x32xf32>, vector<32x4096xf32>, vector<2x4096xf32> -> vector<2x4096xf32>
    %c0_9 = arith.constant 0 : index
    %c0_10 = arith.constant 0 : index
    %6 = vector.load %arg5[%c0_9, %c0_10] : memref<128x4096xf32, #tpu.memory_space<vmem>>, vector<128x4096xf32>
    %cst_11 = arith.constant dense<0.000000e+00> : vector<2x4096xf32>
    %7 = tpu.matmul %2, %6, %cst_11 {dimension_numbers = #tpu.dot_dimension_numbers<[1], [0], [0], [1], [0, 0, 1, 1], [], []>} : vector<2x128xf32>, vector<128x4096xf32>, vector<2x4096xf32> -> vector<2x4096xf32>
    %8 = arith.addf %5, %7 : vector<2x4096xf32>
    %9 = arith.addf %8, %0 : vector<2x4096xf32>
    %c0_12 = arith.constant 0 : index
    %c0_13 = arith.constant 0 : index
    %10 = vector.load %arg6[%c0_12, %c0_13] : memref<1x4096xf32, #tpu.memory_space<vmem>>, vector<1x4096xf32>
    %11 = vector.broadcast %10 : vector<1x4096xf32> to vector<2x4096xf32>
    %12 = arith.addf %9, %11 : vector<2x4096xf32>
    %13 = math.tanh %12 : vector<2x4096xf32>
    %c0_14 = arith.constant 0 : index
    %c0_15 = arith.constant 0 : index
    %14 = vector.load %arg7[%c0_14, %c0_15] : memref<4096x128xf32, #tpu.memory_space<vmem>>, vector<4096x128xf32>
    %cst_16 = arith.constant dense<0.000000e+00> : vector<2x128xf32>
    %15 = tpu.matmul %13, %14, %cst_16 {dimension_numbers = #tpu.dot_dimension_numbers<[1], [0], [0], [1], [0, 0, 1, 1], [], []>} : vector<2x4096xf32>, vector<4096x128xf32>, vector<2x128xf32> -> vector<2x128xf32>
    %c0_i32 = arith.constant 0 : i32
    %16 = vector.broadcast %c0_i32 : i32 to vector<2x128xi32>
    %17 = arith.cmpi ne, %3, %16 : vector<2x128xi32>
    %cst_17 = arith.constant 0.000000e+00 : f32
    %18 = vector.broadcast %cst_17 : f32 to vector<2x128xf32>
    %19 = arith.select %17, %15, %18 : vector<2x128xi1>, vector<2x128xf32>
    %20 = tpu.iota {dimensions = array<i32: 1>} : vector<2x128xi32>
    %c16_i32 = arith.constant 16 : i32
    %21 = vector.broadcast %c16_i32 : i32 to vector<2x128xi32>
    %22 = arith.cmpi slt, %20, %21 : vector<2x128xi32>
    %cst_18 = arith.constant -1.000000e+30 : f32
    %23 = vector.broadcast %cst_18 : f32 to vector<2x128xf32>
    %24 = arith.select %22, %19, %23 : vector<2x128xi1>, vector<2x128xf32>
    %cst_19 = arith.constant dense<0xFF800000> : vector<2xf32>
    %25 = vector.multi_reduction <maximumf>, %24, %cst_19 [1] : vector<2x128xf32> to vector<2xf32>
    %26 = vector.shape_cast %25 : vector<2xf32> to vector<2x1xf32>
    %27 = vector.broadcast %26 : vector<2x1xf32> to vector<2x128xf32>
    %28 = arith.subf %24, %27 : vector<2x128xf32>
    %29 = math.exp %28 : vector<2x128xf32>
    %cst_20 = arith.constant dense<0.000000e+00> : vector<2xf32>
    %30 = vector.multi_reduction <add>, %29, %cst_20 [1] : vector<2x128xf32> to vector<2xf32>
    %31 = vector.shape_cast %30 : vector<2xf32> to vector<2x1xf32>
    %32 = tpu.reciprocal %31 : vector<2x1xf32> -> vector<2x1xf32>
    %33 = vector.broadcast %32 : vector<2x1xf32> to vector<2x128xf32>
    %34 = arith.mulf %29, %33 : vector<2x128xf32>
    %c0_21 = arith.constant 0 : index
    %c0_22 = arith.constant 0 : index
    %35 = vector.load %arg8[%c0_21, %c0_22] : memref<2x128xf32, #tpu.memory_space<vmem>>, vector<2x128xf32>
    tpu.vector_store %arg8[%c0_21, %c0_22], %34 {strides = array<i32>} : memref<2x128xf32, #tpu.memory_space<vmem>>, vector<2x128xf32>,
    %36 = arith.addf %2, %34 : vector<2x128xf32>
    %c0_23 = arith.constant 0 : index
    %c0_24 = arith.constant 0 : index
    %37 = vector.load %arg9[%c0_23, %c0_24] : memref<2x128xf32, #tpu.memory_space<vmem>>, vector<2x128xf32>
    tpu.vector_store %arg9[%c0_23, %c0_24], %36 {strides = array<i32>} : memref<2x128xf32, #tpu.memory_space<vmem>>, vector<2x128xf32>,
    return
  }
}

</mosaic_0001>

<bundles_post_ra>
// kernel: tpu_custom_call.1
= control target key start
LH: loop header
LB: loop body
LE: loop exit
PB: predicated region body
PF: predicated region fallthrough
CT: control target
= control target key end

     0   :  { %15 = vsyncpa [#allocation3], 0  ;;  %s7866_s0 = inlined_call_operand.hbm [shape: f32[2,4096], index: 0, kind: input, shape index: {}]   ;;  %s7867_s1 = inlined_call_operand.hbm [shape: f32[2,32], index: 1, kind: input, shape index: {}]   ;;  %s7868_s2 = inlined_call_operand.hbm [shape: f32[2,128], index: 2, kind: input, shape index: {}, may-alias: {2,9}]   ;;  %s7869_s3 = inlined_call_operand.hbm [shape: s32[2,128], index: 3, kind: input, shape index: {}]   ;;  %s7870_s4 = inlined_call_operand.hbm [shape: f32[32,4096], index: 4, kind: input, shape index: {}]   ;;  %s7871_s5 = inlined_call_operand.hbm [shape: f32[128,4096], index: 5, kind: input, shape index: {}]   ;;  %s7872_s6 = inlined_call_operand.hbm [shape: f32[1,4096], index: 6, kind: input, shape index: {}]   ;;  %s7873_s7 = inlined_call_operand.hbm [shape: f32[4096,128], index: 7, kind: input, shape index: {}]   ;;  %s7874_s8 = inlined_call_operand.hbm [shape: f32[2,128], index: 8, kind: output, shape index: {0}]   ;;  %s7875_s9 = inlined_call_operand.hbm [shape: f32[2,128], index: 9, kind: output, shape index: {1}, may-alias: {2,9}]  }
   0x1   :  { %16 = vsyncpa [#allocation6], 0 }
   0x2   :  { %17 = vsyncpa [#allocation9], 0 }
   0x3   :  { %18 = vsyncpa [#allocation12], 0 }
   0x4   :  { %19 = vsyncpa [#allocation15], 0 }
   0x5   :  { %20 = vsyncpa [#allocation4], 0 }
   0x6   :  { %21 = vsyncpa [#allocation18], 0  ;;  %s7273_s30 = smov [#allocation5]   ;;  %s7274_s11 = smov [#allocation8]  }
   0x7   :  { %s38_s10 = sshll.u32 %s7273_s30, 4  ;;  %s58_s12 = sshll.u32 %s7274_s11, 4  ;;  %s39_s10 = int_to_ptr.vmem [resolvable:$true] %s38_s10  ;;  %s59_s12 = int_to_ptr.vmem [resolvable:$true] %s58_s12 }
   0x8   :  { %s7039_s15 = scalar_lea.hbm %s7867_s1, 32 }
   0x9   :  { %p7040_p0 = scmp.ne.s32.totalorder %s7867_s1, %s7039_s15  ;;  %p7043_p1 = scmp.lt.u32.totalorder %s7039_s15, %s7867_s1 }
   0xb   :  { %p7045_p2 = pnand %p7043_p1, %p7040_p0 }
   0xd   :  { %7048 = shalt.err (!%p7045_p2)
}
   0xe   :  { %s7049_s20 = scalar_lea.vmem %s39_s10, 32  ;;  %p7054_p4 = scmp.lt.s32.totalorder %s39_s10, %s39_s10 }
   0xf   :  { %p7050_p3 = scmp.ne.s32.totalorder %s39_s10, %s7049_s20  ;;  %p7055_p5 = scmp.lt.s32.totalorder %s7049_s20, %s7049_s20 }
  0x11   :  { %p7056_p6 = por %p7055_p5, %p7054_p4 }
  0x13   :  { %p7057_p7 = pnand %p7056_p6, %p7050_p3 }
  0x15   :  { %7060 = shalt.err (!%p7057_p7)
}
  0x16   :  { %41 = dma.hbm_to_vmem [thread:$0]  %s7867_s1, 32, %s39_s10, [#allocation6]  }
  0x17   :  { %s7061_s25 = scalar_lea.hbm %s7869_s3, 32 }
  0x18   :  { %p7062_p8 = scmp.ne.s32.totalorder %s7869_s3, %s7061_s25  ;;  %p7065_p9 = scmp.lt.u32.totalorder %s7061_s25, %s7869_s3 }
  0x1a   :  { %p7067_p10 = pnand %p7065_p9, %p7062_p8 }
  0x1c   :  { %7070 = shalt.err (!%p7067_p10)
}
  0x1d   :  { %s7071_s30 = scalar_lea.vmem %s59_s12, 32  ;;  %p7076_p12 = scmp.lt.s32.totalorder %s59_s12, %s59_s12 }
  0x1e   :  { %p7072_p11 = scmp.ne.s32.totalorder %s59_s12, %s7071_s30  ;;  %p7077_p13 = scmp.lt.s32.totalorder %s7071_s30, %s7071_s30 }
  0x20   :  { %p7078_p0 = por %p7077_p13, %p7076_p12 }
  0x22   :  { %p7079_p1 = pnand %p7078_p0, %p7072_p11 }
  0x24   :  { %7082 = shalt.err (!%p7079_p1)
}
  0x25   :  { %61 = dma.hbm_to_vmem [thread:$0]  %s7869_s3, 32, %s59_s12, [#allocation9]  }
  0x26   :  { %s7275_s11 = smov [#allocation11]   ;;  %s7276_s14 = smov [#allocation2]  }
  0x27   :  { %s79_s13 = sshll.u32 %s7275_s11, 4  ;;  %s28_s15 = sshll.u32 %s7276_s14, 4  ;;  %s80_s13 = int_to_ptr.vmem [resolvable:$true] %s79_s13  ;;  %s29_s15 = int_to_ptr.vmem [resolvable:$true] %s28_s15 }
  0x28   :  { %s7083_s18 = scalar_lea.hbm %s7871_s5, 65536 }
  0x29   :  { %p7084_p2 = scmp.ne.s32.totalorder %s7871_s5, %s7083_s18  ;;  %p7087_p3 = scmp.lt.u32.totalorder %s7083_s18, %s7871_s5 }
  0x2b   :  { %p7089_p4 = pnand %p7087_p3, %p7084_p2 }
  0x2d   :  { %7092 = shalt.err (!%p7089_p4)
}
  0x2e   :  { %s7093_s3 = scalar_lea.vmem %s80_s13, 65536  ;;  %p7098_p6 = scmp.lt.s32.totalorder %s80_s13, %s80_s13 }
  0x2f   :  { %p7094_p5 = scmp.ne.s32.totalorder %s80_s13, %s7093_s3  ;;  %p7099_p7 = scmp.lt.s32.totalorder %s7093_s3, %s7093_s3 }
  0x31   :  { %p7100_p8 = por %p7099_p7, %p7098_p6 }
  0x33   :  { %p7101_p9 = pnand %p7100_p8, %p7094_p5 }
  0x35   :  { %7104 = shalt.err (!%p7101_p9)
}
  0x36   :  { %s7277_s12 = smov 4096   ;;  %s7278_s23 = smov 256  }
  0x37   :  { %85 = dma.hbm_to_vmem [thread:$0]  %s7871_s5, 65536, %s80_s13, [#allocation12], %s7277_s12, %s7277_s12, %s7278_s23  }
  0x38   :  { %s7105_s28 = scalar_lea.hbm %s7866_s0, 1024 }
  0x39   :  { %p7106_p10 = scmp.ne.s32.totalorder %s7866_s0, %s7105_s28  ;;  %p7109_p11 = scmp.lt.u32.totalorder %s7105_s28, %s7866_s0 }
  0x3b   :  { %p7111_p12 = pnand %p7109_p11, %p7106_p10 }
  0x3d   :  { %7114 = shalt.err (!%p7111_p12)
}
  0x3e   :  { %s7115_s11 = scalar_lea.vmem %s29_s15, 1024  ;;  %p7120_p0 = scmp.lt.s32.totalorder %s29_s15, %s29_s15 }
  0x3f   :  { %p7116_p13 = scmp.ne.s32.totalorder %s29_s15, %s7115_s11  ;;  %p7121_p1 = scmp.lt.s32.totalorder %s7115_s11, %s7115_s11 }
  0x41   :  { %p7122_p2 = por %p7121_p1, %p7120_p0 }
  0x43   :  { %p7123_p3 = pnand %p7122_p2, %p7116_p13 }
  0x45   :  { %7126 = shalt.err (!%p7123_p3)
}
  0x46   :  { %31 = dma.hbm_to_vmem [thread:$0]  %s7866_s0, 1024, %s29_s15, [#allocation3]  }
  0x47   :  { %s7279_s14 = smov [#allocation7]   ;;  %s7280_s17 = smov [#allocation10]  }
  0x48   :  { %s48_s16 = sshll.u32 %s7279_s14, 4  ;;  %s67_s18 = sshll.u32 %s7280_s17, 4  ;;  %s49_s16 = int_to_ptr.vmem [resolvable:$true] %s48_s16  ;;  %s7390_s18 = int_to_ptr.vmem [resolvable:$true] %s67_s18 }
  0x49   :  { %s7127_s21 = scalar_lea.hbm %s7868_s2, 32 }
  0x4a   :  { %p7128_p4 = scmp.ne.s32.totalorder %s7868_s2, %s7127_s21  ;;  %p7131_p5 = scmp.lt.u32.totalorder %s7127_s21, %s7868_s2 }
  0x4c   :  { %p7133_p6 = pnand %p7131_p5, %p7128_p4 }
  0x4e   :  { %7136 = shalt.err (!%p7133_p6)
}
  0x4f   :  { %s7137_s0 = scalar_lea.vmem %s49_s16, 32  ;;  %p7142_p8 = scmp.lt.s32.totalorder %s49_s16, %s49_s16 }
  0x50   :  { %p7138_p7 = scmp.ne.s32.totalorder %s49_s16, %s7137_s0  ;;  %p7143_p9 = scmp.lt.s32.totalorder %s7137_s0, %s7137_s0 }
  0x52   :  { %p7144_p10 = por %p7143_p9, %p7142_p8 }
  0x54   :  { %p7145_p11 = pnand %p7144_p10, %p7138_p7 }
  0x56   :  { %7148 = shalt.err (!%p7145_p11)
}
  0x57   :  { %51 = dma.hbm_to_vmem [thread:$0]  %s7868_s2, 32, %s49_s16, [#allocation6]  }
  0x58   :  { %s7149_s29 = scalar_lea.hbm %s7870_s4, 16384 }
  0x59   :  { %p7150_p12 = scmp.ne.s32.totalorder %s7870_s4, %s7149_s29  ;;  %p7153_p13 = scmp.lt.u32.totalorder %s7149_s29, %s7870_s4 }
  0x5b   :  { %p7155_p0 = pnand %p7153_p13, %p7150_p12 }
  0x5d   :  { %7158 = shalt.err (!%p7155_p0)
}
  0x5e   :  { %s7159_s5 = scalar_lea.vmem %s7390_s18, 16384  ;;  %p7164_p2 = scmp.lt.s32.totalorder %s7390_s18, %s7390_s18 }
  0x5f   :  { %p7160_p1 = scmp.ne.s32.totalorder %s7390_s18, %s7159_s5  ;;  %p7165_p3 = scmp.lt.s32.totalorder %s7159_s5, %s7159_s5 }
  0x61   :  { %p7166_p4 = por %p7165_p3, %p7164_p2 }
  0x63   :  { %p7167_p5 = pnand %p7166_p4, %p7160_p1 }
  0x65   :  { %7170 = shalt.err (!%p7167_p5)
}
  0x66   :  { %73 = dma.hbm_to_vmem [thread:$0]  %s7870_s4, 16384, %s7390_s18, [#allocation9], %s7277_s12, %s7277_s12, %s7278_s23  }
  0x67   :  { %s7281_s14 = smov [#allocation13]   ;;  %s7282_s17 = smov [#allocation14]  }
  0x68   :  { %s92_s16 = sshll.u32 %s7281_s14, 4  ;;  %s101_s19 = sshll.u32 %s7282_s17, 4  ;;  %s93_s16 = int_to_ptr.vmem [resolvable:$true] %s92_s16  ;;  %s7424_s19 = int_to_ptr.vmem [resolvable:$true] %s101_s19 }
  0x69   :  { %s7171_s22 = scalar_lea.hbm %s7872_s6, 512 }
  0x6a   :  { %p7172_p6 = scmp.ne.s32.totalorder %s7872_s6, %s7171_s22  ;;  %p7175_p7 = scmp.lt.u32.totalorder %s7171_s22, %s7872_s6 }
  0x6c   :  { %p7177_p8 = pnand %p7175_p7, %p7172_p6 }
  0x6e   :  { %7180 = shalt.err (!%p7177_p8)
}
  0x6f   :  { %s7181_s4 = scalar_lea.vmem %s93_s16, 512  ;;  %p7186_p10 = scmp.lt.s32.totalorder %s93_s16, %s93_s16 }
  0x70   :  { %p7182_p9 = scmp.ne.s32.totalorder %s93_s16, %s7181_s4  ;;  %p7187_p11 = scmp.lt.s32.totalorder %s7181_s4, %s7181_s4 }
  0x72   :  { %p7188_p12 = por %p7187_p11, %p7186_p10 }
  0x74   :  { %p7189_p13 = pnand %p7188_p12, %p7182_p9 }
  0x76   :  { %7192 = shalt.err (!%p7189_p13)
}
  0x77   :  { %95 = dma.hbm_to_vmem [thread:$0]  %s7872_s6, 512, %s93_s16, [#allocation12]  }
  0x78   :  { %s7193_s26 = scalar_lea.hbm %s7873_s7, 65536 }
  0x79   :  { %p7194_p0 = scmp.ne.s32.totalorder %s7873_s7, %s7193_s26  ;;  %p7197_p1 = scmp.lt.u32.totalorder %s7193_s26, %s7873_s7 }
  0x7b   :  { %p7199_p2 = pnand %p7197_p1, %p7194_p0 }
  0x7d   :  { %7202 = shalt.err (!%p7199_p2)
}
  0x7e   :  { %s7203_s1 = scalar_lea.vmem %s7424_s19, 65536  ;;  %p7208_p4 = scmp.lt.s32.totalorder %s7424_s19, %s7424_s19 }
  0x7f   :  { %p7204_p3 = scmp.ne.s32.totalorder %s7424_s19, %s7203_s1  ;;  %p7209_p5 = scmp.lt.s32.totalorder %s7203_s1, %s7203_s1 }
  0x81   :  { %p7210_p6 = por %p7209_p5, %p7208_p4 }
  0x83   :  { %p7211_p7 = pnand %p7210_p6, %p7204_p3 }
  0x85   :  { %7214 = shalt.err (!%p7211_p7)
}
  0x86   :  { %s7283_s6 = smov 128   ;;  %s7284_s10 = smov 8  }
  0x87   :  { %107 = dma.hbm_to_vmem [thread:$0]  %s7873_s7, 65536, %s7424_s19, [#allocation15], %s7283_s6, %s7283_s6, %s7284_s10  }
  0x88   :  { %7259 = dma.done.wait [#allocation3], 1024  }
  0x89   :  { %7260 = vsyncadd [#allocation3], 4294966272 }
  0x8a   :  { %7261 = dma.done.wait [#allocation6], 64  }
  0x8b   :  { %7262 = vsyncadd [#allocation6], 4294967232 }
  0x8c   :  { %7263 = dma.done.wait [#allocation9], 16416  }
  0x8d   :  { %7264 = vsyncadd [#allocation9], 4294950880 }
  0x8e   :  { %7265 = dma.done.wait [#allocation12], 66048  }
  0x8f   :  { %7266 = vsyncadd [#allocation12], 4294901248 }
  0x90   :  { %7267 = dma.done.wait [#allocation15], 65536  }
  0x91   :  { %7268 = vsyncadd [#allocation15], 4294901760  ;;  %v7285_v0 = vmov 0.0   ;;  %v272_v1 = vld [vmem:[#allocation11 + $0x8] sm:$0xff]  ;;  %v274_v3 = vld [vmem:[#allocation11 + $0x18] sm:$0xff]  ;;  %vm1919_vm0 = vcmask 261120  }
  0x92   :  { %847 = vmatprep.mubr.f32.mxu0 %v7285_v0  ;;  %918 = vmatprep.mubr.f32.mxu1 %v7285_v0  ;;  %v304_v2 = vld [vmem:[#allocation11 + $0x108] sm:$0xff]  ;;  %v306_v5 = vld [vmem:[#allocation11 + $0x118] sm:$0xff]  ;;  %v271_v6 = vld [vmem:[#allocation11] sm:$0xff]  ;;  %vm5137_vm3 = vcmask 1041408   ;;  %s7287_s7 = smov [#allocation16]   ;;  %s7288_s13 = smov [#allocation17]  }
  0x93   :  { %v5761_v4 = vpack.c.bf16 %v304_v2, %v272_v1  ;;  %v303_v7 = vld [vmem:[#allocation11 + $0x100] sm:$0xff]  ;;  %v5793_v8 = vpack.c.bf16 %v306_v5, %v274_v3  ;;  %v273_v10 = vld [vmem:[#allocation11 + $0x10] sm:$0xff]  ;;  %v336_v12 = vld [vmem:[#allocation11 + $0x208] sm:$0xff]  ;;  %s5158_s2 = sshll.u32 %s7287_s7, 4  ;;  %s5168_s14 = sshll.u32 %s7288_s13, 4  ;;  %s5159_s2 = int_to_ptr.vmem [resolvable:$true] %s5158_s2  ;;  %s5169_s14 = int_to_ptr.vmem [resolvable:$true] %s5168_s14 }
  0x94   :  { %v5763_v9 = vpack.c.bf16 %v303_v7, %v271_v6  ;;  %v305_v11 = vld [vmem:[#allocation11 + $0x110] sm:$0xff]  ;;  %v368_v14 = vld [vmem:[#allocation11 + $0x308] sm:$0xff]  ;;  %v338_v15 = vld [vmem:[#allocation11 + $0x218] sm:$0xff]  ;;  %s7215_s16 = scalar_lea.vmem %s5159_s2, 32  ;;  %p7220_p9 = scmp.lt.s32.totalorder %s5159_s2, %s5159_s2 }
  0x95   :  { %5762 = vmatprep.subr.bf16.mxu0 %v5761_v4  ;;  %v5795_v13 = vpack.c.bf16 %v305_v11, %v273_v10  ;;  %v370_v16 = vld [vmem:[#allocation11 + $0x318] sm:$0xff]  ;;  %5794 = vmatprep.subr.bf16.mxu1 %v5793_v8  ;;  %v5765_v17 = vpack.c.bf16 %v368_v14, %v336_v12  ;;  %v335_v19 = vld [vmem:[#allocation11 + $0x200] sm:$0xff]  ;;  %v337_v21 = vld [vmem:[#allocation11 + $0x210] sm:$0xff]  ;;  %p7216_p8 = scmp.ne.s32.totalorder %s5159_s2, %s7215_s16  ;;  %p7221_p10 = scmp.lt.s32.totalorder %s7215_s16, %s7215_s16 }
  0x96   :  { %5764 = vmatpush1.bf16.msra.mxu0 %v5763_v9  ;;  %v5797_v18 = vpack.c.bf16 %v370_v16, %v338_v15  ;;  %v367_v20 = vld [vmem:[#allocation11 + $0x300] sm:$0xff]  ;;  %v369_v23 = vld [vmem:[#allocation11 + $0x310] sm:$0xff]  ;;  %v400_v24 = vld [vmem:[#allocation11 + $0x408] sm:$0xff] }
  0x97   :  { %5796 = vmatpush1.bf16.msra.mxu1 %v5795_v13  ;;  %v5767_v22 = vpack.c.bf16 %v367_v20, %v335_v19  ;;  %v432_v25 = vld [vmem:[#allocation11 + $0x508] sm:$0xff]  ;;  %5766 = vmatprep.subr.bf16.mxu0 %v5765_v17  ;;  %v5799_v26 = vpack.c.bf16 %v369_v23, %v337_v21  ;;  %v402_v28 = vld [vmem:[#allocation11 + $0x418] sm:$0xff]  ;;  %v399_v30 = vld [vmem:[#allocation11 + $0x400] sm:$0xff]  ;;  %p7222_p11 = por %p7221_p10, %p7220_p9 }
  0x98   :  { %5798 = vmatprep.subr.bf16.mxu1 %v5797_v18  ;;  %v5769_v27 = vpack.c.bf16 %v432_v25, %v400_v24  ;;  %v434_v29 = vld [vmem:[#allocation11 + $0x518] sm:$0xff]  ;;  %v431_v32 = vld [vmem:[#allocation11 + $0x500] sm:$0xff]  ;;  %v401_v33 = vld [vmem:[#allocation11 + $0x410] sm:$0xff] }
  0x99   :  { %v5801_v31 = vpack.c.bf16 %v434_v29, %v402_v28  ;;  %v433_v34 = vld [vmem:[#allocation11 + $0x510] sm:$0xff]  ;;  %v5771_v35 = vpack.c.bf16 %v431_v32, %v399_v30  ;;  %v464_v36 = vld [vmem:[#allocation11 + $0x608] sm:$0xff]  ;;  %v466_v38 = vld [vmem:[#allocation11 + $0x618] sm:$0xff]  ;;  %p7223_p12 = pnand %p7222_p11, %p7216_p8 }
  0x9a   :  { %5768 = vmatpush1.bf16.msra.mxu0 %v5767_v22  ;;  %v496_v37 = vld [vmem:[#allocation11 + $0x708] sm:$0xff]  ;;  %v5803_v39 = vpack.c.bf16 %v433_v34, %v401_v33  ;;  %v498_v41 = vld [vmem:[#allocation11 + $0x718] sm:$0xff]  ;;  %v463_v42 = vld [vmem:[#allocation11 + $0x600] sm:$0xff] }
  0x9b   :  { %5800 = vmatpush1.bf16.msra.mxu1 %v5799_v26  ;;  %5770 = vmatprep.subr.bf16.mxu0 %v5769_v27  ;;  %v5773_v40 = vpack.c.bf16 %v496_v37, %v464_v36  ;;  %v495_v43 = vld [vmem:[#allocation11 + $0x700] sm:$0xff]  ;;  %v5805_v44 = vpack.c.bf16 %v498_v41, %v466_v38  ;;  %v465_v45 = vld [vmem:[#allocation11 + $0x610] sm:$0xff]  ;;  %v528_v47 = vld [vmem:[#allocation11 + $0x808] sm:$0xff] }
  0x9c   :  { %5802 = vmatprep.subr.bf16.mxu1 %v5801_v31  ;;  %v497_v46 = vld [vmem:[#allocation11 + $0x710] sm:$0xff]  ;;  %v560_v48 = vld [vmem:[#allocation11 + $0x908] sm:$0xff]  ;;  %v530_v49 = vld [vmem:[#allocation11 + $0x818] sm:$0xff]  ;;  %v5775_v51 = vpack.c.bf16 %v495_v43, %v463_v42 }
  0x9d   :  { %v562_v50 = vld [vmem:[#allocation11 + $0x918] sm:$0xff]  ;;  %v5807_v52 = vpack.c.bf16 %v497_v46, %v465_v45  ;;  %v5777_v53 = vpack.c.bf16 %v560_v48, %v528_v47  ;;  %v527_v54 = vld [vmem:[#allocation11 + $0x800] sm:$0xff]  ;;  %v529_v56 = vld [vmem:[#allocation11 + $0x810] sm:$0xff] }
  0x9e   :  { %5772 = vmatpush1.bf16.msra.mxu0 %v5771_v35  ;;  %v559_v55 = vld [vmem:[#allocation11 + $0x900] sm:$0xff]  ;;  %v5809_v57 = vpack.c.bf16 %v562_v50, %v530_v49  ;;  %v561_v58 = vld [vmem:[#allocation11 + $0x910] sm:$0xff]  ;;  %v592_v59 = vld [vmem:[#allocation11 + $0xa08] sm:$0xff] }
  0x9f   :  { %5804 = vmatpush1.bf16.msra.mxu1 %v5803_v39  ;;  %5774 = vmatprep.subr.bf16.mxu0 %v5773_v40  ;;  %v624_v60 = vld [vmem:[#allocation11 + $0xb08] sm:$0xff]  ;;  %v594_v61 = vld [vmem:[#allocation11 + $0xa18] sm:$0xff]  ;;  %v5779_v63 = vpack.c.bf16 %v559_v55, %v527_v54  ;;  %v5811_v1 = vpack.c.bf16 %v561_v58, %v529_v56  ;;  %v591_v3 = vld [vmem:[#allocation11 + $0xa00] sm:$0xff] }
  0xa0   :  { %5806 = vmatprep.subr.bf16.mxu1 %v5805_v44  ;;  %v626_v62 = vld [vmem:[#allocation11 + $0xb18] sm:$0xff]  ;;  %v5781_v2 = vpack.c.bf16 %v624_v60, %v592_v59  ;;  %v623_v4 = vld [vmem:[#allocation11 + $0xb00] sm:$0xff]  ;;  %v593_v5 = vld [vmem:[#allocation11 + $0xa10] sm:$0xff] }
  0xa1   :  { %v5813_v6 = vpack.c.bf16 %v626_v62, %v594_v61  ;;  %v625_v7 = vld [vmem:[#allocation11 + $0xb10] sm:$0xff]  ;;  %v656_v8 = vld [vmem:[#allocation11 + $0xc08] sm:$0xff]  ;;  %v658_v10 = vld [vmem:[#allocation11 + $0xc18] sm:$0xff]  ;;  %v5783_v12 = vpack.c.bf16 %v623_v4, %v591_v3 }
  0xa2   :  { %5776 = vmatpush1.bf16.msra.mxu0 %v5775_v51  ;;  %v688_v9 = vld [vmem:[#allocation11 + $0xd08] sm:$0xff]  ;;  %v690_v11 = vld [vmem:[#allocation11 + $0xd18] sm:$0xff]  ;;  %v5815_v13 = vpack.c.bf16 %v625_v7, %v593_v5  ;;  %v655_v15 = vld [vmem:[#allocation11 + $0xc00] sm:$0xff] }
  0xa3   :  { %5808 = vmatpush1.bf16.msra.mxu1 %v5807_v52  ;;  %5778 = vmatprep.subr.bf16.mxu0 %v5777_v53  ;;  %v5785_v14 = vpack.c.bf16 %v688_v9, %v656_v8  ;;  %v687_v16 = vld [vmem:[#allocation11 + $0xd00] sm:$0xff]  ;;  %v657_v17 = vld [vmem:[#allocation11 + $0xc10] sm:$0xff]  ;;  %v5817_v18 = vpack.c.bf16 %v690_v11, %v658_v10  ;;  %v720_v20 = vld [vmem:[#allocation11 + $0xe08] sm:$0xff] }
  0xa4   :  { %5810 = vmatprep.subr.bf16.mxu1 %v5809_v57  ;;  %v689_v19 = vld [vmem:[#allocation11 + $0xd10] sm:$0xff]  ;;  %v752_v21 = vld [vmem:[#allocation11 + $0xf08] sm:$0xff]  ;;  %v722_v22 = vld [vmem:[#allocation11 + $0xe18] sm:$0xff]  ;;  %v5787_v24 = vpack.c.bf16 %v687_v16, %v655_v15 }
  0xa5   :  { %v754_v23 = vld [vmem:[#allocation11 + $0xf18] sm:$0xff]  ;;  %v5819_v25 = vpack.c.bf16 %v689_v19, %v657_v17  ;;  %v5789_v26 = vpack.c.bf16 %v752_v21, %v720_v20  ;;  %v719_v27 = vld [vmem:[#allocation11 + $0xe00] sm:$0xff]  ;;  %v721_v29 = vld [vmem:[#allocation11 + $0xe10] sm:$0xff] }
  0xa6   :  { %5780 = vmatpush1.bf16.msra.mxu0 %v5779_v63  ;;  %v751_v28 = vld [vmem:[#allocation11 + $0xf00] sm:$0xff]  ;;  %v5821_v30 = vpack.c.bf16 %v754_v23, %v722_v22  ;;  %v753_v31 = vld [vmem:[#allocation11 + $0xf10] sm:$0xff]  ;;  %v276_v32 = vld [vmem:[#allocation11 + $0x28] sm:$0xff] }
  0xa7   :  { %5812 = vmatpush1.bf16.msra.mxu1 %v5811_v1  ;;  %5782 = vmatprep.subr.bf16.mxu0 %v5781_v2  ;;  %v308_v33 = vld [vmem:[#allocation11 + $0x128] sm:$0xff]  ;;  %v278_v34 = vld [vmem:[#allocation11 + $0x38] sm:$0xff]  ;;  %v5791_v36 = vpack.c.bf16 %v751_v28, %v719_v27  ;;  %v5823_v37 = vpack.c.bf16 %v753_v31, %v721_v29  ;;  %v275_v39 = vld [vmem:[#allocation11 + $0x20] sm:$0xff] }
  0xa8   :  { %5814 = vmatprep.subr.bf16.mxu1 %v5813_v6  ;;  %v310_v35 = vld [vmem:[#allocation11 + $0x138] sm:$0xff]  ;;  %v5825_v38 = vpack.c.bf16 %v308_v33, %v276_v32  ;;  %v307_v40 = vld [vmem:[#allocation11 + $0x120] sm:$0xff]  ;;  %v277_v41 = vld [vmem:[#allocation11 + $0x30] sm:$0xff] }
  0xa9   :  { %v5857_v42 = vpack.c.bf16 %v310_v35, %v278_v34  ;;  %v309_v43 = vld [vmem:[#allocation11 + $0x130] sm:$0xff]  ;;  %v340_v44 = vld [vmem:[#allocation11 + $0x228] sm:$0xff]  ;;  %v342_v46 = vld [vmem:[#allocation11 + $0x238] sm:$0xff]  ;;  %v5827_v49 = vpack.c.bf16 %v307_v40, %v275_v39 }
  0xaa   :  { %5784 = vmatpush1.bf16.msra.mxu0 %v5783_v12  ;;  %v372_v45 = vld [vmem:[#allocation11 + $0x328] sm:$0xff]  ;;  %v374_v47 = vld [vmem:[#allocation11 + $0x338] sm:$0xff]  ;;  %v5859_v50 = vpack.c.bf16 %v309_v43, %v277_v41  ;;  %v339_v52 = vld [vmem:[#allocation11 + $0x220] sm:$0xff] }
  0xab   :  { %5816 = vmatpush1.bf16.msra.mxu1 %v5815_v13  ;;  %5786 = vmatprep.subr.bf16.mxu0 %v5785_v14  ;;  %v7457_v48 = vld [vmem:[#allocation7] sm:$0x3]  ;;  %v5829_v51 = vpack.c.bf16 %v372_v45, %v340_v44  ;;  %v371_v53 = vld [vmem:[#allocation11 + $0x320] sm:$0xff]  ;;  %v341_v54 = vld [vmem:[#allocation11 + $0x230] sm:$0xff]  ;;  %v5861_v55 = vpack.c.bf16 %v374_v47, %v342_v46 }
  0xac   :  { %5818 = vmatprep.subr.bf16.mxu1 %v5817_v18  ;;  %v373_v56 = vld [vmem:[#allocation11 + $0x330] sm:$0xff]  ;;  %v404_v57 = vld [vmem:[#allocation11 + $0x428] sm:$0xff]  ;;  %v406_v59 = vld [vmem:[#allocation11 + $0x438] sm:$0xff]  ;;  %v5831_v61 = vpack.c.bf16 %v371_v53, %v339_v52 }
  0xad   :  { %v436_v58 = vld [vmem:[#allocation11 + $0x528] sm:$0xff]  ;;  %v438_v60 = vld [vmem:[#allocation11 + $0x538] sm:$0xff]  ;;  %v5863_v62 = vpack.c.bf16 %v373_v56, %v341_v54  ;;  %v403_v1 = vld [vmem:[#allocation11 + $0x420] sm:$0xff] }
  0xae   :  { %5788 = vmatpush1.bf16.msra.mxu0 %v5787_v24  ;;  %v5833_v63 = vpack.c.bf16 %v436_v58, %v404_v57  ;;  %v435_v2 = vld [vmem:[#allocation11 + $0x520] sm:$0xff]  ;;  %v405_v3 = vld [vmem:[#allocation11 + $0x430] sm:$0xff]  ;;  %v5865_v4 = vpack.c.bf16 %v438_v60, %v406_v59  ;;  %v468_v6 = vld [vmem:[#allocation11 + $0x628] sm:$0xff] }
  0xaf   :  { %5820 = vmatpush1.bf16.msra.mxu1 %v5819_v25  ;;  %5790 = vmatprep.subr.bf16.mxu0 %v5789_v26  ;;  %v437_v5 = vld [vmem:[#allocation11 + $0x530] sm:$0xff]  ;;  %v500_v7 = vld [vmem:[#allocation11 + $0x728] sm:$0xff]  ;;  %v470_v8 = vld [vmem:[#allocation11 + $0x638] sm:$0xff]  ;;  %v5835_v10 = vpack.c.bf16 %v435_v2, %v403_v1 }
  0xb0   :  { %5822 = vmatprep.subr.bf16.mxu1 %v5821_v30  ;;  %v502_v9 = vld [vmem:[#allocation11 + $0x738] sm:$0xff]  ;;  %v5867_v11 = vpack.c.bf16 %v437_v5, %v405_v3  ;;  %v5837_v12 = vpack.c.bf16 %v500_v7, %v468_v6  ;;  %v467_v13 = vld [vmem:[#allocation11 + $0x620] sm:$0xff]  ;;  %v469_v15 = vld [vmem:[#allocation11 + $0x630] sm:$0xff] }
  0xb1   :  { %v499_v14 = vld [vmem:[#allocation11 + $0x720] sm:$0xff]  ;;  %v5869_v16 = vpack.c.bf16 %v502_v9, %v470_v8  ;;  %v501_v17 = vld [vmem:[#allocation11 + $0x730] sm:$0xff]  ;;  %v532_v18 = vld [vmem:[#allocation11 + $0x828] sm:$0xff] }
  0xb2   :  { %5792 = vmatpush1.bf16.msra.mxu0 %v5791_v36  ;;  %v564_v19 = vld [vmem:[#allocation11 + $0x928] sm:$0xff]  ;;  %v534_v20 = vld [vmem:[#allocation11 + $0x838] sm:$0xff]  ;;  %v5839_v22 = vpack.c.bf16 %v499_v14, %v467_v13  ;;  %v5871_v23 = vpack.c.bf16 %v501_v17, %v469_v15  ;;  %v531_v25 = vld [vmem:[#allocation11 + $0x820] sm:$0xff] }
  0xb3   :  { %5824 = vmatpush1.bf16.msra.mxu1 %v5823_v37  ;;  %5826 = vmatprep.subr.bf16.mxu0 %v5825_v38  ;;  %v566_v21 = vld [vmem:[#allocation11 + $0x938] sm:$0xff]  ;;  %v5841_v24 = vpack.c.bf16 %v564_v19, %v532_v18  ;;  %v563_v26 = vld [vmem:[#allocation11 + $0x920] sm:$0xff]  ;;  %v533_v27 = vld [vmem:[#allocation11 + $0x830] sm:$0xff] }
  0xb4   :  { %5858 = vmatprep.subr.bf16.mxu1 %v5857_v42  ;;  %v5873_v28 = vpack.c.bf16 %v566_v21, %v534_v20  ;;  %v565_v29 = vld [vmem:[#allocation11 + $0x930] sm:$0xff]  ;;  %v596_v30 = vld [vmem:[#allocation11 + $0xa28] sm:$0xff]  ;;  %v598_v32 = vld [vmem:[#allocation11 + $0xa38] sm:$0xff]  ;;  %v5843_v34 = vpack.c.bf16 %v563_v26, %v531_v25 }
  0xb5   :  { %848 = vmatmul.mubr.f32.vlgmr.msra.gmra.mrb[0].mxu0 %v7457_v48  ;;  %v628_v31 = vld [vmem:[#allocation11 + $0xb28] sm:$0xff]  ;;  %v630_v33 = vld [vmem:[#allocation11 + $0xb38] sm:$0xff]  ;;  %v5875_v35 = vpack.c.bf16 %v565_v29, %v533_v27  ;;  %v595_v37 = vld [vmem:[#allocation11 + $0xa20] sm:$0xff] }
  0xb6   :  { %919 = vmatmul.mubr.f32.vlgmr.msra.gmra.mrb[0].mxu1 %v7457_v48  ;;  %5828 = vmatpush1.bf16.msra.mxu0 %v5827_v49  ;;  %v5845_v36 = vpack.c.bf16 %v628_v31, %v596_v30  ;;  %v627_v38 = vld [vmem:[#allocation11 + $0xb20] sm:$0xff]  ;;  %v597_v39 = vld [vmem:[#allocation11 + $0xa30] sm:$0xff]  ;;  %v5877_v40 = vpack.c.bf16 %v630_v33, %v598_v32  ;;  %v660_v42 = vld [vmem:[#allocation11 + $0xc28] sm:$0xff] }
  0xb7   :  { %5860 = vmatpush1.bf16.msra.mxu1 %v5859_v50  ;;  %5830 = vmatprep.subr.bf16.mxu0 %v5829_v51  ;;  %v629_v41 = vld [vmem:[#allocation11 + $0xb30] sm:$0xff]  ;;  %v692_v43 = vld [vmem:[#allocation11 + $0xd28] sm:$0xff]  ;;  %v662_v44 = vld [vmem:[#allocation11 + $0xc38] sm:$0xff]  ;;  %v5847_v46 = vpack.c.bf16 %v627_v38, %v595_v37 }
  0xb8   :  { %5862 = vmatprep.subr.bf16.mxu1 %v5861_v55  ;;  %989 = vmatprep.mubr.f32.mxu0 %v7285_v0  ;;  %v694_v45 = vld [vmem:[#allocation11 + $0xd38] sm:$0xff]  ;;  %v5879_v47 = vpack.c.bf16 %v629_v41, %v597_v39  ;;  %v5849_v49 = vpack.c.bf16 %v692_v43, %v660_v42  ;;  %v659_v50 = vld [vmem:[#allocation11 + $0xc20] sm:$0xff]  ;;  %v661_v52 = vld [vmem:[#allocation11 + $0xc30] sm:$0xff] }
  0xb9   :  { %1060 = vmatprep.mubr.f32.mxu1 %v7285_v0  ;;  %v691_v51 = vld [vmem:[#allocation11 + $0xd20] sm:$0xff]  ;;  %v5881_v53 = vpack.c.bf16 %v694_v45, %v662_v44  ;;  %v693_v54 = vld [vmem:[#allocation11 + $0xd30] sm:$0xff]  ;;  %v724_v55 = vld [vmem:[#allocation11 + $0xe28] sm:$0xff] }
  0xba   :  { %5832 = vmatpush1.bf16.msra.mxu0 %v5831_v61  ;;  %v756_v56 = vld [vmem:[#allocation11 + $0xf28] sm:$0xff]  ;;  %v726_v57 = vld [vmem:[#allocation11 + $0xe38] sm:$0xff]  ;;  %v5851_v59 = vpack.c.bf16 %v691_v51, %v659_v50  ;;  %v5883_v60 = vpack.c.bf16 %v693_v54, %v661_v52  ;;  %v725_v1 = vld [vmem:[#allocation11 + $0xe30] sm:$0xff] }
  0xbb   :  { %5864 = vmatpush1.bf16.msra.mxu1 %v5863_v62  ;;  %5834 = vmatprep.subr.bf16.mxu0 %v5833_v63  ;;  %v758_v58 = vld [vmem:[#allocation11 + $0xf38] sm:$0xff]  ;;  %v5853_v61 = vpack.c.bf16 %v756_v56, %v724_v55  ;;  %v723_v62 = vld [vmem:[#allocation11 + $0xe20] sm:$0xff]  ;;  %v757_v3 = vld [vmem:[#allocation11 + $0xf30] sm:$0xff] }
  0xbc   :  { %5866 = vmatprep.subr.bf16.mxu1 %v5865_v4  ;;  %v755_v63 = vld [vmem:[#allocation11 + $0xf20] sm:$0xff]  ;;  %v5885_v2 = vpack.c.bf16 %v758_v58, %v726_v57  ;;  %v280_v4 = vld [vmem:[#allocation11 + $0x48] sm:$0xff]  ;;  %v282_v6 = vld [vmem:[#allocation11 + $0x58] sm:$0xff]  ;;  %v5887_v9 = vpack.c.bf16 %v757_v3, %v725_v1 }
  0xbd   :  { %v312_v5 = vld [vmem:[#allocation11 + $0x148] sm:$0xff]  ;;  %v314_v7 = vld [vmem:[#allocation11 + $0x158] sm:$0xff]  ;;  %v5855_v8 = vpack.c.bf16 %v755_v63, %v723_v62  ;;  %v281_v13 = vld [vmem:[#allocation11 + $0x50] sm:$0xff] }
  0xbe   :  { %5836 = vmatpush1.bf16.msra.mxu0 %v5835_v10  ;;  %v5889_v10 = vpack.c.bf16 %v312_v5, %v280_v4  ;;  %v5921_v14 = vpack.c.bf16 %v314_v7, %v282_v6  ;;  %v313_v15 = vld [vmem:[#allocation11 + $0x150] sm:$0xff]  ;;  %v376_v17 = vld [vmem:[#allocation11 + $0x348] sm:$0xff]  ;;  %v346_v18 = vld [vmem:[#allocation11 + $0x258] sm:$0xff] }
  0xbf   :  { %5868 = vmatpush1.bf16.msra.mxu1 %v5867_v11  ;;  %5838 = vmatprep.subr.bf16.mxu0 %v5837_v12  ;;  %v279_v11 = vld [vmem:[#allocation11 + $0x40] sm:$0xff]  ;;  %v378_v19 = vld [vmem:[#allocation11 + $0x358] sm:$0xff]  ;;  %v5923_v21 = vpack.c.bf16 %v313_v15, %v281_v13  ;;  %v345_v25 = vld [vmem:[#allocation11 + $0x250] sm:$0xff] }
  0xc0   :  { %5870 = vmatprep.subr.bf16.mxu1 %v5869_v16  ;;  %v311_v12 = vld [vmem:[#allocation11 + $0x140] sm:$0xff]  ;;  %v344_v16 = vld [vmem:[#allocation11 + $0x248] sm:$0xff]  ;;  %v5925_v26 = vpack.c.bf16 %v378_v19, %v346_v18  ;;  %v377_v27 = vld [vmem:[#allocation11 + $0x350] sm:$0xff] }
  0xc1   :  { %v5891_v20 = vpack.c.bf16 %v311_v12, %v279_v11  ;;  %v440_v29 = vld [vmem:[#allocation11 + $0x548] sm:$0xff]  ;;  %v410_v30 = vld [vmem:[#allocation11 + $0x458] sm:$0xff]  ;;  %v5927_v33 = vpack.c.bf16 %v377_v27, %v345_v25  ;;  %v409_v37 = vld [vmem:[#allocation11 + $0x450] sm:$0xff] }
  0xc2   :  { %5840 = vmatpush1.bf16.msra.mxu0 %v5839_v22  ;;  %v5893_v22 = vpack.c.bf16 %v376_v17, %v344_v16  ;;  %v442_v31 = vld [vmem:[#allocation11 + $0x558] sm:$0xff]  ;;  %v441_v39 = vld [vmem:[#allocation11 + $0x550] sm:$0xff]  ;;  %v504_v41 = vld [vmem:[#allocation11 + $0x748] sm:$0xff] }
  0xc3   :  { %5872 = vmatpush1.bf16.msra.mxu1 %v5871_v23  ;;  %5842 = vmatprep.subr.bf16.mxu0 %v5841_v24  ;;  %v343_v23 = vld [vmem:[#allocation11 + $0x240] sm:$0xff]  ;;  %v5929_v38 = vpack.c.bf16 %v442_v31, %v410_v30  ;;  %v474_v42 = vld [vmem:[#allocation11 + $0x658] sm:$0xff]  ;;  %v5931_v45 = vpack.c.bf16 %v441_v39, %v409_v37  ;;  %v473_v50 = vld [vmem:[#allocation11 + $0x650] sm:$0xff] }
  0xc4   :  { %5874 = vmatprep.subr.bf16.mxu1 %v5873_v28  ;;  %v375_v24 = vld [vmem:[#allocation11 + $0x340] sm:$0xff]  ;;  %v408_v28 = vld [vmem:[#allocation11 + $0x448] sm:$0xff]  ;;  %v506_v43 = vld [vmem:[#allocation11 + $0x758] sm:$0xff] }
  0xc5   :  { %v5895_v32 = vpack.c.bf16 %v375_v24, %v343_v23  ;;  %v5933_v51 = vpack.c.bf16 %v506_v43, %v474_v42  ;;  %v505_v52 = vld [vmem:[#allocation11 + $0x750] sm:$0xff]  ;;  %v568_v54 = vld [vmem:[#allocation11 + $0x948] sm:$0xff]  ;;  %v538_v55 = vld [vmem:[#allocation11 + $0x858] sm:$0xff] }
  0xc6   :  { %5844 = vmatpush1.bf16.msra.mxu0 %v5843_v34  ;;  %v5897_v34 = vpack.c.bf16 %v440_v29, %v408_v28  ;;  %v570_v56 = vld [vmem:[#allocation11 + $0x958] sm:$0xff]  ;;  %v5935_v58 = vpack.c.bf16 %v505_v52, %v473_v50  ;;  %v537_v62 = vld [vmem:[#allocation11 + $0x850] sm:$0xff]  ;;  %v632_v3 = vld [vmem:[#allocation11 + $0xb48] sm:$0xff] }
  0xc7   :  { %5876 = vmatpush1.bf16.msra.mxu1 %v5875_v35  ;;  %5846 = vmatprep.subr.bf16.mxu0 %v5845_v36  ;;  %v407_v35 = vld [vmem:[#allocation11 + $0x440] sm:$0xff]  ;;  %v5937_v63 = vpack.c.bf16 %v570_v56, %v538_v55  ;;  %v569_v1 = vld [vmem:[#allocation11 + $0x950] sm:$0xff]  ;;  %v602_v4 = vld [vmem:[#allocation11 + $0xa58] sm:$0xff] }
  0xc8   :  { %5878 = vmatprep.subr.bf16.mxu1 %v5877_v40  ;;  %v439_v36 = vld [vmem:[#allocation11 + $0x540] sm:$0xff]  ;;  %v472_v40 = vld [vmem:[#allocation11 + $0x648] sm:$0xff]  ;;  %v634_v5 = vld [vmem:[#allocation11 + $0xb58] sm:$0xff]  ;;  %v5939_v7 = vpack.c.bf16 %v569_v1, %v537_v62 }
  0xc9   :  { %v5899_v44 = vpack.c.bf16 %v439_v36, %v407_v35  ;;  %v601_v11 = vld [vmem:[#allocation11 + $0xa50] sm:$0xff]  ;;  %v5941_v12 = vpack.c.bf16 %v634_v5, %v602_v4  ;;  %v696_v15 = vld [vmem:[#allocation11 + $0xd48] sm:$0xff]  ;;  %v666_v16 = vld [vmem:[#allocation11 + $0xc58] sm:$0xff] }
  0xca   :  { %5848 = vmatpush1.bf16.msra.mxu0 %v5847_v46  ;;  %v5901_v46 = vpack.c.bf16 %v504_v41, %v472_v40  ;;  %v633_v13 = vld [vmem:[#allocation11 + $0xb50] sm:$0xff]  ;;  %v698_v17 = vld [vmem:[#allocation11 + $0xd58] sm:$0xff]  ;;  %v760_v27 = vld [vmem:[#allocation11 + $0xf48] sm:$0xff] }
  0xcb   :  { %5880 = vmatpush1.bf16.msra.mxu1 %v5879_v47  ;;  %5850 = vmatprep.subr.bf16.mxu0 %v5849_v49  ;;  %v471_v47 = vld [vmem:[#allocation11 + $0x640] sm:$0xff]  ;;  %v5943_v19 = vpack.c.bf16 %v633_v13, %v601_v11  ;;  %v665_v23 = vld [vmem:[#allocation11 + $0xc50] sm:$0xff]  ;;  %v5945_v24 = vpack.c.bf16 %v698_v17, %v666_v16  ;;  %v730_v28 = vld [vmem:[#allocation11 + $0xe58] sm:$0xff] }
  0xcc   :  { %5882 = vmatprep.subr.bf16.mxu1 %v5881_v53  ;;  %v503_v49 = vld [vmem:[#allocation11 + $0x740] sm:$0xff]  ;;  %v536_v53 = vld [vmem:[#allocation11 + $0x848] sm:$0xff]  ;;  %v697_v25 = vld [vmem:[#allocation11 + $0xd50] sm:$0xff] }
  0xcd   :  { %v5903_v57 = vpack.c.bf16 %v503_v49, %v471_v47  ;;  %v762_v29 = vld [vmem:[#allocation11 + $0xf58] sm:$0xff]  ;;  %v5947_v31 = vpack.c.bf16 %v697_v25, %v665_v23  ;;  %v729_v35 = vld [vmem:[#allocation11 + $0xe50] sm:$0xff]  ;;  %v316_v39 = vld [vmem:[#allocation11 + $0x168] sm:$0xff] }
  0xce   :  { %5852 = vmatpush1.bf16.msra.mxu0 %v5851_v59  ;;  %v5905_v59 = vpack.c.bf16 %v568_v54, %v536_v53  ;;  %v5949_v36 = vpack.c.bf16 %v762_v29, %v730_v28  ;;  %v761_v37 = vld [vmem:[#allocation11 + $0xf50] sm:$0xff]  ;;  %v286_v40 = vld [vmem:[#allocation11 + $0x78] sm:$0xff]  ;;  %v380_v52 = vld [vmem:[#allocation11 + $0x368] sm:$0xff] }
  0xcf   :  { %5884 = vmatpush1.bf16.msra.mxu1 %v5883_v60  ;;  %5854 = vmatprep.subr.bf16.mxu0 %v5853_v61  ;;  %v535_v60 = vld [vmem:[#allocation11 + $0x840] sm:$0xff]  ;;  %v318_v41 = vld [vmem:[#allocation11 + $0x178] sm:$0xff]  ;;  %v5951_v43 = vpack.c.bf16 %v761_v37, %v729_v35  ;;  %v285_v47 = vld [vmem:[#allocation11 + $0x70] sm:$0xff] }
  0xd0   :  { %5886 = vmatprep.subr.bf16.mxu1 %v5885_v2  ;;  %v567_v61 = vld [vmem:[#allocation11 + $0x940] sm:$0xff]  ;;  %v600_v2 = vld [vmem:[#allocation11 + $0xa48] sm:$0xff]  ;;  %v5985_v49 = vpack.c.bf16 %v318_v41, %v286_v40  ;;  %v317_v50 = vld [vmem:[#allocation11 + $0x170] sm:$0xff] }
  0xd1   :  { %v5907_v6 = vpack.c.bf16 %v567_v61, %v535_v60  ;;  %v350_v53 = vld [vmem:[#allocation11 + $0x278] sm:$0xff]  ;;  %v5987_v56 = vpack.c.bf16 %v317_v50, %v285_v47  ;;  %v349_v60 = vld [vmem:[#allocation11 + $0x270] sm:$0xff]  ;;  %v444_v1 = vld [vmem:[#allocation11 + $0x568] sm:$0xff] }
  0xd2   :  { %5856 = vmatpush1.bf16.msra.mxu0 %v5855_v8  ;;  %v5909_v8 = vpack.c.bf16 %v632_v3, %v600_v2  ;;  %v382_v54 = vld [vmem:[#allocation11 + $0x378] sm:$0xff]  ;;  %v381_v62 = vld [vmem:[#allocation11 + $0x370] sm:$0xff]  ;;  %v508_v13 = vld [vmem:[#allocation11 + $0x768] sm:$0xff] }
  0xd3   :  { %5888 = vmatpush1.bf16.msra.mxu1 %v5887_v9  ;;  %5890 = vmatprep.subr.bf16.mxu0 %v5889_v10  ;;  %v599_v9 = vld [vmem:[#allocation11 + $0xa40] sm:$0xff]  ;;  %v5989_v61 = vpack.c.bf16 %v382_v54, %v350_v53  ;;  %v414_v2 = vld [vmem:[#allocation11 + $0x478] sm:$0xff]  ;;  %v5991_v5 = vpack.c.bf16 %v381_v62, %v349_v60  ;;  %v445_v11 = vld [vmem:[#allocation11 + $0x570] sm:$0xff] }
  0xd4   :  { %5922 = vmatprep.subr.bf16.mxu1 %v5921_v14  ;;  %v631_v10 = vld [vmem:[#allocation11 + $0xb40] sm:$0xff]  ;;  %v664_v14 = vld [vmem:[#allocation11 + $0xc48] sm:$0xff]  ;;  %v446_v3 = vld [vmem:[#allocation11 + $0x578] sm:$0xff] }
  0xd5   :  { %990 = vmatmul.mubr.f32.vlgmr.msra.gmra.mrb[2].mxu0 %v7457_v48  ;;  %v5911_v18 = vpack.c.bf16 %v631_v10, %v599_v9  ;;  %v413_v9 = vld [vmem:[#allocation11 + $0x470] sm:$0xff]  ;;  %v5993_v10 = vpack.c.bf16 %v446_v3, %v414_v2  ;;  %v572_v25 = vld [vmem:[#allocation11 + $0x968] sm:$0xff] }
  0xd6   :  { %1061 = vmatmul.mubr.f32.vlgmr.msra.gmra.mrb[2].mxu1 %v7457_v48  ;;  %5892 = vmatpush1.bf16.msra.mxu0 %v5891_v20  ;;  %v5913_v20 = vpack.c.bf16 %v696_v15, %v664_v14  ;;  %v478_v14 = vld [vmem:[#allocation11 + $0x678] sm:$0xff]  ;;  %v5995_v17 = vpack.c.bf16 %v445_v11, %v413_v9  ;;  %v509_v23 = vld [vmem:[#allocation11 + $0x770] sm:$0xff]  ;;  %v636_v37 = vld [vmem:[#allocation11 + $0xb68] sm:$0xff] }
  0xd7   :  { %5924 = vmatpush1.bf16.msra.mxu1 %v5923_v21  ;;  %5894 = vmatprep.subr.bf16.mxu0 %v5893_v22  ;;  %v663_v21 = vld [vmem:[#allocation11 + $0xc40] sm:$0xff]  ;;  %v510_v15 = vld [vmem:[#allocation11 + $0x778] sm:$0xff]  ;;  %v573_v35 = vld [vmem:[#allocation11 + $0x970] sm:$0xff] }
  0xd8   :  { %5926 = vmatprep.subr.bf16.mxu1 %v5925_v26  ;;  %1131 = vmatprep.mubr.f32.mxu0 %v7285_v0  ;;  %v695_v22 = vld [vmem:[#allocation11 + $0xd40] sm:$0xff]  ;;  %v728_v26 = vld [vmem:[#allocation11 + $0xe48] sm:$0xff]  ;;  %v637_v47 = vld [vmem:[#allocation11 + $0xb70] sm:$0xff] }
  0xd9   :  { %1202 = vmatprep.mubr.f32.mxu1 %v7285_v0  ;;  %v5915_v30 = vpack.c.bf16 %v695_v22, %v663_v21  ;;  %v477_v21 = vld [vmem:[#allocation11 + $0x670] sm:$0xff]  ;;  %v5997_v22 = vpack.c.bf16 %v510_v15, %v478_v14  ;;  %v700_v50 = vld [vmem:[#allocation11 + $0xd68] sm:$0xff] }
  0xda   :  { %5896 = vmatpush1.bf16.msra.mxu0 %v5895_v32  ;;  %v5917_v32 = vpack.c.bf16 %v760_v27, %v728_v26  ;;  %v542_v26 = vld [vmem:[#allocation11 + $0x878] sm:$0xff]  ;;  %v5999_v29 = vpack.c.bf16 %v509_v23, %v477_v21  ;;  %v701_v60 = vld [vmem:[#allocation11 + $0xd70] sm:$0xff]  ;;  %v764_v62 = vld [vmem:[#allocation11 + $0xf68] sm:$0xff] }
  0xdb   :  { %5928 = vmatpush1.bf16.msra.mxu1 %v5927_v33  ;;  %5898 = vmatprep.subr.bf16.mxu0 %v5897_v34  ;;  %v727_v33 = vld [vmem:[#allocation11 + $0xe40] sm:$0xff]  ;;  %v574_v27 = vld [vmem:[#allocation11 + $0x978] sm:$0xff]  ;;  %v765_v9 = vld [vmem:[#allocation11 + $0xf70] sm:$0xff] }
  0xdc   :  { %5930 = vmatprep.subr.bf16.mxu1 %v5929_v38  ;;  %v759_v34 = vld [vmem:[#allocation11 + $0xf40] sm:$0xff]  ;;  %v284_v38 = vld [vmem:[#allocation11 + $0x68] sm:$0xff]  ;;  %v321_v21 = vld [vmem:[#allocation11 + $0x190] sm:$0xff] }
  0xdd   :  { %v5919_v42 = vpack.c.bf16 %v759_v34, %v727_v33  ;;  %v541_v33 = vld [vmem:[#allocation11 + $0x870] sm:$0xff]  ;;  %v6001_v34 = vpack.c.bf16 %v574_v27, %v542_v26  ;;  %v320_v11 = vld [vmem:[#allocation11 + $0x188] sm:$0xff] }
  0xde   :  { %5900 = vmatpush1.bf16.msra.mxu0 %v5899_v44  ;;  %v5953_v44 = vpack.c.bf16 %v316_v39, %v284_v38  ;;  %v606_v38 = vld [vmem:[#allocation11 + $0xa78] sm:$0xff]  ;;  %v6003_v41 = vpack.c.bf16 %v573_v35, %v541_v33  ;;  %v384_v23 = vld [vmem:[#allocation11 + $0x388] sm:$0xff]  ;;  %v385_v33 = vld [vmem:[#allocation11 + $0x390] sm:$0xff] }
  0xdf   :  { %5932 = vmatpush1.bf16.msra.mxu1 %v5931_v45  ;;  %5902 = vmatprep.subr.bf16.mxu0 %v5901_v46  ;;  %v283_v45 = vld [vmem:[#allocation11 + $0x60] sm:$0xff]  ;;  %v638_v39 = vld [vmem:[#allocation11 + $0xb78] sm:$0xff]  ;;  %v448_v35 = vld [vmem:[#allocation11 + $0x588] sm:$0xff] }
  0xe0   :  { %5934 = vmatprep.subr.bf16.mxu1 %v5933_v51  ;;  %v315_v46 = vld [vmem:[#allocation11 + $0x160] sm:$0xff]  ;;  %v348_v51 = vld [vmem:[#allocation11 + $0x268] sm:$0xff] }
  0xe1   :  { %v5955_v55 = vpack.c.bf16 %v315_v46, %v283_v45  ;;  %v605_v45 = vld [vmem:[#allocation11 + $0xa70] sm:$0xff]  ;;  %v6005_v46 = vpack.c.bf16 %v638_v39, %v606_v38 }
  0xe2   :  { %5904 = vmatpush1.bf16.msra.mxu0 %v5903_v57  ;;  %v5957_v57 = vpack.c.bf16 %v380_v52, %v348_v51  ;;  %v670_v51 = vld [vmem:[#allocation11 + $0xc78] sm:$0xff]  ;;  %v6007_v54 = vpack.c.bf16 %v637_v47, %v605_v45  ;;  %v449_v45 = vld [vmem:[#allocation11 + $0x590] sm:$0xff]  ;;  %v512_v47 = vld [vmem:[#allocation11 + $0x788] sm:$0xff] }
  0xe3   :  { %5936 = vmatpush1.bf16.msra.mxu1 %v5935_v58  ;;  %5906 = vmatprep.subr.bf16.mxu0 %v5905_v59  ;;  %v347_v58 = vld [vmem:[#allocation11 + $0x260] sm:$0xff]  ;;  %v702_v52 = vld [vmem:[#allocation11 + $0xd78] sm:$0xff] }
  0xe4   :  { %5938 = vmatprep.subr.bf16.mxu1 %v5937_v63  ;;  %v379_v59 = vld [vmem:[#allocation11 + $0x360] sm:$0xff]  ;;  %v412_v63 = vld [vmem:[#allocation11 + $0x468] sm:$0xff] }
  0xe5   :  { %v5959_v4 = vpack.c.bf16 %v379_v59, %v347_v58  ;;  %v669_v58 = vld [vmem:[#allocation11 + $0xc70] sm:$0xff]  ;;  %v6009_v59 = vpack.c.bf16 %v702_v52, %v670_v51 }
  0xe6   :  { %5908 = vmatpush1.bf16.msra.mxu0 %v5907_v6  ;;  %v5961_v6 = vpack.c.bf16 %v444_v1, %v412_v63  ;;  %v734_v63 = vld [vmem:[#allocation11 + $0xe78] sm:$0xff]  ;;  %v6011_v3 = vpack.c.bf16 %v701_v60, %v669_v58  ;;  %v544_v58 = vld [vmem:[#allocation11 + $0x888] sm:$0xff] }
  0xe7   :  { %5940 = vmatpush1.bf16.msra.mxu1 %v5939_v7  ;;  %5910 = vmatprep.subr.bf16.mxu0 %v5909_v8  ;;  %v411_v7 = vld [vmem:[#allocation11 + $0x460] sm:$0xff]  ;;  %v766_v1 = vld [vmem:[#allocation11 + $0xf78] sm:$0xff] }
  0xe8   :  { %5942 = vmatprep.subr.bf16.mxu1 %v5941_v12  ;;  %v443_v8 = vld [vmem:[#allocation11 + $0x560] sm:$0xff]  ;;  %v476_v12 = vld [vmem:[#allocation11 + $0x668] sm:$0xff]  ;;  %v546_v60 = vld [vmem:[#allocation11 + $0x898] sm:$0xff] }
  0xe9   :  { %v5963_v16 = vpack.c.bf16 %v443_v8, %v411_v7  ;;  %v733_v7 = vld [vmem:[#allocation11 + $0xe70] sm:$0xff]  ;;  %v6013_v8 = vpack.c.bf16 %v766_v1, %v734_v63 }
  0xea   :  { %5912 = vmatpush1.bf16.msra.mxu0 %v5911_v18  ;;  %v5965_v18 = vpack.c.bf16 %v508_v13, %v476_v12  ;;  %v290_v12 = vld [vmem:[#allocation11 + $0x98] sm:$0xff]  ;;  %v6015_v15 = vpack.c.bf16 %v765_v9, %v733_v7  ;;  %v608_v7 = vld [vmem:[#allocation11 + $0xa88] sm:$0xff] }
  0xeb   :  { %5944 = vmatpush1.bf16.msra.mxu1 %v5943_v19  ;;  %5914 = vmatprep.subr.bf16.mxu0 %v5913_v20  ;;  %v475_v19 = vld [vmem:[#allocation11 + $0x660] sm:$0xff]  ;;  %v322_v13 = vld [vmem:[#allocation11 + $0x198] sm:$0xff] }
  0xec   :  { %5946 = vmatprep.subr.bf16.mxu1 %v5945_v24  ;;  %v507_v20 = vld [vmem:[#allocation11 + $0x760] sm:$0xff]  ;;  %v540_v24 = vld [vmem:[#allocation11 + $0x868] sm:$0xff]  ;;  %v610_v9 = vld [vmem:[#allocation11 + $0xa98] sm:$0xff] }
  0xed   :  { %v5967_v28 = vpack.c.bf16 %v507_v20, %v475_v19  ;;  %v289_v19 = vld [vmem:[#allocation11 + $0x90] sm:$0xff]  ;;  %v6049_v20 = vpack.c.bf16 %v322_v13, %v290_v12 }
  0xee   :  { %5916 = vmatpush1.bf16.msra.mxu0 %v5915_v30  ;;  %v5969_v30 = vpack.c.bf16 %v572_v25, %v540_v24  ;;  %v354_v24 = vld [vmem:[#allocation11 + $0x298] sm:$0xff]  ;;  %v6051_v27 = vpack.c.bf16 %v321_v21, %v289_v19  ;;  %v672_v19 = vld [vmem:[#allocation11 + $0xc88] sm:$0xff] }
  0xef   :  { %5948 = vmatpush1.bf16.msra.mxu1 %v5947_v31  ;;  %5918 = vmatprep.subr.bf16.mxu0 %v5917_v32  ;;  %v539_v31 = vld [vmem:[#allocation11 + $0x860] sm:$0xff]  ;;  %v386_v25 = vld [vmem:[#allocation11 + $0x398] sm:$0xff] }
  0xf0   :  { %5950 = vmatprep.subr.bf16.mxu1 %v5949_v36  ;;  %v571_v32 = vld [vmem:[#allocation11 + $0x960] sm:$0xff]  ;;  %v604_v36 = vld [vmem:[#allocation11 + $0xa68] sm:$0xff]  ;;  %v674_v21 = vld [vmem:[#allocation11 + $0xc98] sm:$0xff] }
  0xf1   :  { %v5971_v40 = vpack.c.bf16 %v571_v32, %v539_v31  ;;  %v353_v31 = vld [vmem:[#allocation11 + $0x290] sm:$0xff]  ;;  %v6053_v32 = vpack.c.bf16 %v386_v25, %v354_v24 }
  0xf2   :  { %5920 = vmatpush1.bf16.msra.mxu0 %v5919_v42  ;;  %v5973_v42 = vpack.c.bf16 %v636_v37, %v604_v36  ;;  %v418_v36 = vld [vmem:[#allocation11 + $0x498] sm:$0xff]  ;;  %v6055_v39 = vpack.c.bf16 %v385_v33, %v353_v31  ;;  %v736_v31 = vld [vmem:[#allocation11 + $0xe88] sm:$0xff] }
  0xf3   :  { %5952 = vmatpush1.bf16.msra.mxu1 %v5951_v43  ;;  %5954 = vmatprep.subr.bf16.mxu0 %v5953_v44  ;;  %v603_v43 = vld [vmem:[#allocation11 + $0xa60] sm:$0xff]  ;;  %v450_v37 = vld [vmem:[#allocation11 + $0x598] sm:$0xff] }
  0xf4   :  { %5986 = vmatprep.subr.bf16.mxu1 %v5985_v49  ;;  %v635_v44 = vld [vmem:[#allocation11 + $0xb60] sm:$0xff]  ;;  %v668_v49 = vld [vmem:[#allocation11 + $0xc68] sm:$0xff]  ;;  %v738_v33 = vld [vmem:[#allocation11 + $0xe98] sm:$0xff] }
  0xf5   :  { %1132 = vmatmul.mubr.f32.vlgmr.msra.gmra.mrb[4].mxu0 %v7457_v48  ;;  %v5975_v53 = vpack.c.bf16 %v635_v44, %v603_v43  ;;  %v417_v43 = vld [vmem:[#allocation11 + $0x490] sm:$0xff]  ;;  %v6057_v44 = vpack.c.bf16 %v450_v37, %v418_v36 }
  0xf6   :  { %1203 = vmatmul.mubr.f32.vlgmr.msra.gmra.mrb[4].mxu1 %v7457_v48  ;;  %5956 = vmatpush1.bf16.msra.mxu0 %v5955_v55  ;;  %v5977_v55 = vpack.c.bf16 %v700_v50, %v668_v49  ;;  %v482_v49 = vld [vmem:[#allocation11 + $0x698] sm:$0xff]  ;;  %v6059_v51 = vpack.c.bf16 %v449_v45, %v417_v43  ;;  %v292_v43 = vld [vmem:[#allocation11 + $0xa8] sm:$0xff] }
  0xf7   :  { %5988 = vmatpush1.bf16.msra.mxu1 %v5987_v56  ;;  %5958 = vmatprep.subr.bf16.mxu0 %v5957_v57  ;;  %v667_v56 = vld [vmem:[#allocation11 + $0xc60] sm:$0xff]  ;;  %v514_v50 = vld [vmem:[#allocation11 + $0x798] sm:$0xff] }
  0xf8   :  { %5990 = vmatprep.subr.bf16.mxu1 %v5989_v61  ;;  %1273 = vmatprep.mubr.f32.mxu0 %v7285_v0  ;;  %v699_v57 = vld [vmem:[#allocation11 + $0xd60] sm:$0xff]  ;;  %v732_v61 = vld [vmem:[#allocation11 + $0xe68] sm:$0xff]  ;;  %v294_v45 = vld [vmem:[#allocation11 + $0xb8] sm:$0xff] }
  0xf9   :  { %1344 = vmatprep.mubr.f32.mxu1 %v7285_v0  ;;  %v5979_v2 = vpack.c.bf16 %v699_v57, %v667_v56  ;;  %v6061_v56 = vpack.c.bf16 %v514_v50, %v482_v49  ;;  %v513_v57 = vld [vmem:[#allocation11 + $0x790] sm:$0xff] }
  0xfa   :  { %5960 = vmatpush1.bf16.msra.mxu0 %v5959_v4  ;;  %v5981_v4 = vpack.c.bf16 %v764_v62, %v732_v61  ;;  %v578_v61 = vld [vmem:[#allocation11 + $0x998] sm:$0xff] }
  0xfb   :  { %5992 = vmatpush1.bf16.msra.mxu1 %v5991_v5  ;;  %5962 = vmatprep.subr.bf16.mxu0 %v5961_v6  ;;  %v731_v5 = vld [vmem:[#allocation11 + $0xe60] sm:$0xff] }
  0xfc   :  { %5994 = vmatprep.subr.bf16.mxu1 %v5993_v10  ;;  %v763_v6 = vld [vmem:[#allocation11 + $0xf60] sm:$0xff]  ;;  %v288_v10 = vld [vmem:[#allocation11 + $0x88] sm:$0xff] }
  0xfd   :  { %v5983_v14 = vpack.c.bf16 %v763_v6, %v731_v5  ;;  %v6065_v5 = vpack.c.bf16 %v578_v61, %v546_v60  ;;  %v577_v6 = vld [vmem:[#allocation11 + $0x990] sm:$0xff] }
  0xfe   :  { %5964 = vmatpush1.bf16.msra.mxu0 %v5963_v16  ;;  %v6017_v16 = vpack.c.bf16 %v320_v11, %v288_v10  ;;  %v642_v10 = vld [vmem:[#allocation11 + $0xb98] sm:$0xff] }
  0xff   :  { %5996 = vmatpush1.bf16.msra.mxu1 %v5995_v17  ;;  %5966 = vmatprep.subr.bf16.mxu0 %v5965_v18  ;;  %v287_v17 = vld [vmem:[#allocation11 + $0x80] sm:$0xff] }
 0x100   :  { %5998 = vmatprep.subr.bf16.mxu1 %v5997_v22  ;;  %v319_v18 = vld [vmem:[#allocation11 + $0x180] sm:$0xff]  ;;  %v352_v22 = vld [vmem:[#allocation11 + $0x288] sm:$0xff] }
 0x101   :  { %v6019_v26 = vpack.c.bf16 %v319_v18, %v287_v17  ;;  %v6069_v17 = vpack.c.bf16 %v642_v10, %v610_v9  ;;  %v641_v18 = vld [vmem:[#allocation11 + $0xb90] sm:$0xff] }
 0x102   :  { %5968 = vmatpush1.bf16.msra.mxu0 %v5967_v28  ;;  %v6021_v28 = vpack.c.bf16 %v384_v23, %v352_v22  ;;  %v706_v22 = vld [vmem:[#allocation11 + $0xd98] sm:$0xff] }
 0x103   :  { %6000 = vmatpush1.bf16.msra.mxu1 %v5999_v29  ;;  %5970 = vmatprep.subr.bf16.mxu0 %v5969_v30  ;;  %v351_v29 = vld [vmem:[#allocation11 + $0x280] sm:$0xff] }
 0x104   :  { %6002 = vmatprep.subr.bf16.mxu1 %v6001_v34  ;;  %v383_v30 = vld [vmem:[#allocation11 + $0x380] sm:$0xff]  ;;  %v416_v34 = vld [vmem:[#allocation11 + $0x488] sm:$0xff] }
 0x105   :  { %v6023_v38 = vpack.c.bf16 %v383_v30, %v351_v29  ;;  %v6073_v29 = vpack.c.bf16 %v706_v22, %v674_v21  ;;  %v705_v30 = vld [vmem:[#allocation11 + $0xd90] sm:$0xff] }
 0x106   :  { %5972 = vmatpush1.bf16.msra.mxu0 %v5971_v40  ;;  %v6025_v40 = vpack.c.bf16 %v448_v35, %v416_v34  ;;  %v770_v34 = vld [vmem:[#allocation11 + $0xf98] sm:$0xff] }
 0x107   :  { %6004 = vmatpush1.bf16.msra.mxu1 %v6003_v41  ;;  %5974 = vmatprep.subr.bf16.mxu0 %v5973_v42  ;;  %v415_v41 = vld [vmem:[#allocation11 + $0x480] sm:$0xff] }
 0x108   :  { %6006 = vmatprep.subr.bf16.mxu1 %v6005_v46  ;;  %v447_v42 = vld [vmem:[#allocation11 + $0x580] sm:$0xff]  ;;  %v480_v46 = vld [vmem:[#allocation11 + $0x688] sm:$0xff] }
 0x109   :  { %v6029_v52 = vpack.c.bf16 %v512_v47, %v480_v46  ;;  %v326_v46 = vld [vmem:[#allocation11 + $0x1b8] sm:$0xff] }
 0x10a   :  { %5976 = vmatpush1.bf16.msra.mxu0 %v5975_v53  ;;  %v479_v53 = vld [vmem:[#allocation11 + $0x680] sm:$0xff] }
 0x10b   :  { %6008 = vmatpush1.bf16.msra.mxu1 %v6007_v54  ;;  %5978 = vmatprep.subr.bf16.mxu0 %v5977_v55  ;;  %v511_v54 = vld [vmem:[#allocation11 + $0x780] sm:$0xff]  ;;  %v481_v55 = vld [vmem:[#allocation11 + $0x690] sm:$0xff] }
 0x10c   :  { %6010 = vmatprep.subr.bf16.mxu1 %v6009_v59  ;;  %v576_v59 = vld [vmem:[#allocation11 + $0x988] sm:$0xff]  ;;  %v6031_v62 = vpack.c.bf16 %v511_v54, %v479_v53  ;;  %v6063_v63 = vpack.c.bf16 %v513_v57, %v481_v55  ;;  %v6113_v53 = vpack.c.bf16 %v326_v46, %v294_v45  ;;  %v325_v54 = vld [vmem:[#allocation11 + $0x1b0] sm:$0xff]  ;;  %v358_v57 = vld [vmem:[#allocation11 + $0x2b8] sm:$0xff] }
 0x10d   :  { %v6033_v1 = vpack.c.bf16 %v576_v59, %v544_v58  ;;  %v356_v55 = vld [vmem:[#allocation11 + $0x2a8] sm:$0xff]  ;;  %v390_v58 = vld [vmem:[#allocation11 + $0x3b8] sm:$0xff] }
 0x10e   :  { %5980 = vmatpush1.bf16.msra.mxu0 %v5979_v2  ;;  %v543_v2 = vld [vmem:[#allocation11 + $0x880] sm:$0xff] }
 0x10f   :  { %6012 = vmatpush1.bf16.msra.mxu1 %v6011_v3  ;;  %5982 = vmatprep.subr.bf16.mxu0 %v5981_v4  ;;  %v575_v3 = vld [vmem:[#allocation11 + $0x980] sm:$0xff]  ;;  %v545_v4 = vld [vmem:[#allocation11 + $0x890] sm:$0xff] }
 0x110   :  { %6014 = vmatprep.subr.bf16.mxu1 %v6013_v8  ;;  %v640_v8 = vld [vmem:[#allocation11 + $0xb88] sm:$0xff]  ;;  %v6035_v11 = vpack.c.bf16 %v575_v3, %v543_v2  ;;  %v6067_v12 = vpack.c.bf16 %v577_v6, %v545_v4  ;;  %v6117_v2 = vpack.c.bf16 %v390_v58, %v358_v57  ;;  %v389_v3 = vld [vmem:[#allocation11 + $0x3b0] sm:$0xff]  ;;  %v7475_v6 = vld [vmem:[#allocation7] sm:$0x3] }
 0x111   :  { %v6037_v13 = vpack.c.bf16 %v640_v8, %v608_v7  ;;  %v420_v4 = vld [vmem:[#allocation11 + $0x4a8] sm:$0xff]  ;;  %v422_v7 = vld [vmem:[#allocation11 + $0x4b8] sm:$0xff] }
 0x112   :  { %5984 = vmatpush1.bf16.msra.mxu0 %v5983_v14  ;;  %v607_v14 = vld [vmem:[#allocation11 + $0xa80] sm:$0xff]  ;;  %v454_v8 = vld [vmem:[#allocation11 + $0x5b8] sm:$0xff] }
 0x113   :  { %6016 = vmatpush1.bf16.msra.mxu1 %v6015_v15  ;;  %6018 = vmatprep.subr.bf16.mxu0 %v6017_v16  ;;  %v639_v15 = vld [vmem:[#allocation11 + $0xb80] sm:$0xff]  ;;  %v609_v16 = vld [vmem:[#allocation11 + $0xa90] sm:$0xff] }
 0x114   :  { %6050 = vmatprep.subr.bf16.mxu1 %v6049_v20  ;;  %v704_v20 = vld [vmem:[#allocation11 + $0xd88] sm:$0xff]  ;;  %v6039_v23 = vpack.c.bf16 %v639_v15, %v607_v14  ;;  %v6071_v24 = vpack.c.bf16 %v641_v18, %v609_v16  ;;  %v421_v14 = vld [vmem:[#allocation11 + $0x4b0] sm:$0xff]  ;;  %v6121_v15 = vpack.c.bf16 %v454_v8, %v422_v7 }
 0x115   :  { %1274 = vmatmul.mubr.f32.vlgmr.msra.gmra.mrb[6].mxu0 %v7457_v48  ;;  %v6041_v25 = vpack.c.bf16 %v704_v20, %v672_v19  ;;  %v453_v16 = vld [vmem:[#allocation11 + $0x5b0] sm:$0xff]  ;;  %v516_v18 = vld [vmem:[#allocation11 + $0x7a8] sm:$0xff]  ;;  %v486_v19 = vld [vmem:[#allocation11 + $0x6b8] sm:$0xff] }
 0x116   :  { %1345 = vmatmul.mubr.f32.vlgmr.msra.gmra.mrb[6].mxu1 %v7457_v48  ;;  %6020 = vmatpush1.bf16.msra.mxu0 %v6019_v26  ;;  %v6027_v48 = vpack.c.bf16 %v447_v42, %v415_v41  ;;  %v671_v26 = vld [vmem:[#allocation11 + $0xc80] sm:$0xff]  ;;  %v6077_v41 = vpack.c.bf16 %v770_v34, %v738_v33  ;;  %v769_v42 = vld [vmem:[#allocation11 + $0xf90] sm:$0xff]  ;;  %v518_v20 = vld [vmem:[#allocation11 + $0x7b8] sm:$0xff]  ;;  %v6123_v22 = vpack.c.bf16 %v453_v16, %v421_v14 }
 0x117   :  { %6052 = vmatpush1.bf16.msra.mxu1 %v6051_v27  ;;  %6022 = vmatprep.subr.bf16.mxu0 %v6021_v28  ;;  %v703_v27 = vld [vmem:[#allocation11 + $0xd80] sm:$0xff]  ;;  %v673_v28 = vld [vmem:[#allocation11 + $0xc90] sm:$0xff]  ;;  %v328_v16 = vld [vmem:[#allocation11 + $0x1c8] sm:$0xff] }
 0x118   :  { %6054 = vmatprep.subr.bf16.mxu1 %v6053_v32  ;;  %1415 = vmatprep.mubr.f32.mxu0 %v7285_v0  ;;  %v768_v32 = vld [vmem:[#allocation11 + $0xf88] sm:$0xff]  ;;  %v6043_v35 = vpack.c.bf16 %v703_v27, %v671_v26  ;;  %v6075_v36 = vpack.c.bf16 %v705_v30, %v673_v28  ;;  %v485_v26 = vld [vmem:[#allocation11 + $0x6b0] sm:$0xff]  ;;  %v6125_v27 = vpack.c.bf16 %v518_v20, %v486_v19 }
 0x119   :  { %1486 = vmatprep.mubr.f32.mxu1 %v7285_v0  ;;  %v6045_v37 = vpack.c.bf16 %v768_v32, %v736_v31  ;;  %v517_v28 = vld [vmem:[#allocation11 + $0x7b0] sm:$0xff]  ;;  %v580_v30 = vld [vmem:[#allocation11 + $0x9a8] sm:$0xff]  ;;  %v550_v31 = vld [vmem:[#allocation11 + $0x8b8] sm:$0xff] }
 0x11a   :  { %6024 = vmatpush1.bf16.msra.mxu0 %v6023_v38  ;;  %v735_v38 = vld [vmem:[#allocation11 + $0xe80] sm:$0xff]  ;;  %v582_v32 = vld [vmem:[#allocation11 + $0x9b8] sm:$0xff]  ;;  %v6127_v34 = vpack.c.bf16 %v517_v28, %v485_v26  ;;  %v773_v14 = vld [vmem:[#allocation11 + $0xfb0] sm:$0xff] }
 0x11b   :  { %6056 = vmatpush1.bf16.msra.mxu1 %v6055_v39  ;;  %6026 = vmatprep.subr.bf16.mxu0 %v6025_v40  ;;  %v767_v39 = vld [vmem:[#allocation11 + $0xf80] sm:$0xff]  ;;  %v737_v40 = vld [vmem:[#allocation11 + $0xe90] sm:$0xff]  ;;  %v392_v28 = vld [vmem:[#allocation11 + $0x3c8] sm:$0xff] }
 0x11c   :  { %6058 = vmatprep.subr.bf16.mxu1 %v6057_v44  ;;  %v324_v44 = vld [vmem:[#allocation11 + $0x1a8] sm:$0xff]  ;;  %v6047_v47 = vpack.c.bf16 %v767_v39, %v735_v38  ;;  %v6079_v49 = vpack.c.bf16 %v769_v42, %v737_v40  ;;  %v549_v38 = vld [vmem:[#allocation11 + $0x8b0] sm:$0xff]  ;;  %v6129_v39 = vpack.c.bf16 %v582_v32, %v550_v31 }
 0x11d   :  { %v6081_v50 = vpack.c.bf16 %v324_v44, %v292_v43  ;;  %v581_v40 = vld [vmem:[#allocation11 + $0x9b0] sm:$0xff]  ;;  %v644_v42 = vld [vmem:[#allocation11 + $0xba8] sm:$0xff]  ;;  %v614_v43 = vld [vmem:[#allocation11 + $0xab8] sm:$0xff] }
 0x11e   :  { %6028 = vmatpush1.bf16.msra.mxu0 %v6027_v48  ;;  %v291_v48 = vld [vmem:[#allocation11 + $0xa0] sm:$0xff]  ;;  %v646_v44 = vld [vmem:[#allocation11 + $0xbb8] sm:$0xff]  ;;  %v6131_v46 = vpack.c.bf16 %v581_v40, %v549_v38  ;;  %v329_v26 = vld [vmem:[#allocation11 + $0x1d0] sm:$0xff] }
 0x11f   :  { %6060 = vmatpush1.bf16.msra.mxu1 %v6059_v51  ;;  %6030 = vmatprep.subr.bf16.mxu0 %v6029_v52  ;;  %v323_v51 = vld [vmem:[#allocation11 + $0x1a0] sm:$0xff]  ;;  %v293_v52 = vld [vmem:[#allocation11 + $0xb0] sm:$0xff]  ;;  %v456_v40 = vld [vmem:[#allocation11 + $0x5c8] sm:$0xff] }
 0x120   :  { %6062 = vmatprep.subr.bf16.mxu1 %v6061_v56  ;;  %v388_v56 = vld [vmem:[#allocation11 + $0x3a8] sm:$0xff]  ;;  %v6083_v59 = vpack.c.bf16 %v323_v51, %v291_v48  ;;  %v6115_v60 = vpack.c.bf16 %v325_v54, %v293_v52  ;;  %v613_v48 = vld [vmem:[#allocation11 + $0xab0] sm:$0xff]  ;;  %v6133_v51 = vpack.c.bf16 %v646_v44, %v614_v43 }
 0x121   :  { %v6085_v61 = vpack.c.bf16 %v388_v56, %v356_v55  ;;  %v645_v52 = vld [vmem:[#allocation11 + $0xbb0] sm:$0xff]  ;;  %v708_v54 = vld [vmem:[#allocation11 + $0xda8] sm:$0xff]  ;;  %v678_v55 = vld [vmem:[#allocation11 + $0xcb8] sm:$0xff] }
 0x122   :  { %6032 = vmatpush1.bf16.msra.mxu0 %v6031_v62  ;;  %v355_v62 = vld [vmem:[#allocation11 + $0x2a0] sm:$0xff]  ;;  %v710_v56 = vld [vmem:[#allocation11 + $0xdb8] sm:$0xff]  ;;  %v6135_v58 = vpack.c.bf16 %v645_v52, %v613_v48  ;;  %v393_v38 = vld [vmem:[#allocation11 + $0x3d0] sm:$0xff] }
 0x123   :  { %6064 = vmatpush1.bf16.msra.mxu1 %v6063_v63  ;;  %6034 = vmatprep.subr.bf16.mxu0 %v6033_v1  ;;  %v387_v63 = vld [vmem:[#allocation11 + $0x3a0] sm:$0xff]  ;;  %v357_v1 = vld [vmem:[#allocation11 + $0x2b0] sm:$0xff]  ;;  %v520_v52 = vld [vmem:[#allocation11 + $0x7c8] sm:$0xff] }
 0x124   :  { %6066 = vmatprep.subr.bf16.mxu1 %v6065_v5  ;;  %v452_v5 = vld [vmem:[#allocation11 + $0x5a8] sm:$0xff]  ;;  %v6087_v9 = vpack.c.bf16 %v387_v63, %v355_v62  ;;  %v6119_v10 = vpack.c.bf16 %v389_v3, %v357_v1  ;;  %v677_v62 = vld [vmem:[#allocation11 + $0xcb0] sm:$0xff]  ;;  %v6137_v63 = vpack.c.bf16 %v710_v56, %v678_v55 }
 0x125   :  { %v709_v1 = vld [vmem:[#allocation11 + $0xdb0] sm:$0xff]  ;;  %v772_v3 = vld [vmem:[#allocation11 + $0xfa8] sm:$0xff] }
 0x126   :  { %6036 = vmatpush1.bf16.msra.mxu0 %v6035_v11  ;;  %v6089_v11 = vpack.c.bf16 %v452_v5, %v420_v4  ;;  %v742_v4 = vld [vmem:[#allocation11 + $0xeb8] sm:$0xff]  ;;  %v6139_v8 = vpack.c.bf16 %v709_v1, %v677_v62  ;;  %v457_v48 = vld [vmem:[#allocation11 + $0x5d0] sm:$0xff]  ;;  %v584_v1 = vld [vmem:[#allocation11 + $0x9c8] sm:$0xff] }
 0x127   :  { %6068 = vmatpush1.bf16.msra.mxu1 %v6067_v12  ;;  %6038 = vmatprep.subr.bf16.mxu0 %v6037_v13  ;;  %v419_v12 = vld [vmem:[#allocation11 + $0x4a0] sm:$0xff]  ;;  %v774_v5 = vld [vmem:[#allocation11 + $0xfb8] sm:$0xff]  ;;  %v521_v62 = vld [vmem:[#allocation11 + $0x7d0] sm:$0xff] }
 0x128   :  { %6070 = vmatprep.subr.bf16.mxu1 %v6069_v17  ;;  %v451_v13 = vld [vmem:[#allocation11 + $0x5a0] sm:$0xff]  ;;  %v484_v17 = vld [vmem:[#allocation11 + $0x6a8] sm:$0xff] }
 0x129   :  { %v6091_v21 = vpack.c.bf16 %v451_v13, %v419_v12  ;;  %v741_v12 = vld [vmem:[#allocation11 + $0xeb0] sm:$0xff]  ;;  %v6141_v13 = vpack.c.bf16 %v774_v5, %v742_v4 }
 0x12a   :  { %6040 = vmatpush1.bf16.msra.mxu0 %v6039_v23  ;;  %v6093_v23 = vpack.c.bf16 %v516_v18, %v484_v17  ;;  %v298_v17 = vld [vmem:[#allocation11 + $0xd8] sm:$0xff]  ;;  %v6143_v20 = vpack.c.bf16 %v773_v14, %v741_v12  ;;  %v585_v12 = vld [vmem:[#allocation11 + $0x9d0] sm:$0xff]  ;;  %v648_v14 = vld [vmem:[#allocation11 + $0xbc8] sm:$0xff] }
 0x12b   :  { %6072 = vmatpush1.bf16.msra.mxu1 %v6071_v24  ;;  %6042 = vmatprep.subr.bf16.mxu0 %v6041_v25  ;;  %v483_v24 = vld [vmem:[#allocation11 + $0x6a0] sm:$0xff]  ;;  %v330_v18 = vld [vmem:[#allocation11 + $0x1d8] sm:$0xff] }
 0x12c   :  { %6074 = vmatprep.subr.bf16.mxu1 %v6073_v29  ;;  %v515_v25 = vld [vmem:[#allocation11 + $0x7a0] sm:$0xff]  ;;  %v548_v29 = vld [vmem:[#allocation11 + $0x8a8] sm:$0xff] }
 0x12d   :  { %v6095_v33 = vpack.c.bf16 %v515_v25, %v483_v24  ;;  %v297_v24 = vld [vmem:[#allocation11 + $0xd0] sm:$0xff]  ;;  %v6177_v25 = vpack.c.bf16 %v330_v18, %v298_v17 }
 0x12e   :  { %6044 = vmatpush1.bf16.msra.mxu0 %v6043_v35  ;;  %v6097_v35 = vpack.c.bf16 %v580_v30, %v548_v29  ;;  %v362_v29 = vld [vmem:[#allocation11 + $0x2d8] sm:$0xff]  ;;  %v6179_v32 = vpack.c.bf16 %v329_v26, %v297_v24  ;;  %v649_v24 = vld [vmem:[#allocation11 + $0xbd0] sm:$0xff]  ;;  %v712_v26 = vld [vmem:[#allocation11 + $0xdc8] sm:$0xff] }
 0x12f   :  { %6076 = vmatpush1.bf16.msra.mxu1 %v6075_v36  ;;  %6046 = vmatprep.subr.bf16.mxu0 %v6045_v37  ;;  %v547_v36 = vld [vmem:[#allocation11 + $0x8a0] sm:$0xff]  ;;  %v394_v30 = vld [vmem:[#allocation11 + $0x3d8] sm:$0xff] }
 0x130   :  { %6078 = vmatprep.subr.bf16.mxu1 %v6077_v41  ;;  %v579_v37 = vld [vmem:[#allocation11 + $0x9a0] sm:$0xff]  ;;  %v612_v41 = vld [vmem:[#allocation11 + $0xaa8] sm:$0xff] }
 0x131   :  { %v6099_v45 = vpack.c.bf16 %v579_v37, %v547_v36  ;;  %v361_v36 = vld [vmem:[#allocation11 + $0x2d0] sm:$0xff]  ;;  %v6181_v37 = vpack.c.bf16 %v394_v30, %v362_v29 }
 0x132   :  { %6048 = vmatpush1.bf16.msra.mxu0 %v6047_v47  ;;  %v6101_v47 = vpack.c.bf16 %v644_v42, %v612_v41  ;;  %v426_v41 = vld [vmem:[#allocation11 + $0x4d8] sm:$0xff]  ;;  %v6183_v44 = vpack.c.bf16 %v393_v38, %v361_v36  ;;  %v713_v36 = vld [vmem:[#allocation11 + $0xdd0] sm:$0xff]  ;;  %v776_v38 = vld [vmem:[#allocation11 + $0xfc8] sm:$0xff] }
 0x133   :  { %6080 = vmatpush1.bf16.msra.mxu1 %v6079_v49  ;;  %6082 = vmatprep.subr.bf16.mxu0 %v6081_v50  ;;  %v611_v49 = vld [vmem:[#allocation11 + $0xaa0] sm:$0xff]  ;;  %v458_v42 = vld [vmem:[#allocation11 + $0x5d8] sm:$0xff] }
 0x134   :  { %6114 = vmatprep.subr.bf16.mxu1 %v6113_v53  ;;  %v643_v50 = vld [vmem:[#allocation11 + $0xba0] sm:$0xff]  ;;  %v676_v53 = vld [vmem:[#allocation11 + $0xca8] sm:$0xff] }
 0x135   :  { %1416 = vmatmul.mubr.f32.vlgmr.msra.gmra.mrb[8].mxu0 %v7475_v6  ;;  %v6103_v57 = vpack.c.bf16 %v643_v50, %v611_v49  ;;  %v425_v49 = vld [vmem:[#allocation11 + $0x4d0] sm:$0xff]  ;;  %v6185_v50 = vpack.c.bf16 %v458_v42, %v426_v41 }
 0x136   :  { %1487 = vmatmul.mubr.f32.vlgmr.msra.gmra.mrb[8].mxu1 %v7475_v6  ;;  %6084 = vmatpush1.bf16.msra.mxu0 %v6083_v59  ;;  %v6105_v59 = vpack.c.bf16 %v708_v54, %v676_v53  ;;  %v490_v53 = vld [vmem:[#allocation11 + $0x6d8] sm:$0xff]  ;;  %v6187_v56 = vpack.c.bf16 %v457_v48, %v425_v49  ;;  %v777_v49 = vld [vmem:[#allocation11 + $0xfd0] sm:$0xff]  ;;  %v332_v48 = vld [vmem:[#allocation11 + $0x1e8] sm:$0xff] }
 0x137   :  { %6116 = vmatpush1.bf16.msra.mxu1 %v6115_v60  ;;  %6086 = vmatprep.subr.bf16.mxu0 %v6085_v61  ;;  %v675_v60 = vld [vmem:[#allocation11 + $0xca0] sm:$0xff]  ;;  %v522_v54 = vld [vmem:[#allocation11 + $0x7d8] sm:$0xff] }
 0x138   :  { %6118 = vmatprep.subr.bf16.mxu1 %v6117_v2  ;;  %1557 = vmatprep.mubr.f32.mxu0 %v7285_v0  ;;  %v707_v61 = vld [vmem:[#allocation11 + $0xda0] sm:$0xff]  ;;  %v740_v2 = vld [vmem:[#allocation11 + $0xea8] sm:$0xff] }
 0x139   :  { %1628 = vmatprep.mubr.f32.mxu1 %v7285_v0  ;;  %v6107_v7 = vpack.c.bf16 %v707_v61, %v675_v60  ;;  %v489_v60 = vld [vmem:[#allocation11 + $0x6d0] sm:$0xff]  ;;  %v6189_v61 = vpack.c.bf16 %v522_v54, %v490_v53 }
 0x13a   :  { %6088 = vmatpush1.bf16.msra.mxu0 %v6087_v9  ;;  %v6109_v9 = vpack.c.bf16 %v772_v3, %v740_v2  ;;  %v554_v2 = vld [vmem:[#allocation11 + $0x8d8] sm:$0xff]  ;;  %v6191_v5 = vpack.c.bf16 %v521_v62, %v489_v60  ;;  %v333_v60 = vld [vmem:[#allocation11 + $0x1f0] sm:$0xff]  ;;  %v396_v62 = vld [vmem:[#allocation11 + $0x3e8] sm:$0xff] }
 0x13b   :  { %6120 = vmatpush1.bf16.msra.mxu1 %v6119_v10  ;;  %6090 = vmatprep.subr.bf16.mxu0 %v6089_v11  ;;  %v739_v10 = vld [vmem:[#allocation11 + $0xea0] sm:$0xff]  ;;  %v586_v3 = vld [vmem:[#allocation11 + $0x9d8] sm:$0xff] }
 0x13c   :  { %6122 = vmatprep.subr.bf16.mxu1 %v6121_v15  ;;  %v771_v11 = vld [vmem:[#allocation11 + $0xfa0] sm:$0xff]  ;;  %v296_v15 = vld [vmem:[#allocation11 + $0xc8] sm:$0xff] }
 0x13d   :  { %v6111_v19 = vpack.c.bf16 %v771_v11, %v739_v10  ;;  %v553_v10 = vld [vmem:[#allocation11 + $0x8d0] sm:$0xff]  ;;  %v6193_v11 = vpack.c.bf16 %v586_v3, %v554_v2 }
 0x13e   :  { %6092 = vmatpush1.bf16.msra.mxu0 %v6091_v21  ;;  %v6145_v21 = vpack.c.bf16 %v328_v16, %v296_v15  ;;  %v618_v15 = vld [vmem:[#allocation11 + $0xad8] sm:$0xff]  ;;  %v6195_v18 = vpack.c.bf16 %v585_v12, %v553_v10  ;;  %v397_v10 = vld [vmem:[#allocation11 + $0x3f0] sm:$0xff]  ;;  %v460_v12 = vld [vmem:[#allocation11 + $0x5e8] sm:$0xff] }
 0x13f   :  { %6124 = vmatpush1.bf16.msra.mxu1 %v6123_v22  ;;  %6094 = vmatprep.subr.bf16.mxu0 %v6093_v23  ;;  %v295_v22 = vld [vmem:[#allocation11 + $0xc0] sm:$0xff]  ;;  %v650_v16 = vld [vmem:[#allocation11 + $0xbd8] sm:$0xff] }
 0x140   :  { %6126 = vmatprep.subr.bf16.mxu1 %v6125_v27  ;;  %v327_v23 = vld [vmem:[#allocation11 + $0x1c0] sm:$0xff]  ;;  %v360_v27 = vld [vmem:[#allocation11 + $0x2c8] sm:$0xff] }
 0x141   :  { %v6147_v31 = vpack.c.bf16 %v327_v23, %v295_v22  ;;  %v617_v22 = vld [vmem:[#allocation11 + $0xad0] sm:$0xff]  ;;  %v6197_v23 = vpack.c.bf16 %v650_v16, %v618_v15 }
 0x142   :  { %6096 = vmatpush1.bf16.msra.mxu0 %v6095_v33  ;;  %v6149_v33 = vpack.c.bf16 %v392_v28, %v360_v27  ;;  %v682_v27 = vld [vmem:[#allocation11 + $0xcd8] sm:$0xff]  ;;  %v6199_v30 = vpack.c.bf16 %v649_v24, %v617_v22  ;;  %v461_v22 = vld [vmem:[#allocation11 + $0x5f0] sm:$0xff]  ;;  %v524_v24 = vld [vmem:[#allocation11 + $0x7e8] sm:$0xff] }
 0x143   :  { %6128 = vmatpush1.bf16.msra.mxu1 %v6127_v34  ;;  %6098 = vmatprep.subr.bf16.mxu0 %v6097_v35  ;;  %v359_v34 = vld [vmem:[#allocation11 + $0x2c0] sm:$0xff]  ;;  %v714_v28 = vld [vmem:[#allocation11 + $0xdd8] sm:$0xff] }
 0x144   :  { %6130 = vmatprep.subr.bf16.mxu1 %v6129_v39  ;;  %v391_v35 = vld [vmem:[#allocation11 + $0x3c0] sm:$0xff]  ;;  %v424_v39 = vld [vmem:[#allocation11 + $0x4c8] sm:$0xff] }
 0x145   :  { %v6151_v43 = vpack.c.bf16 %v391_v35, %v359_v34  ;;  %v681_v34 = vld [vmem:[#allocation11 + $0xcd0] sm:$0xff]  ;;  %v6201_v35 = vpack.c.bf16 %v714_v28, %v682_v27 }
 0x146   :  { %6100 = vmatpush1.bf16.msra.mxu0 %v6099_v45  ;;  %v6153_v45 = vpack.c.bf16 %v456_v40, %v424_v39  ;;  %v746_v39 = vld [vmem:[#allocation11 + $0xed8] sm:$0xff]  ;;  %v6203_v42 = vpack.c.bf16 %v713_v36, %v681_v34  ;;  %v525_v34 = vld [vmem:[#allocation11 + $0x7f0] sm:$0xff]  ;;  %v588_v36 = vld [vmem:[#allocation11 + $0x9e8] sm:$0xff] }
 0x147   :  { %6132 = vmatpush1.bf16.msra.mxu1 %v6131_v46  ;;  %6102 = vmatprep.subr.bf16.mxu0 %v6101_v47  ;;  %v423_v46 = vld [vmem:[#allocation11 + $0x4c0] sm:$0xff]  ;;  %v778_v40 = vld [vmem:[#allocation11 + $0xfd8] sm:$0xff] }
 0x148   :  { %6134 = vmatprep.subr.bf16.mxu1 %v6133_v51  ;;  %v455_v47 = vld [vmem:[#allocation11 + $0x5c0] sm:$0xff]  ;;  %v488_v51 = vld [vmem:[#allocation11 + $0x6c8] sm:$0xff] }
 0x149   :  { %v6155_v55 = vpack.c.bf16 %v455_v47, %v423_v46  ;;  %v745_v46 = vld [vmem:[#allocation11 + $0xed0] sm:$0xff]  ;;  %v6205_v47 = vpack.c.bf16 %v778_v40, %v746_v39 }
 0x14a   :  { %6104 = vmatpush1.bf16.msra.mxu0 %v6103_v57  ;;  %v6157_v57 = vpack.c.bf16 %v520_v52, %v488_v51  ;;  %v302_v51 = vld [vmem:[#allocation11 + $0xf8] sm:$0xff]  ;;  %v6207_v54 = vpack.c.bf16 %v777_v49, %v745_v46  ;;  %v589_v46 = vld [vmem:[#allocation11 + $0x9f0] sm:$0xff]  ;;  %v652_v49 = vld [vmem:[#allocation11 + $0xbe8] sm:$0xff] }
 0x14b   :  { %6136 = vmatpush1.bf16.msra.mxu1 %v6135_v58  ;;  %6106 = vmatprep.subr.bf16.mxu0 %v6105_v59  ;;  %v487_v58 = vld [vmem:[#allocation11 + $0x6c0] sm:$0xff]  ;;  %v334_v52 = vld [vmem:[#allocation11 + $0x1f8] sm:$0xff] }
 0x14c   :  { %6138 = vmatprep.subr.bf16.mxu1 %v6137_v63  ;;  %v519_v59 = vld [vmem:[#allocation11 + $0x7c0] sm:$0xff]  ;;  %v552_v63 = vld [vmem:[#allocation11 + $0x8c8] sm:$0xff] }
 0x14d   :  { %v6159_v4 = vpack.c.bf16 %v519_v59, %v487_v58  ;;  %v301_v58 = vld [vmem:[#allocation11 + $0xf0] sm:$0xff]  ;;  %v6241_v59 = vpack.c.bf16 %v334_v52, %v302_v51 }
 0x14e   :  { %6108 = vmatpush1.bf16.msra.mxu0 %v6107_v7  ;;  %v6161_v7 = vpack.c.bf16 %v584_v1, %v552_v63  ;;  %v366_v63 = vld [vmem:[#allocation11 + $0x2f8] sm:$0xff]  ;;  %v6243_v3 = vpack.c.bf16 %v333_v60, %v301_v58  ;;  %v653_v58 = vld [vmem:[#allocation11 + $0xbf0] sm:$0xff]  ;;  %v716_v60 = vld [vmem:[#allocation11 + $0xde8] sm:$0xff] }
 0x14f   :  { %6140 = vmatpush1.bf16.msra.mxu1 %v6139_v8  ;;  %6110 = vmatprep.subr.bf16.mxu0 %v6109_v9  ;;  %v551_v8 = vld [vmem:[#allocation11 + $0x8c0] sm:$0xff]  ;;  %v398_v1 = vld [vmem:[#allocation11 + $0x3f8] sm:$0xff] }
 0x150   :  { %6142 = vmatprep.subr.bf16.mxu1 %v6141_v13  ;;  %v583_v9 = vld [vmem:[#allocation11 + $0x9c0] sm:$0xff]  ;;  %v616_v13 = vld [vmem:[#allocation11 + $0xac8] sm:$0xff] }
 0x151   :  { %v6163_v17 = vpack.c.bf16 %v583_v9, %v551_v8  ;;  %v365_v8 = vld [vmem:[#allocation11 + $0x2f0] sm:$0xff]  ;;  %v6245_v9 = vpack.c.bf16 %v398_v1, %v366_v63 }
 0x152   :  { %6112 = vmatpush1.bf16.msra.mxu0 %v6111_v19  ;;  %v6165_v19 = vpack.c.bf16 %v648_v14, %v616_v13  ;;  %v430_v13 = vld [vmem:[#allocation11 + $0x4f8] sm:$0xff]  ;;  %v6247_v16 = vpack.c.bf16 %v397_v10, %v365_v8  ;;  %v717_v8 = vld [vmem:[#allocation11 + $0xdf0] sm:$0xff]  ;;  %v780_v10 = vld [vmem:[#allocation11 + $0xfe8] sm:$0xff] }
 0x153   :  { %6144 = vmatpush1.bf16.msra.mxu1 %v6143_v20  ;;  %6146 = vmatprep.subr.bf16.mxu0 %v6145_v21  ;;  %v615_v20 = vld [vmem:[#allocation11 + $0xac0] sm:$0xff]  ;;  %v462_v14 = vld [vmem:[#allocation11 + $0x5f8] sm:$0xff] }
 0x154   :  { %6178 = vmatprep.subr.bf16.mxu1 %v6177_v25  ;;  %v647_v21 = vld [vmem:[#allocation11 + $0xbc0] sm:$0xff]  ;;  %v680_v25 = vld [vmem:[#allocation11 + $0xcc8] sm:$0xff] }
 0x155   :  { %1558 = vmatmul.mubr.f32.vlgmr.msra.gmra.mrb[10].mxu0 %v7475_v6  ;;  %v6167_v29 = vpack.c.bf16 %v647_v21, %v615_v20  ;;  %v429_v20 = vld [vmem:[#allocation11 + $0x4f0] sm:$0xff]  ;;  %v6249_v21 = vpack.c.bf16 %v462_v14, %v430_v13 }
 0x156   :  { %1629 = vmatmul.mubr.f32.vlgmr.msra.gmra.mrb[10].mxu1 %v7475_v6  ;;  %6148 = vmatpush1.bf16.msra.mxu0 %v6147_v31  ;;  %v6169_v31 = vpack.c.bf16 %v712_v26, %v680_v25  ;;  %v494_v25 = vld [vmem:[#allocation11 + $0x6f8] sm:$0xff]  ;;  %v6251_v28 = vpack.c.bf16 %v461_v22, %v429_v20  ;;  %v781_v20 = vld [vmem:[#allocation11 + $0xff0] sm:$0xff]  ;;  %v176_v22 = vld [vmem:[#allocation10 + $0x108] sm:$0xff] }
 0x157   :  { %6180 = vmatpush1.bf16.msra.mxu1 %v6179_v32  ;;  %6150 = vmatprep.subr.bf16.mxu0 %v6149_v33  ;;  %v679_v32 = vld [vmem:[#allocation11 + $0xcc0] sm:$0xff]  ;;  %v526_v26 = vld [vmem:[#allocation11 + $0x7f8] sm:$0xff] }
 0x158   :  { %6182 = vmatprep.subr.bf16.mxu1 %v6181_v37  ;;  %1699 = vmatprep.mubr.f32.mxu0 %v7285_v0  ;;  %v711_v33 = vld [vmem:[#allocation11 + $0xdc0] sm:$0xff]  ;;  %v744_v37 = vld [vmem:[#allocation11 + $0xec8] sm:$0xff] }
 0x159   :  { %1770 = vmatprep.mubr.f32.mxu1 %v7285_v0  ;;  %v6171_v41 = vpack.c.bf16 %v711_v33, %v679_v32  ;;  %v493_v32 = vld [vmem:[#allocation11 + $0x6f0] sm:$0xff]  ;;  %v6253_v33 = vpack.c.bf16 %v526_v26, %v494_v25 }
 0x15a   :  { %6152 = vmatpush1.bf16.msra.mxu0 %v6151_v43  ;;  %v6173_v43 = vpack.c.bf16 %v776_v38, %v744_v37  ;;  %v558_v37 = vld [vmem:[#allocation11 + $0x8f8] sm:$0xff]  ;;  %v6255_v40 = vpack.c.bf16 %v525_v34, %v493_v32  ;;  %v177_v32 = vld [vmem:[#allocation10 + $0x110] sm:$0xff]  ;;  %v240_v34 = vld [vmem:[#allocation10 + $0x308] sm:$0xff] }
 0x15b   :  { %6184 = vmatpush1.bf16.msra.mxu1 %v6183_v44  ;;  %6154 = vmatprep.subr.bf16.mxu0 %v6153_v45  ;;  %v743_v44 = vld [vmem:[#allocation11 + $0xec0] sm:$0xff]  ;;  %v590_v38 = vld [vmem:[#allocation11 + $0x9f8] sm:$0xff] }
 0x15c   :  { %6186 = vmatprep.subr.bf16.mxu1 %v6185_v50  ;;  %v775_v45 = vld [vmem:[#allocation11 + $0xfc0] sm:$0xff]  ;;  %v300_v50 = vld [vmem:[#allocation11 + $0xe8] sm:$0xff] }
 0x15d   :  { %v6175_v53 = vpack.c.bf16 %v775_v45, %v743_v44  ;;  %v557_v44 = vld [vmem:[#allocation11 + $0x8f0] sm:$0xff]  ;;  %v6257_v45 = vpack.c.bf16 %v590_v38, %v558_v37 }
 0x15e   :  { %6156 = vmatpush1.bf16.msra.mxu0 %v6155_v55  ;;  %v6209_v55 = vpack.c.bf16 %v332_v48, %v300_v50  ;;  %v622_v50 = vld [vmem:[#allocation11 + $0xaf8] sm:$0xff]  ;;  %v6259_v52 = vpack.c.bf16 %v589_v46, %v557_v44  ;;  %v241_v44 = vld [vmem:[#allocation10 + $0x310] sm:$0xff]  ;;  %v180_v46 = vld [vmem:[#allocation10 + $0x128] sm:$0xff] }
 0x15f   :  { %6188 = vmatpush1.bf16.msra.mxu1 %v6187_v56  ;;  %6158 = vmatprep.subr.bf16.mxu0 %v6157_v57  ;;  %v299_v56 = vld [vmem:[#allocation11 + $0xe0] sm:$0xff]  ;;  %v654_v48 = vld [vmem:[#allocation11 + $0xbf8] sm:$0xff] }
 0x160   :  { %6190 = vmatprep.subr.bf16.mxu1 %v6189_v61  ;;  %v331_v57 = vld [vmem:[#allocation11 + $0x1e0] sm:$0xff]  ;;  %v364_v61 = vld [vmem:[#allocation11 + $0x2e8] sm:$0xff] }
 0x161   :  { %v6211_v2 = vpack.c.bf16 %v331_v57, %v299_v56  ;;  %v621_v56 = vld [vmem:[#allocation11 + $0xaf0] sm:$0xff]  ;;  %v6261_v57 = vpack.c.bf16 %v654_v48, %v622_v50 }
 0x162   :  { %6160 = vmatpush1.bf16.msra.mxu0 %v6159_v4  ;;  %v6213_v4 = vpack.c.bf16 %v396_v62, %v364_v61  ;;  %v686_v61 = vld [vmem:[#allocation11 + $0xcf8] sm:$0xff]  ;;  %v6263_v1 = vpack.c.bf16 %v653_v58, %v621_v56  ;;  %v181_v56 = vld [vmem:[#allocation10 + $0x130] sm:$0xff]  ;;  %v244_v58 = vld [vmem:[#allocation10 + $0x328] sm:$0xff] }
 0x163   :  { %6192 = vmatpush1.bf16.msra.mxu1 %v6191_v5  ;;  %6162 = vmatprep.subr.bf16.mxu0 %v6161_v7  ;;  %v363_v5 = vld [vmem:[#allocation11 + $0x2e0] sm:$0xff]  ;;  %v718_v62 = vld [vmem:[#allocation11 + $0xdf8] sm:$0xff] }
 0x164   :  { %6194 = vmatprep.subr.bf16.mxu1 %v6193_v11  ;;  %v395_v7 = vld [vmem:[#allocation11 + $0x3e0] sm:$0xff]  ;;  %v428_v11 = vld [vmem:[#allocation11 + $0x4e8] sm:$0xff] }
 0x165   :  { %v6215_v15 = vpack.c.bf16 %v395_v7, %v363_v5  ;;  %v685_v5 = vld [vmem:[#allocation11 + $0xcf0] sm:$0xff]  ;;  %v6265_v7 = vpack.c.bf16 %v718_v62, %v686_v61 }
 0x166   :  { %6164 = vmatpush1.bf16.msra.mxu0 %v6163_v17  ;;  %v6217_v17 = vpack.c.bf16 %v460_v12, %v428_v11  ;;  %v750_v11 = vld [vmem:[#allocation11 + $0xef8] sm:$0xff]  ;;  %v6267_v14 = vpack.c.bf16 %v717_v8, %v685_v5  ;;  %v245_v5 = vld [vmem:[#allocation10 + $0x330] sm:$0xff]  ;;  %v184_v8 = vld [vmem:[#allocation10 + $0x148] sm:$0xff] }
 0x167   :  { %6196 = vmatpush1.bf16.msra.mxu1 %v6195_v18  ;;  %6166 = vmatprep.subr.bf16.mxu0 %v6165_v19  ;;  %v427_v18 = vld [vmem:[#allocation11 + $0x4e0] sm:$0xff]  ;;  %v782_v12 = vld [vmem:[#allocation11 + $0xff8] sm:$0xff] }
 0x168   :  { %6198 = vmatprep.subr.bf16.mxu1 %v6197_v23  ;;  %v459_v19 = vld [vmem:[#allocation11 + $0x5e0] sm:$0xff]  ;;  %v492_v23 = vld [vmem:[#allocation11 + $0x6e8] sm:$0xff] }
 0x169   :  { %v6219_v27 = vpack.c.bf16 %v459_v19, %v427_v18  ;;  %v749_v18 = vld [vmem:[#allocation11 + $0xef0] sm:$0xff]  ;;  %v6269_v19 = vpack.c.bf16 %v782_v12, %v750_v11 }
 0x16a   :  { %6168 = vmatpush1.bf16.msra.mxu0 %v6167_v29  ;;  %v6221_v29 = vpack.c.bf16 %v524_v24, %v492_v23  ;;  %v146_v23 = vld [vmem:[#allocation10 + $0x18] sm:$0xff]  ;;  %v6271_v26 = vpack.c.bf16 %v781_v20, %v749_v18  ;;  %v185_v18 = vld [vmem:[#allocation10 + $0x150] sm:$0xff]  ;;  %v248_v20 = vld [vmem:[#allocation10 + $0x348] sm:$0xff] }
 0x16b   :  { %6200 = vmatpush1.bf16.msra.mxu1 %v6199_v30  ;;  %6170 = vmatprep.subr.bf16.mxu0 %v6169_v31  ;;  %v491_v30 = vld [vmem:[#allocation11 + $0x6e0] sm:$0xff]  ;;  %v178_v24 = vld [vmem:[#allocation10 + $0x118] sm:$0xff] }
 0x16c   :  { %6202 = vmatprep.subr.bf16.mxu1 %v6201_v35  ;;  %v523_v31 = vld [vmem:[#allocation11 + $0x7e0] sm:$0xff]  ;;  %v556_v35 = vld [vmem:[#allocation11 + $0x8e8] sm:$0xff] }
 0x16d   :  { %v6223_v39 = vpack.c.bf16 %v523_v31, %v491_v30  ;;  %v145_v30 = vld [vmem:[#allocation10 + $0x10] sm:$0xff]  ;;  %v6281_v31 = vpack.c.bf16 %v178_v24, %v146_v23 }
 0x16e   :  { %6172 = vmatpush1.bf16.msra.mxu0 %v6171_v41  ;;  %v6225_v41 = vpack.c.bf16 %v588_v36, %v556_v35  ;;  %v210_v35 = vld [vmem:[#allocation10 + $0x218] sm:$0xff]  ;;  %v6283_v38 = vpack.c.bf16 %v177_v32, %v145_v30  ;;  %v249_v30 = vld [vmem:[#allocation10 + $0x350] sm:$0xff]  ;;  %v188_v32 = vld [vmem:[#allocation10 + $0x168] sm:$0xff] }
 0x16f   :  { %6204 = vmatpush1.bf16.msra.mxu1 %v6203_v42  ;;  %6174 = vmatprep.subr.bf16.mxu0 %v6173_v43  ;;  %v555_v42 = vld [vmem:[#allocation11 + $0x8e0] sm:$0xff]  ;;  %v242_v36 = vld [vmem:[#allocation10 + $0x318] sm:$0xff] }
 0x170   :  { %6206 = vmatprep.subr.bf16.mxu1 %v6205_v47  ;;  %v587_v43 = vld [vmem:[#allocation11 + $0x9e0] sm:$0xff]  ;;  %v620_v47 = vld [vmem:[#allocation11 + $0xae8] sm:$0xff] }
 0x171   :  { %v6227_v51 = vpack.c.bf16 %v587_v43, %v555_v42  ;;  %v209_v42 = vld [vmem:[#allocation10 + $0x210] sm:$0xff]  ;;  %v6285_v43 = vpack.c.bf16 %v242_v36, %v210_v35 }
 0x172   :  { %6176 = vmatpush1.bf16.msra.mxu0 %v6175_v53  ;;  %v6229_v53 = vpack.c.bf16 %v652_v49, %v620_v47  ;;  %v150_v47 = vld [vmem:[#allocation10 + $0x38] sm:$0xff]  ;;  %v6287_v48 = vpack.c.bf16 %v241_v44, %v209_v42  ;;  %v189_v42 = vld [vmem:[#allocation10 + $0x170] sm:$0xff]  ;;  %v252_v44 = vld [vmem:[#allocation10 + $0x368] sm:$0xff] }
 0x173   :  { %6208 = vmatpush1.bf16.msra.mxu1 %v6207_v54  ;;  %6210 = vmatprep.subr.bf16.mxu0 %v6209_v55  ;;  %v619_v54 = vld [vmem:[#allocation11 + $0xae0] sm:$0xff]  ;;  %v182_v49 = vld [vmem:[#allocation10 + $0x138] sm:$0xff] }
 0x174   :  { %6242 = vmatprep.subr.bf16.mxu1 %v6241_v59  ;;  %v651_v55 = vld [vmem:[#allocation11 + $0xbe0] sm:$0xff]  ;;  %v684_v59 = vld [vmem:[#allocation11 + $0xce8] sm:$0xff] }
 0x175   :  { %1700 = vmatmul.mubr.f32.vlgmr.msra.gmra.mrb[12].mxu0 %v7475_v6  ;;  %v6231_v63 = vpack.c.bf16 %v651_v55, %v619_v54  ;;  %v149_v54 = vld [vmem:[#allocation10 + $0x30] sm:$0xff]  ;;  %v6297_v55 = vpack.c.bf16 %v182_v49, %v150_v47 }
 0x176   :  { %1771 = vmatmul.mubr.f32.vlgmr.msra.gmra.mrb[12].mxu1 %v7475_v6  ;;  %6212 = vmatpush1.bf16.msra.mxu0 %v6211_v2  ;;  %v6233_v2 = vpack.c.bf16 %v716_v60, %v684_v59  ;;  %v214_v59 = vld [vmem:[#allocation10 + $0x238] sm:$0xff]  ;;  %v6299_v62 = vpack.c.bf16 %v181_v56, %v149_v54  ;;  %v253_v54 = vld [vmem:[#allocation10 + $0x370] sm:$0xff]  ;;  %v192_v56 = vld [vmem:[#allocation10 + $0x188] sm:$0xff] }
 0x177   :  { %6244 = vmatpush1.bf16.msra.mxu1 %v6243_v3  ;;  %6214 = vmatprep.subr.bf16.mxu0 %v6213_v4  ;;  %v683_v3 = vld [vmem:[#allocation11 + $0xce0] sm:$0xff]  ;;  %v7493_v60 = vld [vmem:[#allocation5] sm:$0x3] }
 0x178   :  { %6246 = vmatprep.subr.bf16.mxu1 %v6245_v9  ;;  %1841 = vmatprep.mubr.f32.mxu0 %v7285_v0  ;;  %v715_v4 = vld [vmem:[#allocation11 + $0xde0] sm:$0xff]  ;;  %v748_v9 = vld [vmem:[#allocation11 + $0xee8] sm:$0xff] }
 0x179   :  { %1912 = vmatprep.mubr.f32.mxu1 %v7285_v0  ;;  %v6235_v13 = vpack.c.bf16 %v715_v4, %v683_v3  ;;  %v213_v3 = vld [vmem:[#allocation10 + $0x230] sm:$0xff] }
 0x17a   :  { %6216 = vmatpush1.bf16.msra.mxu0 %v6215_v15  ;;  %v6237_v15 = vpack.c.bf16 %v780_v10, %v748_v9  ;;  %v154_v9 = vld [vmem:[#allocation10 + $0x58] sm:$0xff]  ;;  %v6303_v12 = vpack.c.bf16 %v245_v5, %v213_v3  ;;  %v193_v3 = vld [vmem:[#allocation10 + $0x190] sm:$0xff]  ;;  %v256_v5 = vld [vmem:[#allocation10 + $0x388] sm:$0xff] }
 0x17b   :  { %6248 = vmatpush1.bf16.msra.mxu1 %v6247_v16  ;;  %6218 = vmatprep.subr.bf16.mxu0 %v6217_v17  ;;  %v747_v16 = vld [vmem:[#allocation11 + $0xee0] sm:$0xff]  ;;  %v186_v10 = vld [vmem:[#allocation10 + $0x158] sm:$0xff] }
 0x17c   :  { %6250 = vmatprep.subr.bf16.mxu1 %v6249_v21  ;;  %v779_v17 = vld [vmem:[#allocation11 + $0xfe0] sm:$0xff]  ;;  %v144_v21 = vld [vmem:[#allocation10 + $0x8] sm:$0xff] }
 0x17d   :  { %v6239_v25 = vpack.c.bf16 %v779_v17, %v747_v16  ;;  %v153_v16 = vld [vmem:[#allocation10 + $0x50] sm:$0xff]  ;;  %v6313_v17 = vpack.c.bf16 %v186_v10, %v154_v9 }
 0x17e   :  { %6220 = vmatpush1.bf16.msra.mxu0 %v6219_v27  ;;  %v6273_v27 = vpack.c.bf16 %v176_v22, %v144_v21  ;;  %v218_v21 = vld [vmem:[#allocation10 + $0x258] sm:$0xff]  ;;  %v6315_v24 = vpack.c.bf16 %v185_v18, %v153_v16  ;;  %v257_v16 = vld [vmem:[#allocation10 + $0x390] sm:$0xff]  ;;  %v196_v18 = vld [vmem:[#allocation10 + $0x1a8] sm:$0xff] }
 0x17f   :  { %6252 = vmatpush1.bf16.msra.mxu1 %v6251_v28  ;;  %6222 = vmatprep.subr.bf16.mxu0 %v6221_v29  ;;  %v143_v28 = vld [vmem:[#allocation10] sm:$0xff]  ;;  %v250_v22 = vld [vmem:[#allocation10 + $0x358] sm:$0xff] }
 0x180   :  { %6254 = vmatprep.subr.bf16.mxu1 %v6253_v33  ;;  %v175_v29 = vld [vmem:[#allocation10 + $0x100] sm:$0xff]  ;;  %v208_v33 = vld [vmem:[#allocation10 + $0x208] sm:$0xff] }
 0x181   :  { %v6275_v37 = vpack.c.bf16 %v175_v29, %v143_v28  ;;  %v217_v28 = vld [vmem:[#allocation10 + $0x250] sm:$0xff]  ;;  %v6317_v29 = vpack.c.bf16 %v250_v22, %v218_v21 }
 0x182   :  { %6224 = vmatpush1.bf16.msra.mxu0 %v6223_v39  ;;  %v6277_v39 = vpack.c.bf16 %v240_v34, %v208_v33  ;;  %v158_v33 = vld [vmem:[#allocation10 + $0x78] sm:$0xff]  ;;  %v6319_v36 = vpack.c.bf16 %v249_v30, %v217_v28  ;;  %v197_v28 = vld [vmem:[#allocation10 + $0x1b0] sm:$0xff]  ;;  %v260_v30 = vld [vmem:[#allocation10 + $0x3a8] sm:$0xff] }
 0x183   :  { %6256 = vmatpush1.bf16.msra.mxu1 %v6255_v40  ;;  %6226 = vmatprep.subr.bf16.mxu0 %v6225_v41  ;;  %v207_v40 = vld [vmem:[#allocation10 + $0x200] sm:$0xff]  ;;  %v190_v34 = vld [vmem:[#allocation10 + $0x178] sm:$0xff] }
 0x184   :  { %6258 = vmatprep.subr.bf16.mxu1 %v6257_v45  ;;  %v239_v41 = vld [vmem:[#allocation10 + $0x300] sm:$0xff]  ;;  %v148_v45 = vld [vmem:[#allocation10 + $0x28] sm:$0xff] }
 0x185   :  { %v6279_v50 = vpack.c.bf16 %v239_v41, %v207_v40  ;;  %v157_v40 = vld [vmem:[#allocation10 + $0x70] sm:$0xff]  ;;  %v6329_v41 = vpack.c.bf16 %v190_v34, %v158_v33 }
 0x186   :  { %6228 = vmatpush1.bf16.msra.mxu0 %v6227_v51  ;;  %v6289_v51 = vpack.c.bf16 %v180_v46, %v148_v45  ;;  %v222_v45 = vld [vmem:[#allocation10 + $0x278] sm:$0xff]  ;;  %v6331_v49 = vpack.c.bf16 %v189_v42, %v157_v40  ;;  %v261_v40 = vld [vmem:[#allocation10 + $0x3b0] sm:$0xff]  ;;  %v200_v42 = vld [vmem:[#allocation10 + $0x1c8] sm:$0xff] }
 0x187   :  { %6260 = vmatpush1.bf16.msra.mxu1 %v6259_v52  ;;  %6230 = vmatprep.subr.bf16.mxu0 %v6229_v53  ;;  %v147_v52 = vld [vmem:[#allocation10 + $0x20] sm:$0xff]  ;;  %v254_v46 = vld [vmem:[#allocation10 + $0x378] sm:$0xff] }
 0x188   :  { %6262 = vmatprep.subr.bf16.mxu1 %v6261_v57  ;;  %v179_v53 = vld [vmem:[#allocation10 + $0x120] sm:$0xff]  ;;  %v212_v57 = vld [vmem:[#allocation10 + $0x228] sm:$0xff] }
 0x189   :  { %v6291_v61 = vpack.c.bf16 %v179_v53, %v147_v52  ;;  %v221_v52 = vld [vmem:[#allocation10 + $0x270] sm:$0xff]  ;;  %v6333_v53 = vpack.c.bf16 %v254_v46, %v222_v45 }
 0x18a   :  { %6232 = vmatpush1.bf16.msra.mxu0 %v6231_v63  ;;  %v6293_v63 = vpack.c.bf16 %v244_v58, %v212_v57  ;;  %v162_v57 = vld [vmem:[#allocation10 + $0x98] sm:$0xff] }
 0x18b   :  { %6264 = vmatpush1.bf16.msra.mxu1 %v6263_v1  ;;  %6234 = vmatprep.subr.bf16.mxu0 %v6233_v2  ;;  %v211_v1 = vld [vmem:[#allocation10 + $0x220] sm:$0xff]  ;;  %v194_v58 = vld [vmem:[#allocation10 + $0x198] sm:$0xff] }
 0x18c   :  { %6266 = vmatprep.subr.bf16.mxu1 %v6265_v7  ;;  %v243_v2 = vld [vmem:[#allocation10 + $0x320] sm:$0xff]  ;;  %v152_v7 = vld [vmem:[#allocation10 + $0x48] sm:$0xff] }
 0x18d   :  { %v6295_v11 = vpack.c.bf16 %v243_v2, %v211_v1  ;;  %v161_v1 = vld [vmem:[#allocation10 + $0x90] sm:$0xff]  ;;  %v6345_v2 = vpack.c.bf16 %v194_v58, %v162_v57 }
 0x18e   :  { %6236 = vmatpush1.bf16.msra.mxu0 %v6235_v13  ;;  %v6305_v13 = vpack.c.bf16 %v184_v8, %v152_v7  ;;  %v226_v7 = vld [vmem:[#allocation10 + $0x298] sm:$0xff]  ;;  %v6347_v10 = vpack.c.bf16 %v193_v3, %v161_v1  ;;  %v265_v1 = vld [vmem:[#allocation10 + $0x3d0] sm:$0xff]  ;;  %v204_v3 = vld [vmem:[#allocation10 + $0x1e8] sm:$0xff] }
 0x18f   :  { %6268 = vmatpush1.bf16.msra.mxu1 %v6267_v14  ;;  %6238 = vmatprep.subr.bf16.mxu0 %v6237_v15  ;;  %v151_v14 = vld [vmem:[#allocation10 + $0x40] sm:$0xff]  ;;  %v258_v8 = vld [vmem:[#allocation10 + $0x398] sm:$0xff] }
 0x190   :  { %6270 = vmatprep.subr.bf16.mxu1 %v6269_v19  ;;  %v183_v15 = vld [vmem:[#allocation10 + $0x140] sm:$0xff]  ;;  %v216_v19 = vld [vmem:[#allocation10 + $0x248] sm:$0xff] }
 0x191   :  { %v6307_v23 = vpack.c.bf16 %v183_v15, %v151_v14  ;;  %v225_v14 = vld [vmem:[#allocation10 + $0x290] sm:$0xff]  ;;  %v6349_v15 = vpack.c.bf16 %v258_v8, %v226_v7 }
 0x192   :  { %6240 = vmatpush1.bf16.msra.mxu0 %v6239_v25  ;;  %v6309_v25 = vpack.c.bf16 %v248_v20, %v216_v19  ;;  %v166_v19 = vld [vmem:[#allocation10 + $0xb8] sm:$0xff]  ;;  %v6351_v22 = vpack.c.bf16 %v257_v16, %v225_v14  ;;  %v205_v14 = vld [vmem:[#allocation10 + $0x1f0] sm:$0xff]  ;;  %v268_v16 = vld [vmem:[#allocation10 + $0x3e8] sm:$0xff] }
 0x193   :  { %6272 = vmatpush1.bf16.msra.mxu1 %v6271_v26  ;;  %6274 = vmatprep.subr.bf16.mxu0 %v6273_v27  ;;  %v215_v26 = vld [vmem:[#allocation10 + $0x240] sm:$0xff]  ;;  %v198_v20 = vld [vmem:[#allocation10 + $0x1b8] sm:$0xff] }
 0x194   :  { %6282 = vmatprep.subr.bf16.mxu1 %v6281_v31  ;;  %v247_v27 = vld [vmem:[#allocation10 + $0x340] sm:$0xff]  ;;  %v156_v31 = vld [vmem:[#allocation10 + $0x68] sm:$0xff] }
 0x195   :  { %1842 = vmatmul.mubr.f32.vlgmr.msra.gmra.mrb[14].mxu0 %v7475_v6  ;;  %v6311_v35 = vpack.c.bf16 %v247_v27, %v215_v26  ;;  %v165_v26 = vld [vmem:[#allocation10 + $0xb0] sm:$0xff]  ;;  %v6361_v27 = vpack.c.bf16 %v198_v20, %v166_v19 }
 0x196   :  { %1913 = vmatmul.mubr.f32.vlgmr.msra.gmra.mrb[14].mxu1 %v7475_v6  ;;  %6276 = vmatpush1.bf16.msra.mxu0 %v6275_v37  ;;  %v246_v6 = vld [vmem:[#allocation10 + $0x338] sm:$0xff]  ;;  %v6321_v37 = vpack.c.bf16 %v188_v32, %v156_v31  ;;  %v6363_v34 = vpack.c.bf16 %v197_v28, %v165_v26  ;;  %v269_v26 = vld [vmem:[#allocation10 + $0x3f0] sm:$0xff]  ;;  %v3516_v28 = vld [vmem:[#allocation14 + $0x88] sm:$0xff] }
 0x197   :  { %6284 = vmatpush1.bf16.msra.mxu1 %v6283_v38  ;;  %6278 = vmatprep.subr.bf16.mxu0 %v6277_v39  ;;  %v6301_v4 = vpack.c.bf16 %v246_v6, %v214_v59  ;;  %v155_v38 = vld [vmem:[#allocation10 + $0x60] sm:$0xff]  ;;  %v6335_v6 = vpack.c.bf16 %v253_v54, %v221_v52  ;;  %v230_v31 = vld [vmem:[#allocation10 + $0x2b8] sm:$0xff]  ;;  %v201_v52 = vld [vmem:[#allocation10 + $0x1d0] sm:$0xff] }
 0x198   :  { %6286 = vmatprep.subr.bf16.mxu1 %v6285_v43  ;;  %1987 = vmatprep.mubr.f32.mxu0 %v7285_v0  ;;  %v187_v39 = vld [vmem:[#allocation10 + $0x160] sm:$0xff]  ;;  %v220_v43 = vld [vmem:[#allocation10 + $0x268] sm:$0xff]  ;;  %v262_v32 = vld [vmem:[#allocation10 + $0x3b8] sm:$0xff] }
 0x199   :  { %2058 = vmatprep.mubr.f32.mxu1 %v7285_v0  ;;  %v6323_v47 = vpack.c.bf16 %v187_v39, %v155_v38  ;;  %v229_v38 = vld [vmem:[#allocation10 + $0x2b0] sm:$0xff]  ;;  %v6365_v39 = vpack.c.bf16 %v262_v32, %v230_v31  ;;  %v264_v54 = vld [vmem:[#allocation10 + $0x3c8] sm:$0xff] }
 0x19a   :  { %6280 = vmatpush1.bf16.msra.mxu0 %v6279_v50  ;;  %v6325_v50 = vpack.c.bf16 %v252_v44, %v220_v43  ;;  %v170_v43 = vld [vmem:[#allocation10 + $0xd8] sm:$0xff]  ;;  %v6367_v46 = vpack.c.bf16 %v261_v40, %v229_v38  ;;  %v3532_v38 = vld [vmem:[#allocation14 + $0x108] sm:$0xff] }
 0x19b   :  { %6288 = vmatpush1.bf16.msra.mxu1 %v6287_v48  ;;  %6290 = vmatprep.subr.bf16.mxu0 %v6289_v51  ;;  %v219_v48 = vld [vmem:[#allocation10 + $0x260] sm:$0xff]  ;;  %v202_v44 = vld [vmem:[#allocation10 + $0x1d8] sm:$0xff] }
 0x19c   :  { %6298 = vmatprep.subr.bf16.mxu1 %v6297_v55  ;;  %v251_v51 = vld [vmem:[#allocation10 + $0x360] sm:$0xff]  ;;  %v160_v55 = vld [vmem:[#allocation10 + $0x88] sm:$0xff]  ;;  %v3518_v40 = vld [vmem:[#allocation14 + $0x98] sm:$0xff] }
 0x19d   :  { %5185 = vmatmul.mubr.msk.f32.vlgmr.msra.gmra.mrb[0].mxu0 %vm1919_vm0, %v7493_v60  ;;  %v6327_v59 = vpack.c.bf16 %v251_v51, %v219_v48  ;;  %v169_v48 = vld [vmem:[#allocation10 + $0xd0] sm:$0xff]  ;;  %v6377_v51 = vpack.c.bf16 %v202_v44, %v170_v43 }
 0x19e   :  { %5186 = vmatmul.mubr.msk.f32.vlgmr.msra.gmra.mrb[0].mxu1 %vm1919_vm0, %v7493_v60  ;;  %6292 = vmatpush1.bf16.msra.mxu0 %v6291_v61  ;;  %v6337_v61 = vpack.c.bf16 %v192_v56, %v160_v55  ;;  %v234_v55 = vld [vmem:[#allocation10 + $0x2d8] sm:$0xff]  ;;  %v6379_v58 = vpack.c.bf16 %v201_v52, %v169_v48  ;;  %v3520_v52 = vld [vmem:[#allocation14 + $0xa8] sm:$0xff] }
 0x19f   :  { %6300 = vmatpush1.bf16.msra.mxu1 %v6299_v62  ;;  %6294 = vmatprep.subr.bf16.mxu0 %v6293_v63  ;;  %v159_v62 = vld [vmem:[#allocation10 + $0x80] sm:$0xff]  ;;  %v266_v56 = vld [vmem:[#allocation10 + $0x3d8] sm:$0xff] }
 0x1a0   :  { %6302 = vmatprep.subr.bf16.mxu1 %v6301_v4  ;;  %2129 = vmatprep.mubr.f32.mxu0 %v7285_v0  ;;  %v191_v63 = vld [vmem:[#allocation10 + $0x180] sm:$0xff]  ;;  %v224_v4 = vld [vmem:[#allocation10 + $0x288] sm:$0xff]  ;;  %v3534_v48 = vld [vmem:[#allocation14 + $0x118] sm:$0xff] }
 0x1a1   :  { %2200 = vmatprep.mubr.f32.mxu1 %v7285_v0  ;;  %v6339_v9 = vpack.c.bf16 %v191_v63, %v159_v62  ;;  %v233_v62 = vld [vmem:[#allocation10 + $0x2d0] sm:$0xff]  ;;  %v6381_v63 = vpack.c.bf16 %v266_v56, %v234_v55 }
 0x1a2   :  { %6296 = vmatpush1.bf16.msra.mxu0 %v6295_v11  ;;  %v6341_v11 = vpack.c.bf16 %v256_v5, %v224_v4  ;;  %v174_v4 = vld [vmem:[#allocation10 + $0xf8] sm:$0xff]  ;;  %v6383_v8 = vpack.c.bf16 %v265_v1, %v233_v62  ;;  %v3521_v62 = vld [vmem:[#allocation14 + $0xb0] sm:$0xff] }
 0x1a3   :  { %6304 = vmatpush1.bf16.msra.mxu1 %v6303_v12  ;;  %6306 = vmatprep.subr.bf16.mxu0 %v6305_v13  ;;  %v223_v12 = vld [vmem:[#allocation10 + $0x280] sm:$0xff]  ;;  %v206_v5 = vld [vmem:[#allocation10 + $0x1f8] sm:$0xff]  ;;  %v3553_v1 = vld [vmem:[#allocation14 + $0x1b0] sm:$0xff] }
 0x1a4   :  { %6314 = vmatprep.subr.bf16.mxu1 %v6313_v17  ;;  %v255_v13 = vld [vmem:[#allocation10 + $0x380] sm:$0xff]  ;;  %v164_v17 = vld [vmem:[#allocation10 + $0xa8] sm:$0xff] }
 0x1a5   :  { %5187 = vmatmul.mubr.msk.f32.vlgmr.msra.gmra.mrb[2].mxu0 %vm1919_vm0, %v7493_v60  ;;  %v6343_v21 = vpack.c.bf16 %v255_v13, %v223_v12  ;;  %v173_v12 = vld [vmem:[#allocation10 + $0xf0] sm:$0xff]  ;;  %v6393_v13 = vpack.c.bf16 %v206_v5, %v174_v4 }
 0x1a6   :  { %5188 = vmatmul.mubr.msk.f32.vlgmr.msra.gmra.mrb[2].mxu1 %vm1919_vm0, %v7493_v60  ;;  %6308 = vmatpush1.bf16.msra.mxu0 %v6307_v23  ;;  %v6353_v23 = vpack.c.bf16 %v196_v18, %v164_v17  ;;  %v238_v17 = vld [vmem:[#allocation10 + $0x2f8] sm:$0xff]  ;;  %v6395_v20 = vpack.c.bf16 %v205_v14, %v173_v12  ;;  %v3505_v5 = vld [vmem:[#allocation14 + $0x30] sm:$0xff]  ;;  %v3524_v14 = vld [vmem:[#allocation14 + $0xc8] sm:$0xff] }
 0x1a7   :  { %6316 = vmatpush1.bf16.msra.mxu1 %v6315_v24  ;;  %6310 = vmatprep.subr.bf16.mxu0 %v6309_v25  ;;  %v163_v24 = vld [vmem:[#allocation10 + $0xa0] sm:$0xff]  ;;  %v270_v18 = vld [vmem:[#allocation10 + $0x3f8] sm:$0xff] }
 0x1a8   :  { %6318 = vmatprep.subr.bf16.mxu1 %v6317_v29  ;;  %2271 = vmatprep.mubr.f32.mxu0 %v7285_v0  ;;  %v195_v25 = vld [vmem:[#allocation10 + $0x1a0] sm:$0xff]  ;;  %v228_v29 = vld [vmem:[#allocation10 + $0x2a8] sm:$0xff] }
 0x1a9   :  { %2342 = vmatprep.mubr.f32.mxu1 %v7285_v0  ;;  %v6355_v33 = vpack.c.bf16 %v195_v25, %v163_v24  ;;  %v237_v24 = vld [vmem:[#allocation10 + $0x2f0] sm:$0xff]  ;;  %v6397_v25 = vpack.c.bf16 %v270_v18, %v238_v17  ;;  %v3507_v17 = vld [vmem:[#allocation14 + $0x40] sm:$0xff] }
 0x1aa   :  { %6312 = vmatpush1.bf16.msra.mxu0 %v6311_v35  ;;  %v6357_v35 = vpack.c.bf16 %v260_v30, %v228_v29  ;;  %v3547_v29 = vld [vmem:[#allocation14 + $0x180] sm:$0xff]  ;;  %v3548_v30 = vld [vmem:[#allocation14 + $0x188] sm:$0xff]  ;;  %v6399_v32 = vpack.c.bf16 %v269_v26, %v237_v24  ;;  %v3526_v26 = vld [vmem:[#allocation14 + $0xd8] sm:$0xff] }
 0x1ab   :  { %6320 = vmatpush1.bf16.msra.mxu1 %v6319_v36  ;;  %6322 = vmatprep.subr.bf16.mxu0 %v6321_v37  ;;  %v227_v36 = vld [vmem:[#allocation10 + $0x2a0] sm:$0xff] }
 0x1ac   :  { %6330 = vmatprep.subr.bf16.mxu1 %v6329_v41  ;;  %v259_v37 = vld [vmem:[#allocation10 + $0x3a0] sm:$0xff]  ;;  %v168_v41 = vld [vmem:[#allocation10 + $0xc8] sm:$0xff] }
 0x1ad   :  { %5189 = vmatmul.mubr.msk.f32.vlgmr.msra.gmra.mrb[4].mxu0 %vm1919_vm0, %v7493_v60  ;;  %v6359_v45 = vpack.c.bf16 %v259_v37, %v227_v36  ;;  %v3531_v36 = vld [vmem:[#allocation14 + $0x100] sm:$0xff]  ;;  %v6433_v37 = vpack.c.bf16 %v3548_v30, %v3547_v29  ;;  %v3558_v29 = vld [vmem:[#allocation14 + $0x1d8] sm:$0xff]  ;;  %v3509_v30 = vld [vmem:[#allocation14 + $0x50] sm:$0xff] }
 0x1ae   :  { %5190 = vmatmul.mubr.msk.f32.vlgmr.msra.gmra.mrb[4].mxu1 %vm1919_vm0, %v7493_v60  ;;  %6324 = vmatpush1.bf16.msra.mxu0 %v6323_v47  ;;  %v6369_v47 = vpack.c.bf16 %v200_v42, %v168_v41  ;;  %v3549_v41 = vld [vmem:[#allocation14 + $0x190] sm:$0xff]  ;;  %v3550_v42 = vld [vmem:[#allocation14 + $0x198] sm:$0xff]  ;;  %v6435_v44 = vpack.c.bf16 %v3532_v38, %v3531_v36  ;;  %v3528_v38 = vld [vmem:[#allocation14 + $0xe8] sm:$0xff] }
 0x1af   :  { %6332 = vmatpush1.bf16.msra.mxu1 %v6331_v49  ;;  %6326 = vmatprep.subr.bf16.mxu0 %v6325_v50  ;;  %v167_v49 = vld [vmem:[#allocation10 + $0xc0] sm:$0xff] }
 0x1b0   :  { %6334 = vmatprep.subr.bf16.mxu1 %v6333_v53  ;;  %2413 = vmatprep.mubr.f32.mxu0 %v7285_v0  ;;  %v199_v50 = vld [vmem:[#allocation10 + $0x1c0] sm:$0xff]  ;;  %v232_v53 = vld [vmem:[#allocation10 + $0x2c8] sm:$0xff] }
 0x1b1   :  { %2484 = vmatprep.mubr.f32.mxu1 %v7285_v0  ;;  %v6371_v57 = vpack.c.bf16 %v199_v50, %v167_v49  ;;  %v3533_v49 = vld [vmem:[#allocation14 + $0x110] sm:$0xff]  ;;  %v6437_v50 = vpack.c.bf16 %v3550_v42, %v3549_v41  ;;  %v3560_v41 = vld [vmem:[#allocation14 + $0x1e8] sm:$0xff]  ;;  %v3511_v42 = vld [vmem:[#allocation14 + $0x60] sm:$0xff] }
 0x1b2   :  { %6328 = vmatpush1.bf16.msra.mxu0 %v6327_v59  ;;  %v6373_v59 = vpack.c.bf16 %v264_v54, %v232_v53  ;;  %v3552_v53 = vld [vmem:[#allocation14 + $0x1a8] sm:$0xff]  ;;  %v6439_v55 = vpack.c.bf16 %v3534_v48, %v3533_v49  ;;  %v3530_v48 = vld [vmem:[#allocation14 + $0xf8] sm:$0xff] }
 0x1b3   :  { %6336 = vmatpush1.bf16.msra.mxu1 %v6335_v6  ;;  %6338 = vmatprep.subr.bf16.mxu0 %v6337_v61  ;;  %v231_v6 = vld [vmem:[#allocation10 + $0x2c0] sm:$0xff] }
 0x1b4   :  { %6346 = vmatprep.subr.bf16.mxu1 %v6345_v2  ;;  %v263_v61 = vld [vmem:[#allocation10 + $0x3c0] sm:$0xff]  ;;  %v172_v2 = vld [vmem:[#allocation10 + $0xe8] sm:$0xff] }
 0x1b5   :  { %5191 = vmatmul.mubr.msk.f32.vlgmr.msra.gmra.mrb[6].mxu0 %vm1919_vm0, %v7493_v60  ;;  %v6375_v7 = vpack.c.bf16 %v263_v61, %v231_v6  ;;  %v3536_v61 = vld [vmem:[#allocation14 + $0x128] sm:$0xff] }
 0x1b6   :  { %5192 = vmatmul.mubr.msk.f32.vlgmr.msra.gmra.mrb[6].mxu1 %vm1919_vm0, %v7493_v60  ;;  %6340 = vmatpush1.bf16.msra.mxu0 %v6339_v9  ;;  %v6385_v9 = vpack.c.bf16 %v204_v3, %v172_v2  ;;  %v3554_v2 = vld [vmem:[#allocation14 + $0x1b8] sm:$0xff] }
 0x1b7   :  { %6348 = vmatpush1.bf16.msra.mxu1 %v6347_v10  ;;  %6342 = vmatprep.subr.bf16.mxu0 %v6341_v11  ;;  %v171_v10 = vld [vmem:[#allocation10 + $0xe0] sm:$0xff] }
 0x1b8   :  { %6350 = vmatprep.subr.bf16.mxu1 %v6349_v15  ;;  %2555 = vmatprep.mubr.f32.mxu0 %v7285_v0  ;;  %v203_v11 = vld [vmem:[#allocation10 + $0x1e0] sm:$0xff]  ;;  %v236_v15 = vld [vmem:[#allocation10 + $0x2e8] sm:$0xff] }
 0x1b9   :  { %2626 = vmatprep.mubr.f32.mxu1 %v7285_v0  ;;  %v6387_v19 = vpack.c.bf16 %v203_v11, %v171_v10  ;;  %v3538_v10 = vld [vmem:[#allocation14 + $0x138] sm:$0xff] }
 0x1ba   :  { %6344 = vmatpush1.bf16.msra.mxu0 %v6343_v21  ;;  %v6389_v21 = vpack.c.bf16 %v268_v16, %v236_v15  ;;  %v3555_v15 = vld [vmem:[#allocation14 + $0x1c0] sm:$0xff]  ;;  %v3556_v16 = vld [vmem:[#allocation14 + $0x1c8] sm:$0xff] }
 0x1bb   :  { %6352 = vmatpush1.bf16.msra.mxu1 %v6351_v22  ;;  %6354 = vmatprep.subr.bf16.mxu0 %v6353_v23  ;;  %v235_v22 = vld [vmem:[#allocation10 + $0x2e0] sm:$0xff] }
 0x1bc   :  { %6362 = vmatprep.subr.bf16.mxu1 %v6361_v27  ;;  %v267_v23 = vld [vmem:[#allocation10 + $0x3e0] sm:$0xff] }
 0x1bd   :  { %5193 = vmatmul.mubr.msk.f32.vlgmr.msra.gmra.mrb[8].mxu0 %vm1919_vm0, %v7493_v60  ;;  %v3515_v27 = vld [vmem:[#allocation14 + $0x80] sm:$0xff]  ;;  %v6391_v31 = vpack.c.bf16 %v267_v23, %v235_v22  ;;  %v3540_v22 = vld [vmem:[#allocation14 + $0x148] sm:$0xff] }
 0x1be   :  { %5194 = vmatmul.mubr.msk.f32.vlgmr.msra.gmra.mrb[8].mxu1 %vm1919_vm0, %v7493_v60  ;;  %6356 = vmatpush1.bf16.msra.mxu0 %v6355_v33  ;;  %v6401_v33 = vpack.c.bf16 %v3516_v28, %v3515_v27  ;;  %v3557_v27 = vld [vmem:[#allocation14 + $0x1d0] sm:$0xff] }
 0x1bf   :  { %6364 = vmatpush1.bf16.msra.mxu1 %v6363_v34  ;;  %6358 = vmatprep.subr.bf16.mxu0 %v6357_v35  ;;  %v3499_v34 = vld [vmem:[#allocation14] sm:$0xff]  ;;  %v3500_v35 = vld [vmem:[#allocation14 + $0x8] sm:$0xff] }
 0x1c0   :  { %6366 = vmatprep.subr.bf16.mxu1 %v6365_v39  ;;  %2697 = vmatprep.mubr.f32.mxu0 %v7285_v0  ;;  %v3517_v39 = vld [vmem:[#allocation14 + $0x90] sm:$0xff]  ;;  %v6403_v43 = vpack.c.bf16 %v3500_v35, %v3499_v34  ;;  %v3542_v35 = vld [vmem:[#allocation14 + $0x158] sm:$0xff] }
 0x1c1   :  { %2768 = vmatprep.mubr.f32.mxu1 %v7285_v0  ;;  %v3541_v34 = vld [vmem:[#allocation14 + $0x150] sm:$0xff] }
 0x1c2   :  { %6360 = vmatpush1.bf16.msra.mxu0 %v6359_v45  ;;  %v6405_v45 = vpack.c.bf16 %v3518_v40, %v3517_v39  ;;  %v6455_v36 = vpack.c.bf16 %v3542_v35, %v3541_v34  ;;  %v3559_v39 = vld [vmem:[#allocation14 + $0x1e0] sm:$0xff] }
 0x1c3   :  { %6368 = vmatpush1.bf16.msra.mxu1 %v6367_v46  ;;  %6370 = vmatprep.subr.bf16.mxu0 %v6369_v47  ;;  %v3501_v46 = vld [vmem:[#allocation14 + $0x10] sm:$0xff]  ;;  %v3502_v47 = vld [vmem:[#allocation14 + $0x18] sm:$0xff] }
 0x1c4   :  { %6378 = vmatprep.subr.bf16.mxu1 %v6377_v51  ;;  %v3519_v51 = vld [vmem:[#allocation14 + $0xa0] sm:$0xff]  ;;  %v6407_v54 = vpack.c.bf16 %v3502_v47, %v3501_v46  ;;  %v3544_v46 = vld [vmem:[#allocation14 + $0x168] sm:$0xff] }
 0x1c5   :  { %5195 = vmatmul.mubr.msk.f32.vlgmr.msra.gmra.mrb[10].mxu0 %vm1919_vm0, %v7493_v60  ;;  %v6409_v56 = vpack.c.bf16 %v3520_v52, %v3519_v51  ;;  %v3561_v51 = vld [vmem:[#allocation14 + $0x1f0] sm:$0xff] }
 0x1c6   :  { %5196 = vmatmul.mubr.msk.f32.vlgmr.msra.gmra.mrb[10].mxu1 %vm1919_vm0, %v7493_v60  ;;  %6372 = vmatpush1.bf16.msra.mxu0 %v6371_v57  ;;  %v3503_v57 = vld [vmem:[#allocation14 + $0x20] sm:$0xff] }
 0x1c7   :  { %6380 = vmatpush1.bf16.msra.mxu1 %v6379_v58  ;;  %6374 = vmatprep.subr.bf16.mxu0 %v6373_v59  ;;  %v3504_v58 = vld [vmem:[#allocation14 + $0x28] sm:$0xff]  ;;  %v3535_v59 = vld [vmem:[#allocation14 + $0x120] sm:$0xff] }
 0x1c8   :  { %6382 = vmatprep.subr.bf16.mxu1 %v6381_v63  ;;  %2839 = vmatprep.mubr.f32.mxu0 %v7285_v0  ;;  %v3522_v63 = vld [vmem:[#allocation14 + $0xb8] sm:$0xff]  ;;  %v6411_v3 = vpack.c.bf16 %v3504_v58, %v3503_v57  ;;  %v3545_v57 = vld [vmem:[#allocation14 + $0x170] sm:$0xff] }
 0x1c9   :  { %2910 = vmatprep.mubr.f32.mxu1 %v7285_v0  ;;  %v6413_v4 = vpack.c.bf16 %v3522_v63, %v3521_v62  ;;  %v3546_v58 = vld [vmem:[#allocation14 + $0x178] sm:$0xff]  ;;  %v3611_v62 = vld [vmem:[#allocation14 + $0x380] sm:$0xff] }
 0x1ca   :  { %6376 = vmatpush1.bf16.msra.mxu0 %v6375_v7  ;;  %v3506_v7 = vld [vmem:[#allocation14 + $0x38] sm:$0xff] }
 0x1cb   :  { %6384 = vmatpush1.bf16.msra.mxu1 %v6383_v8  ;;  %6386 = vmatprep.subr.bf16.mxu0 %v6385_v9  ;;  %v6445_v8 = vpack.c.bf16 %v3554_v2, %v3553_v1  ;;  %v3537_v9 = vld [vmem:[#allocation14 + $0x130] sm:$0xff]  ;;  %v6415_v11 = vpack.c.bf16 %v3506_v7, %v3505_v5  ;;  %v3612_v1 = vld [vmem:[#allocation14 + $0x388] sm:$0xff] }
 0x1cc   :  { %6394 = vmatprep.subr.bf16.mxu1 %v6393_v13  ;;  %v6447_v12 = vpack.c.bf16 %v3538_v10, %v3537_v9  ;;  %v3523_v13 = vld [vmem:[#allocation14 + $0xc0] sm:$0xff]  ;;  %v6497_v2 = vpack.c.bf16 %v3612_v1, %v3611_v62  ;;  %v3596_v62 = vld [vmem:[#allocation14 + $0x308] sm:$0xff]  ;;  %v3582_v1 = vld [vmem:[#allocation14 + $0x298] sm:$0xff] }
 0x1cd   :  { %5197 = vmatmul.mubr.msk.f32.vlgmr.msra.gmra.mrb[12].mxu0 %vm1919_vm0, %v7493_v60  ;;  %v6417_v18 = vpack.c.bf16 %v3524_v14, %v3523_v13  ;;  %v7552_v14 = vld [vmem:[#allocation13] sm:$0xff] }
 0x1ce   :  { %5198 = vmatmul.mubr.msk.f32.vlgmr.msra.gmra.mrb[12].mxu1 %vm1919_vm0, %v7493_v60  ;;  %6388 = vmatpush1.bf16.msra.mxu0 %v6387_v19  ;;  %v6449_v19 = vpack.c.bf16 %v3556_v16, %v3555_v15  ;;  %v133_v16 = vld [vmem:[#allocation2 + $0x8] sm:$0xff] }
 0x1cf   :  { %6396 = vmatpush1.bf16.msra.mxu1 %v6395_v20  ;;  %6390 = vmatprep.subr.bf16.mxu0 %v6389_v21  ;;  %v3508_v20 = vld [vmem:[#allocation14 + $0x48] sm:$0xff]  ;;  %v3539_v21 = vld [vmem:[#allocation14 + $0x140] sm:$0xff] }
 0x1d0   :  { %6398 = vmatprep.subr.bf16.mxu1 %v6397_v25  ;;  %2981 = vmatprep.mubr.f32.mxu0 %v7285_v0  ;;  %v6419_v23 = vpack.c.bf16 %v3508_v20, %v3507_v17  ;;  %v6451_v24 = vpack.c.bf16 %v3540_v22, %v3539_v21  ;;  %v3525_v25 = vld [vmem:[#allocation14 + $0xd0] sm:$0xff]  ;;  %v3084_v22 = vcombine.high %v133_v16, %v133_v16 }
 0x1d1   :  { %3052 = vmatprep.mubr.f32.mxu1 %v7285_v0  ;;  %v3551_v0 = vld [vmem:[#allocation14 + $0x1a0] sm:$0xff]  ;;  %v6421_v28 = vpack.c.bf16 %v3526_v26, %v3525_v25 }
 0x1d2   :  { %6392 = vmatpush1.bf16.msra.mxu0 %v6391_v31  ;;  %v6441_v6 = vpack.c.bf16 %v3552_v53, %v3551_v0  ;;  %v3510_v31 = vld [vmem:[#allocation14 + $0x58] sm:$0xff]  ;;  %v3513_v53 = vld [vmem:[#allocation14 + $0x70] sm:$0xff] }
 0x1d3   :  { %6400 = vmatpush1.bf16.msra.mxu1 %v6399_v32  ;;  %6402 = vmatprep.subr.bf16.mxu0 %v6401_v33  ;;  %v6453_v32 = vpack.c.bf16 %v3558_v29, %v3557_v27  ;;  %v6423_v33 = vpack.c.bf16 %v3510_v31, %v3509_v30  ;;  %v3562_v0 = vld [vmem:[#allocation14 + $0x1f8] sm:$0xff] }
 0x1d4   :  { %6434 = vmatprep.subr.bf16.mxu1 %v6433_v37  ;;  %v3527_v37 = vld [vmem:[#allocation14 + $0xe0] sm:$0xff] }
 0x1d5   :  { %5199 = vmatmul.mubr.msk.f32.vlgmr.msra.gmra.mrb[14].mxu0 %vm1919_vm0, %v7493_v60  ;;  %v6425_v40 = vpack.c.bf16 %v3528_v38, %v3527_v37 }
 0x1d6   :  { %5200 = vmatmul.mubr.msk.f32.vlgmr.msra.gmra.mrb[14].mxu1 %vm1919_vm0, %v7493_v60  ;;  %6404 = vmatpush3.bf16.msra.mxu0 %v6403_v43  ;;  %v6443_v60 = vpack.c.bf16 %v3536_v61, %v3535_v59  ;;  %v3512_v43 = vld [vmem:[#allocation14 + $0x68] sm:$0xff]  ;;  %v6463_v59 = vpack.c.bf16 %v3546_v58, %v3545_v57  ;;  %v3563_v58 = vld [vmem:[#allocation14 + $0x200] sm:$0xff] }
 0x1d7   :  { %6436 = vmatpush3.bf16.msra.mxu1 %v6435_v44  ;;  %6406 = vmatprep.subr.bf16.mxu0 %v6405_v45  ;;  %v6457_v44 = vpack.c.bf16 %v3560_v41, %v3559_v39  ;;  %v3543_v45 = vld [vmem:[#allocation14 + $0x160] sm:$0xff]  ;;  %v6427_v47 = vpack.c.bf16 %v3512_v43, %v3511_v42  ;;  %v3580_v61 = vld [vmem:[#allocation14 + $0x288] sm:$0xff] }
 0x1d8   :  { %6438 = vmatprep.subr.bf16.mxu1 %v6437_v50  ;;  %v6459_v49 = vpack.c.bf16 %v3544_v46, %v3543_v45  ;;  %v3529_v50 = vld [vmem:[#allocation14 + $0xf0] sm:$0xff] }
 0x1d9   :  { %v6429_v52 = vpack.c.bf16 %v3530_v48, %v3529_v50 }
 0x1da   :  { %6408 = vmatpush3.bf16.msra.mxu0 %v6407_v54  ;;  %v3514_v54 = vld [vmem:[#allocation14 + $0x78] sm:$0xff] }
 0x1db   :  { %6440 = vmatpush3.bf16.msra.mxu1 %v6439_v55  ;;  %6410 = vmatprep.subr.bf16.mxu0 %v6409_v56  ;;  %v6461_v55 = vpack.c.bf16 %v3562_v0, %v3561_v51  ;;  %v6431_v56 = vpack.c.bf16 %v3514_v54, %v3513_v53  ;;  %v7595_v54 = vld [vmem:[#allocation13 + $0x8] sm:$0xff] }
 0x1dc   :  { %6442 = vmatprep.subr.bf16.mxu1 %v6441_v6  ;;  %v3579_v6 = vld [vmem:[#allocation14 + $0x280] sm:$0xff] }
 0x1dd   :  { %v6465_v63 = vpack.c.bf16 %v3580_v61, %v3579_v6  ;;  %v3595_v6 = vld [vmem:[#allocation14 + $0x300] sm:$0xff] }
 0x1de   :  { %6412 = vmatpush3.bf16.msra.mxu0 %v6411_v3  ;;  %v7286_v3 = vmov 1983009808  }
 0x1df   :  { %6444 = vmatpush3.bf16.msra.mxu1 %v6443_v60  ;;  %6414 = vmatprep.subr.bf16.mxu0 %v6413_v4  ;;  %v3069_v60 = vunpack.c.l.s4 %v7286_v3  ;;  %v7876_v4 = vlaneseq  ;;  %v3613_v3 = vld [vmem:[#allocation14 + $0x390] sm:$0xff] }
 0x1e0   :  { %6446 = vmatprep.subr.bf16.mxu1 %v6445_v8  ;;  %v132_v8 = vld [vmem:[#allocation2] sm:$0xff] }
 0x1e1   :  { %v3070_v5 = vunpack.c.0.s8 %v3069_v60  ;;  %v7542_v7 = vshrl.u32 %v7876_v4, 7  ;;  %v3067_v10 = vcombine.high %v132_v8, %v132_v8  ;;  %v3614_v60 = vld [vmem:[#allocation14 + $0x398] sm:$0xff] }
 0x1e2   :  { %6416 = vmatpush3.bf16.msra.mxu0 %v6415_v11 }
 0x1e3   :  { %6448 = vmatpush3.bf16.msra.mxu1 %v6447_v12  ;;  %6418 = vmatprep.subr.bf16.mxu0 %v6417_v18  ;;  %v7545_v9 = vsub.s32 %v3070_v5, %v7542_v7  ;;  %v7549_v12 = vsub.s32 0, %v7542_v7  ;;  %v7555_v15 = vsub.s32 1, %v7542_v7  ;;  %v7558_v17 = vsub.s32 2, %v7542_v7 }
 0x1e4   :  { %6450 = vmatprep.subr.bf16.mxu1 %v6449_v19  ;;  %v7561_v18 = vsub.s32 3, %v7542_v7  ;;  %v7578_v38 = vsub.s32 5, %v7542_v7  ;;  %v7581_v41 = vsub.s32 7, %v7542_v7 }
 0x1e5   :  { %v3074_v11 = vrot.slane %v132_v8, %v7545_v9  ;;  %v3081_v13 = vrot.slane %v3067_v10, %v7545_v9  ;;  %v3278_v20 = vrot.slane %v7552_v14, %v7549_v12  ;;  %v3286_v27 = vrot.slane %v7552_v14, %v7558_v17 }
 0x1e6   :  { %6420 = vmatpush3.bf16.msra.mxu0 %v6419_v23  ;;  %v3290_v29 = vrot.slane %v7552_v14, %v7561_v18  ;;  %v3298_v46 = vrot.slane %v7552_v14, %v7578_v38  ;;  %v3306_v50 = vrot.slane %v7552_v14, %v7581_v41 }
 0x1e7   :  { %6452 = vmatpush3.bf16.msra.mxu1 %v6451_v24  ;;  %6422 = vmatprep.subr.bf16.mxu0 %v6421_v28  ;;  %v3082_v19 = vcombine.high %v3074_v11, %v3074_v11  ;;  %v3083_v21 = vcombine.high %v3081_v13, %v3081_v13  ;;  %v3282_v24 = vrot.slane %v7552_v14, %v7555_v15 }
 0x1e8   :  { %6454 = vmatprep.subr.bf16.mxu1 %v6453_v32 }
 0x1ea   :  { %6424 = vmatpush3.bf16.msra.mxu0 %v6423_v33  ;;  %v7572_v33 = vrot.slane %v133_v16, %v7545_v9 }
 0x1eb   :  { %6456 = vmatpush3.bf16.msra.mxu1 %v6455_v36  ;;  %6426 = vmatprep.subr.bf16.mxu0 %v6425_v40  ;;  %v7575_v36 = vrot.slane %v3084_v22, %v7545_v9  ;;  %v6499_v22 = vpack.c.bf16 %v3596_v62, %v3595_v6 }
 0x1ec   :  { %6458 = vmatprep.subr.bf16.mxu1 %v6457_v44  ;;  %v3099_v42 = vcombine.high %v7572_v33, %v7572_v33  ;;  %v134_v44 = vld [vmem:[#allocation2 + $0x10] sm:$0xff] }
 0x1ed   :  { %v3100_v43 = vcombine.high %v7575_v36, %v7575_v36  ;;  %v7598_v57 = vrot.slane %v134_v44, %v7545_v9 }
 0x1ee   :  { %6428 = vmatpush3.bf16.msra.mxu0 %v6427_v47 }
 0x1ef   :  { %6460 = vmatpush3.bf16.msra.mxu1 %v6459_v49  ;;  %6430 = vmatprep.subr.bf16.mxu0 %v6429_v52  ;;  %v3101_v52 = vcombine.high %v134_v44, %v134_v44  ;;  %v3615_v44 = vld [vmem:[#allocation14 + $0x3a0] sm:$0xff] }
 0x1f0   :  { %6462 = vmatprep.subr.bf16.mxu1 %v6461_v55  ;;  %v135_v55 = vld [vmem:[#allocation2 + $0x18] sm:$0xff] }
 0x1f1   :  { %v7601_v61 = vrot.slane %v3101_v52, %v7545_v9  ;;  %v3118_v5 = vcombine.high %v135_v55, %v135_v55  ;;  %v3568_v52 = vld [vmem:[#allocation14 + $0x228] sm:$0xff] }
 0x1f2   :  { %6432 = vmatpush3.bf16.msra.mxu0 %v6431_v56 }
 0x1f3   :  { %6464 = vmatpush3.bf16.msra.mxu1 %v6463_v59  ;;  %6466 = vmatprep.subr.bf16.mxu0 %v6465_v63  ;;  %v3564_v59 = vld [vmem:[#allocation14 + $0x208] sm:$0xff]  ;;  %v3581_v63 = vld [vmem:[#allocation14 + $0x290] sm:$0xff] }
 0x1f4   :  { %6498 = vmatprep.subr.bf16.mxu1 %v6497_v2  ;;  %v3310_v2 = vrot.slane %v7595_v54, %v7549_v12 }
 0x270   :  { %v1989_v23 = vpop.f32.mrb[0].mxu0 }
 0x271   :  { %v3235_v25 = vadd.f32 %v3074_v11, %v1989_v23  ;;  %v2060_v26 = vpop.f32.mrb[0].mxu1  ;;  %v1991_v28 = vpop.f32.mrb[1].mxu0  ;;  %v3318_v11 = vrot.slane %v7595_v54, %v7558_v17  ;;  %v6469_v23 = vpack.c.bf16 %v3582_v1, %v3581_v63  ;;  %v7633_v63 = vld [vmem:[#allocation14 + $0x3b0] sm:$0xff]  ;;  %v3618_v1 = vld [vmem:[#allocation14 + $0x3b8] sm:$0xff] }
 0x272   :  { %v3237_v30 = vadd.f32 %v3081_v13, %v2060_v26  ;;  %v3236_v31 = vadd.f32 %v3082_v19, %v1991_v28  ;;  %v2062_v32 = vpop.f32.mrb[1].mxu1  ;;  %v6467_v13 = vpack.c.bf16 %v3564_v59, %v3563_v58  ;;  %v3597_v26 = vld [vmem:[#allocation14 + $0x310] sm:$0xff]  ;;  %v7611_v28 = vsub.s32 4, %v7542_v7  ;;  %v3586_v58 = vld [vmem:[#allocation14 + $0x2b8] sm:$0xff] }
 0x273   :  { %v3435_v34 = vadd.f32 %v3278_v20, %v3235_v25  ;;  %v3238_v35 = vadd.f32 %v3083_v21, %v2062_v32  ;;  %v3566_v25 = vld [vmem:[#allocation14 + $0x218] sm:$0xff] }
 0x274   :  { %v3436_v37 = vadd.f32 %v3282_v24, %v3236_v31  ;;  %v3437_v39 = vadd.f32 %v3286_v27, %v3237_v30  ;;  %v3565_v24 = vld [vmem:[#allocation14 + $0x210] sm:$0xff]  ;;  %v6501_v31 = vpack.c.bf16 %v3614_v60, %v3613_v3  ;;  %v3598_v32 = vld [vmem:[#allocation14 + $0x318] sm:$0xff]  ;;  %v3294_v59 = vrot.slane %v7552_v14, %v7611_v28 }
 0x275   :  { %v3438_v40 = vadd.f32 %v3290_v29, %v3238_v35  ;;  %6969 = vtanh.f32 %v3435_v34  ;;  %v3125_v34 = vrot.slane %v135_v55, %v7545_v9  ;;  %v3583_v35 = vld [vmem:[#allocation14 + $0x2a0] sm:$0xff]  ;;  %v3600_v55 = vld [vmem:[#allocation14 + $0x328] sm:$0xff]  ;;  %v3116_v60 = vcombine.high %v7598_v57, %v7598_v57 }
 0x276   :  { %6971 = vtanh.f32 %v3436_v37  ;;  %v3584_v37 = vld [vmem:[#allocation14 + $0x2a8] sm:$0xff] }
 0x277   :  { %6973 = vtanh.f32 %v3438_v40  ;;  %v7618_v40 = vsub.s32 6, %v7542_v7  ;;  %v7629_v7 = vld [vmem:[#allocation14 + $0x320] sm:$0xff]  ;;  %v3133_v6 = vcombine.high %v3125_v34, %v3125_v34 }
 0x278   :  { %v7587_v45 = vpop.f32.mrb[2].mxu0  ;;  %6975 = vtanh.f32 %v3437_v39 }
 0x279   :  { %v7591_v47 = vpop.f32.mrb[2].mxu1  ;;  %v2133_v49 = vpop.f32.mrb[3].mxu0  ;;  %v3302_v3 = vrot.slane %v7552_v14, %v7618_v40  ;;  %v3626_v14 = vld [vmem:[#allocation14 + $0x3f8] sm:$0xff] }
 0x27a   :  { %v3240_v48 = vadd.f32 %v3099_v42, %v2133_v49  ;;  %v2204_v51 = vpop.f32.mrb[3].mxu1  ;;  %v136_v49 = vld [vmem:[#allocation2 + $0x20] sm:$0xff] }
 0x27b   :  { %v3242_v0 = vadd.f32 %v3100_v43, %v2204_v51  ;;  %v7623_v43 = vrot.slane %v3118_v5, %v7545_v9  ;;  %v7627_v51 = vld [vmem:[#allocation14 + $0x220] sm:$0xff]  ;;  %v3326_v5 = vrot.slane %v7595_v54, %v7611_v28 }
 0x27c   :  { %v3440_v53 = vadd.f32 %v3298_v46, %v3240_v48  ;;  %v3616_v46 = vld [vmem:[#allocation14 + $0x3a8] sm:$0xff]  ;;  %v6471_v48 = vpack.c.bf16 %v3566_v25, %v3565_v24  ;;  %v7653_v24 = vld [vmem:[#allocation14 + $0x338] sm:$0xff]  ;;  %v7655_v25 = vld [vmem:[#allocation13 + $0x10] sm:$0xff] }
 0x27d   :  { %v3442_v56 = vadd.f32 %v3306_v50, %v3242_v0  ;;  %v6503_v0 = vpack.c.bf16 %v3598_v32, %v3597_v26  ;;  %v6505_v62 = vpack.c.bf16 %v3616_v46, %v3615_v44  ;;  %v6509_v32 = vpack.c.bf16 %v3618_v1, %v7633_v63  ;;  %v7661_v44 = vld [vmem:[#allocation14 + $0x3c0] sm:$0xff] }
 0x27e   :  { %6977 = vtanh.f32 %v3440_v53  ;;  %v6473_v53 = vpack.c.bf16 %v3584_v37, %v3583_v35  ;;  %v7659_v35 = vrot.slane %v136_v49, %v7545_v9  ;;  %v3587_v37 = vld [vmem:[#allocation14 + $0x2c0] sm:$0xff]  ;;  %v3322_v63 = vrot.slane %v7595_v54, %v7561_v18 }
 0x27f   :  { %v6970_v8 = vpop.eup %6969  ;;  %6979 = vtanh.f32 %v3442_v56  ;;  %v3585_v56 = vld [vmem:[#allocation14 + $0x2b0] sm:$0xff] }
 0x280   :  { %v2273_v10 = vpop.f32.mrb[4].mxu0  ;;  %v6972_v16 = vpop.eup %6971 }
 0x281   :  { %v3243_v19 = vadd.f32 %v7598_v57, %v2273_v10  ;;  %v2344_v20 = vpop.f32.mrb[4].mxu1  ;;  %v7608_v21 = vpop.f32.mrb[5].mxu0  ;;  %4075 = vmatprep.mubr.f32.mxu0 %v6972_v16  ;;  %v7643_v10 = vld [vmem:[#allocation14 + $0x230] sm:$0xff]  ;;  %v3334_v16 = vrot.slane %v7595_v54, %v7618_v40  ;;  %v3575_v57 = vld [vmem:[#allocation14 + $0x260] sm:$0xff] }
 0x282   :  { %v6974_v27 = vpop.eup %6973  ;;  %v3245_v29 = vadd.f32 %v7601_v61, %v2344_v20  ;;  %v7614_v30 = vpop.f32.mrb[5].mxu1  ;;  %4076 = vmatmul.mubr.f32.vlgmr.msra.gmra.mrb[16].mxu0 %v6970_v8  ;;  %v3134_v8 = vcombine.high %v7623_v43, %v7623_v43  ;;  %v6507_v20 = vpack.c.bf16 %v3600_v55, %v7629_v7  ;;  %v3620_v7 = vld [vmem:[#allocation14 + $0x3c8] sm:$0xff]  ;;  %v3117_v55 = vcombine.high %v7601_v61, %v7601_v61 }
 0x283   :  { %v6976_v39 = vpop.eup %6975  ;;  %v7620_v42 = vadd.f32 %v3310_v2, %v3243_v19  ;;  %4145 = vmatprep.mubr.f32.mxu1 %v6974_v27  ;;  %6468 = vmatpush3.bf16.msra.mxu0 %v6467_v13  ;;  %v3135_v2 = vcombine.high %v136_v49, %v136_v49  ;;  %v6475_v19 = vpack.c.bf16 %v3568_v52, %v7627_v51  ;;  %v7671_v49 = vld [vmem:[#allocation14 + $0x248] sm:$0xff] }
 0x284   :  { %v7625_v50 = vadd.f32 %v3318_v11, %v3245_v29  ;;  %4146 = vmatmul.mubr.f32.vlgmr.msra.gmra.mrb[16].mxu1 %v6976_v39  ;;  %6470 = vmatprep.subr.bf16.mxu0 %v6469_v23  ;;  %v7645_v11 = vld [vmem:[#allocation14 + $0x238] sm:$0xff]  ;;  %v7651_v23 = vld [vmem:[#allocation14 + $0x330] sm:$0xff]  ;;  %v3588_v39 = vld [vmem:[#allocation14 + $0x2c8] sm:$0xff] }
 0x285   :  { %6500 = vmatpush3.bf16.msra.mxu1 %v6499_v22  ;;  %v6477_v22 = vpack.c.bf16 %v3586_v58, %v3585_v56  ;;  %v7681_v58 = vld [vmem:[#allocation14 + $0x340] sm:$0xff]  ;;  %v6479_v61 = vpack.c.bf16 %v7645_v11, %v7643_v10  ;;  %v7703_v10 = vld [vmem:[#allocation14 + $0x258] sm:$0xff]  ;;  %v3350_v11 = vrot.slane %v7655_v25, %v7558_v17 }
 0x286   :  { %6502 = vmatprep.subr.bf16.mxu1 %v6501_v31 }
 0x287   :  { %6472 = vmatpush3.bf16.msra.mxu0 %v6471_v48 }
 0x288   :  { %v2415_v13 = vpop.f32.mrb[6].mxu0  ;;  %v6978_v26 = vpop.eup %6977  ;;  %6474 = vmatprep.subr.bf16.mxu0 %v6473_v53  ;;  %v3314_v53 = vrot.slane %v7595_v54, %v7555_v15 }
 0x289   :  { %6504 = vmatpush3.bf16.msra.mxu1 %v6503_v0  ;;  %v3247_v27 = vadd.f32 %v3125_v34, %v2415_v13  ;;  %v2486_v29 = vpop.f32.mrb[6].mxu1  ;;  %v2417_v31 = vpop.f32.mrb[7].mxu0  ;;  %4215 = vmatprep.mubr.f32.mxu0 %v6978_v26  ;;  %v7667_v34 = vrot.slane %v3135_v2, %v7545_v9  ;;  %v7669_v0 = vld [vmem:[#allocation14 + $0x240] sm:$0xff]  ;;  %v6511_v2 = vpack.c.bf16 %v7653_v24, %v7651_v23  ;;  %v7712_v24 = vld [vmem:[#allocation14 + $0x350] sm:$0xff] }
 0x28a   :  { %v6980_v46 = vpop.eup %6979  ;;  %v3249_v48 = vadd.f32 %v7623_v43, %v2486_v29  ;;  %v7664_v51 = vadd.f32 %v3133_v6, %v2417_v31  ;;  %v2488_v52 = vpop.f32.mrb[7].mxu1  ;;  %6506 = vmatprep.subr.bf16.mxu1 %v6505_v62  ;;  %v7683_v6 = vld [vmem:[#allocation14 + $0x348] sm:$0xff]  ;;  %v7685_v62 = vld [vmem:[#allocation14 + $0x2d0] sm:$0xff]  ;;  %v3342_v26 = vrot.slane %v7655_v25, %v7549_v12  ;;  %v6483_v23 = vpack.c.bf16 %v7671_v49, %v7669_v0  ;;  %v7714_v31 = vld [vmem:[#allocation14 + $0x358] sm:$0xff] }
 0x28b   :  { %v7677_v43 = vadd.f32 %v3326_v5, %v3247_v27  ;;  %v7679_v56 = vadd.f32 %v3134_v8, %v2488_v52  ;;  %4285 = vmatprep.mubr.f32.mxu1 %v6980_v46  ;;  %6476 = vmatpush3.bf16.msra.mxu0 %v6475_v19  ;;  %v3590_v5 = vld [vmem:[#allocation14 + $0x2d8] sm:$0xff]  ;;  %v7695_v8 = vld [vmem:[#allocation14 + $0x3d0] sm:$0xff]  ;;  %v137_v13 = vld [vmem:[#allocation2 + $0x28] sm:$0xff]  ;;  %v6481_v27 = vpack.c.bf16 %v3588_v39, %v3587_v37 }
 0x28c   :  { %v7689_v1 = vadd.f32 %v3334_v16, %v3249_v48  ;;  %6478 = vmatprep.subr.bf16.mxu0 %v6477_v22  ;;  %v3150_v16 = vcombine.high %v7659_v35, %v7659_v35  ;;  %v3622_v19 = vld [vmem:[#allocation14 + $0x3d8] sm:$0xff]  ;;  %v7701_v29 = vld [vmem:[#allocation14 + $0x250] sm:$0xff]  ;;  %v6513_v22 = vpack.c.bf16 %v3620_v7, %v7661_v44  ;;  %v3346_v37 = vrot.slane %v7655_v25, %v7555_v15 }
 0x28d   :  { %6508 = vmatpush3.bf16.msra.mxu1 %v6507_v20  ;;  %v3151_v20 = vcombine.high %v7667_v34, %v7667_v34  ;;  %v6515_v39 = vpack.c.bf16 %v7683_v6, %v7681_v58  ;;  %v3152_v46 = vcombine.high %v137_v13, %v137_v13  ;;  %v3239_v44 = vadd.f32 %v7572_v33, %v7587_v45 }
 0x28e   :  { %6510 = vmatprep.subr.bf16.mxu1 %v6509_v32  ;;  %v3354_v32 = vrot.slane %v7655_v25, %v7561_v18  ;;  %v6485_v52 = vpack.c.bf16 %v3590_v5, %v7685_v62  ;;  %v6517_v7 = vpack.c.bf16 %v3622_v19, %v7695_v8  ;;  %v6487_v0 = vpack.c.bf16 %v7703_v10, %v7701_v29  ;;  %v3624_v10 = vld [vmem:[#allocation14 + $0x3e8] sm:$0xff] }
 0x28f   :  { %6480 = vmatpush3.bf16.msra.mxu0 %v6479_v61  ;;  %v3241_v49 = vadd.f32 %v7575_v36, %v7591_v47  ;;  %v6519_v33 = vpack.c.bf16 %v7714_v31, %v7712_v24  ;;  %v3244_v45 = vadd.f32 %v3116_v60, %v7608_v21  ;;  %v3159_v36 = vrot.slane %v137_v13, %v7545_v9  ;;  %v3591_v47 = vld [vmem:[#allocation14 + $0x2e0] sm:$0xff]  ;;  %v3576_v21 = vld [vmem:[#allocation14 + $0x268] sm:$0xff] }
 0x290   :  { %v2557_v48 = vpop.f32.mrb[8].mxu0  ;;  %6482 = vmatprep.subr.bf16.mxu0 %v6481_v27  ;;  %v3246_v8 = vadd.f32 %v3117_v55, %v7614_v30  ;;  %v3166_v29 = vrot.slane %v3152_v46, %v7545_v9  ;;  %v3439_v60 = vadd.f32 %v3294_v59, %v3239_v44  ;;  %v3358_v30 = vrot.slane %v7655_v25, %v7611_v28  ;;  %v3608_v59 = vld [vmem:[#allocation14 + $0x368] sm:$0xff]  ;;  %v3625_v46 = vld [vmem:[#allocation14 + $0x3f0] sm:$0xff] }
 0x291   :  { %6512 = vmatpush3.bf16.msra.mxu1 %v6511_v2  ;;  %v3251_v4 = vadd.f32 %v7659_v35, %v2557_v48  ;;  %v2628_v58 = vpop.f32.mrb[8].mxu1  ;;  %v2559_v6 = vpop.f32.mrb[9].mxu0  ;;  %v3592_v35 = vld [vmem:[#allocation14 + $0x2e8] sm:$0xff]  ;;  %v3623_v2 = vld [vmem:[#allocation14 + $0x3e0] sm:$0xff]  ;;  %v3441_v55 = vadd.f32 %v3302_v3, %v3241_v49  ;;  %v6491_v31 = vpack.c.bf16 %v3576_v21, %v3575_v57 }
 0x292   :  { %v3253_v62 = vadd.f32 %v7667_v34, %v2628_v58  ;;  %v3252_v61 = vadd.f32 %v3150_v16, %v2559_v6  ;;  %v2630_v5 = vpop.f32.mrb[9].mxu1  ;;  %6514 = vmatprep.subr.bf16.mxu1 %v6513_v22  ;;  %v6489_v16 = vpack.c.bf16 %v3592_v35, %v3591_v47  ;;  %v3444_v22 = vadd.f32 %v3314_v53, %v3244_v45  ;;  %v3675_v57 = vld [vmem:[#allocation14 + $0x580] sm:$0xff]  ;;  %v3676_v21 = vld [vmem:[#allocation14 + $0x588] sm:$0xff] }
 0x293   :  { %v7740_v27 = vadd.f32 %v3342_v26, %v3251_v4  ;;  %v3254_v19 = vadd.f32 %v3151_v20, %v2630_v5  ;;  %6484 = vmatpush3.bf16.msra.mxu0 %v6483_v23  ;;  %v138_v4 = vld [vmem:[#allocation2 + $0x30] sm:$0xff]  ;;  %v3607_v20 = vld [vmem:[#allocation14 + $0x360] sm:$0xff]  ;;  %v3167_v23 = vcombine.high %v3159_v36, %v3159_v36  ;;  %v6521_v24 = vpack.c.bf16 %v3624_v10, %v3623_v2  ;;  %v3610_v2 = vld [vmem:[#allocation14 + $0x378] sm:$0xff] }
 0x294   :  { %v7746_v34 = vadd.f32 %v3350_v11, %v3253_v62  ;;  %v7748_v13 = vadd.f32 %v3346_v37, %v3252_v61  ;;  %6486 = vmatprep.subr.bf16.mxu0 %v6485_v52  ;;  %v3593_v11 = vld [vmem:[#allocation14 + $0x2f0] sm:$0xff]  ;;  %v3594_v37 = vld [vmem:[#allocation14 + $0x2f8] sm:$0xff]  ;;  %v3446_v3 = vadd.f32 %v3322_v63, %v3246_v8  ;;  %v3169_v44 = vcombine.high %v138_v4, %v138_v4  ;;  %v3643_v8 = vld [vmem:[#allocation14 + $0x480] sm:$0xff] }
 0x295   :  { %v7755_v26 = vadd.f32 %v3354_v32, %v3254_v19  ;;  %6516 = vmatpush3.bf16.msra.mxu1 %v6515_v39  ;;  %v3366_v32 = vrot.slane %v7655_v25, %v7618_v40  ;;  %v3168_v39 = vcombine.high %v3166_v29, %v3166_v29  ;;  %6981 = vtanh.f32 %v3439_v60  ;;  %v3577_v62 = vld [vmem:[#allocation14 + $0x270] sm:$0xff]  ;;  %v3578_v61 = vld [vmem:[#allocation14 + $0x278] sm:$0xff]  ;;  %v3644_v19 = vld [vmem:[#allocation14 + $0x488] sm:$0xff] }
 0x296   :  { %6518 = vmatprep.subr.bf16.mxu1 %v6517_v7  ;;  %v3362_v53 = vrot.slane %v7655_v25, %v7578_v38  ;;  %v3370_v52 = vrot.slane %v7655_v25, %v7581_v41  ;;  %v6523_v7 = vpack.c.bf16 %v3608_v59, %v3607_v20  ;;  %6983 = vtanh.f32 %v3441_v55  ;;  %v3609_v5 = vld [vmem:[#allocation14 + $0x370] sm:$0xff] }
 0x297   :  { %6488 = vmatpush3.bf16.msra.mxu0 %v6487_v0  ;;  %v6493_v6 = vpack.c.bf16 %v3594_v37, %v3593_v11  ;;  %v6525_v45 = vpack.c.bf16 %v3626_v14, %v3625_v46  ;;  %6985 = vtanh.f32 %v3444_v22  ;;  %v3176_v25 = vrot.slane %v138_v4, %v7545_v9  ;;  %v139_v20 = vld [vmem:[#allocation2 + $0x38] sm:$0xff]  ;;  %v3627_v11 = vld [vmem:[#allocation14 + $0x400] sm:$0xff]  ;;  %v3628_v22 = vld [vmem:[#allocation14 + $0x408] sm:$0xff] }
 0x298   :  { %v2699_v48 = vpop.f32.mrb[10].mxu0  ;;  %6490 = vmatprep.subr.bf16.mxu0 %v6489_v16  ;;  %6987 = vtanh.f32 %v3446_v3  ;;  %v3183_v10 = vrot.slane %v3169_v44, %v7545_v9  ;;  %v7777_v16 = vld [vmem:[#allocation13 + $0x18] sm:$0xff]  ;;  %v6529_v59 = vpack.c.bf16 %v3644_v19, %v3643_v8  ;;  %v3659_v37 = vld [vmem:[#allocation14 + $0x500] sm:$0xff]  ;;  %v3660_v46 = vld [vmem:[#allocation14 + $0x508] sm:$0xff]  ;;  %v3193_v8 = vrot.slane %v139_v20, %v7545_v9 }
 0x299   :  { %6520 = vmatpush3.bf16.msra.mxu1 %v6519_v33  ;;  %v3255_v49 = vadd.f32 %v3159_v36, %v2699_v48  ;;  %v2770_v58 = vpop.f32.mrb[10].mxu1  ;;  %v2701_v63 = vpop.f32.mrb[11].mxu0  ;;  %v3645_v3 = vld [vmem:[#allocation14 + $0x490] sm:$0xff]  ;;  %v3382_v48 = vrot.slane %v7777_v16, %v7558_v17  ;;  %v3648_v19 = vld [vmem:[#allocation14 + $0x4a8] sm:$0xff]  ;;  %6989 = vtanh.f32 %v7620_v42 }
 0x29a   :  { %v3257_v0 = vadd.f32 %v3166_v29, %v2770_v58  ;;  %v3256_v47 = vadd.f32 %v3167_v23, %v2701_v63  ;;  %v2772_v35 = vpop.f32.mrb[11].mxu1  ;;  %6522 = vmatprep.subr.bf16.mxu1 %v6521_v24  ;;  %v6495_v29 = vpack.c.bf16 %v3578_v61, %v3577_v62  ;;  %v3184_v23 = vcombine.high %v3176_v25, %v3176_v25  ;;  %v3629_v62 = vld [vmem:[#allocation14 + $0x410] sm:$0xff]  ;;  %v3630_v61 = vld [vmem:[#allocation14 + $0x418] sm:$0xff]  ;;  %v3740_v42 = vld [vmem:[#allocation14 + $0x788] sm:$0xff] }
 0x29b   :  { %v7770_v33 = vadd.f32 %v3358_v30, %v3255_v49  ;;  %v3258_v36 = vadd.f32 %v3168_v39, %v2772_v35  ;;  %6492 = vmatpush3.bf16.msra.mxu0 %v6491_v31  ;;  %v6527_v30 = vpack.c.bf16 %v3610_v2, %v3609_v5  ;;  %v6561_v24 = vpack.c.bf16 %v3676_v21, %v3675_v57  ;;  %v3678_v49 = vld [vmem:[#allocation14 + $0x598] sm:$0xff]  ;;  %v3661_v5 = vld [vmem:[#allocation14 + $0x510] sm:$0xff] }
 0x29c   :  { %v7773_v60 = vadd.f32 %v3366_v32, %v3257_v0  ;;  %v7775_v55 = vadd.f32 %v3362_v53, %v3256_v47  ;;  %6494 = vmatprep.subr.bf16.mxu0 %v6493_v6  ;;  %v3374_v31 = vrot.slane %v7777_v16, %v7549_v12  ;;  %v3185_v14 = vcombine.high %v3183_v10, %v3183_v10  ;;  %v3646_v32 = vld [vmem:[#allocation14 + $0x498] sm:$0xff] }
 0x29d   :  { %v7779_v4 = vadd.f32 %v3370_v52, %v3258_v36  ;;  %6524 = vmatpush3.bf16.msra.mxu1 %v6523_v7  ;;  %v3186_v39 = vcombine.high %v139_v20, %v139_v20  ;;  %v3378_v53 = vrot.slane %v7777_v16, %v7555_v15  ;;  %v6531_v52 = vpack.c.bf16 %v3628_v22, %v3627_v11  ;;  %v3677_v7 = vld [vmem:[#allocation14 + $0x590] sm:$0xff]  ;;  %v3662_v2 = vld [vmem:[#allocation14 + $0x518] sm:$0xff] }
 0x29e   :  { %6526 = vmatprep.subr.bf16.mxu1 %v6525_v45  ;;  %v3386_v12 = vrot.slane %v7777_v16, %v7561_v18  ;;  %v6563_v45 = vpack.c.bf16 %v3660_v46, %v3659_v37  ;;  %v6533_v15 = vpack.c.bf16 %v3646_v32, %v3645_v3  ;;  %v6565_v21 = vpack.c.bf16 %v3678_v49, %v3677_v7  ;;  %v3664_v3 = vld [vmem:[#allocation14 + $0x528] sm:$0xff]  ;;  %v3681_v7 = vld [vmem:[#allocation14 + $0x5b0] sm:$0xff]  ;;  %v3682_v49 = vld [vmem:[#allocation14 + $0x5b8] sm:$0xff] }
 0x29f   :  { %6496 = vmatpush3.bf16.msra.mxu0 %v6495_v29  ;;  %v6982_v0 = vpop.eup %6981  ;;  %v3200_v29 = vrot.slane %v3186_v39, %v7545_v9  ;;  %v6535_v20 = vpack.c.bf16 %v3630_v61, %v3629_v62  ;;  %v6567_v46 = vpack.c.bf16 %v3662_v2, %v3661_v5  ;;  %v3663_v9 = vld [vmem:[#allocation14 + $0x520] sm:$0xff]  ;;  %v3201_v32 = vcombine.high %v3193_v8, %v3193_v8 }
 0x2a0   :  { %v2841_v44 = vpop.f32.mrb[12].mxu0  ;;  %6530 = vmatprep.subr.bf16.mxu0 %v6529_v59  ;;  %v6984_v36 = vpop.eup %6983  ;;  %v3680_v59 = vld [vmem:[#allocation14 + $0x5a8] sm:$0xff]  ;;  %6991 = vtanh.f32 %v7625_v50 }
 0x2a1   :  { %6528 = vmatpush3.bf16.msra.mxu1 %v6527_v30  ;;  %v3259_v58 = vadd.f32 %v3176_v25, %v2841_v44  ;;  %v2912_v63 = vpop.f32.mrb[12].mxu1  ;;  %v2843_v6 = vpop.f32.mrb[13].mxu0  ;;  %v3647_v25 = vld [vmem:[#allocation14 + $0x4a0] sm:$0xff]  ;;  %v3649_v44 = vld [vmem:[#allocation14 + $0x4b0] sm:$0xff] }
 0x2a2   :  { %v3261_v17 = vadd.f32 %v3183_v10, %v2912_v63  ;;  %v3260_v47 = vadd.f32 %v3184_v23, %v2843_v6  ;;  %v2914_v35 = vpop.f32.mrb[13].mxu1  ;;  %6562 = vmatprep.subr.bf16.mxu1 %v6561_v24  ;;  %4216 = vmatmul.mubr.f32.vlgmr.msra.gmra.mrb[18].mxu0 %v6982_v0  ;;  %v3679_v30 = vld [vmem:[#allocation14 + $0x5a0] sm:$0xff]  ;;  %v6986_v10 = vpop.eup %6985  ;;  %v3398_v63 = vrot.slane %v7777_v16, %v7618_v40 }
 0x2a3   :  { %v7790_v57 = vadd.f32 %v3374_v31, %v3259_v58  ;;  %v3262_v18 = vadd.f32 %v3185_v14, %v2914_v35  ;;  %6532 = vmatpush3.bf16.msra.mxu0 %v6531_v52  ;;  %v3631_v23 = vld [vmem:[#allocation14 + $0x420] sm:$0xff]  ;;  %v6988_v24 = vpop.eup %6987  ;;  %4355 = vmatprep.mubr.f32.mxu0 %v6986_v10  ;;  %v6537_v31 = vpack.c.bf16 %v3648_v19, %v3647_v25  ;;  %v3632_v14 = vld [vmem:[#allocation14 + $0x428] sm:$0xff]  ;;  %v3665_v35 = vld [vmem:[#allocation14 + $0x530] sm:$0xff] }
 0x2a4   :  { %v7793_v11 = vadd.f32 %v3382_v48, %v3261_v17  ;;  %v7795_v22 = vadd.f32 %v3378_v53, %v3260_v47  ;;  %4286 = vmatmul.mubr.f32.vlgmr.msra.gmra.mrb[18].mxu1 %v6984_v36  ;;  %6534 = vmatprep.subr.bf16.mxu0 %v6533_v15  ;;  %v6569_v39 = vpack.c.bf16 %v3680_v59, %v3679_v30  ;;  %v3650_v48 = vld [vmem:[#allocation14 + $0x4b8] sm:$0xff]  ;;  %v3633_v17 = vld [vmem:[#allocation14 + $0x430] sm:$0xff]  ;;  %v3651_v36 = vld [vmem:[#allocation14 + $0x4c0] sm:$0xff] }
 0x2a5   :  { %v7797_v37 = vadd.f32 %v3386_v12, %v3262_v18  ;;  %6564 = vmatpush3.bf16.msra.mxu1 %v6563_v45  ;;  %4425 = vmatprep.mubr.f32.mxu1 %v6988_v24  ;;  %v3390_v53 = vrot.slane %v7777_v16, %v7611_v28  ;;  %v3202_v52 = vcombine.high %v3200_v29, %v3200_v29  ;;  %v3634_v47 = vld [vmem:[#allocation14 + $0x438] sm:$0xff]  ;;  %v3652_v18 = vld [vmem:[#allocation14 + $0x4c8] sm:$0xff]  ;;  %v3683_v30 = vld [vmem:[#allocation14 + $0x5c0] sm:$0xff] }
 0x2a6   :  { %6566 = vmatprep.subr.bf16.mxu1 %v6565_v21  ;;  %v3394_v6 = vrot.slane %v7777_v16, %v7578_v38  ;;  %v6539_v12 = vpack.c.bf16 %v3632_v14, %v3631_v23  ;;  %v6571_v45 = vpack.c.bf16 %v3664_v3, %v3663_v9  ;;  %v3402_v28 = vrot.slane %v7777_v16, %v7581_v41  ;;  %v3666_v19 = vld [vmem:[#allocation14 + $0x538] sm:$0xff]  ;;  %v3684_v59 = vld [vmem:[#allocation14 + $0x5c8] sm:$0xff]  ;;  %v3667_v14 = vld [vmem:[#allocation14 + $0x540] sm:$0xff] }
 0x2a7   :  { %6536 = vmatpush3.bf16.msra.mxu0 %v6535_v20  ;;  %v6541_v0 = vpack.c.bf16 %v3650_v48, %v3649_v44  ;;  %v6573_v25 = vpack.c.bf16 %v3682_v49, %v3681_v7  ;;  %v6543_v20 = vpack.c.bf16 %v3634_v47, %v3633_v17  ;;  %v6545_v24 = vpack.c.bf16 %v3652_v18, %v3651_v36  ;;  %v3668_v3 = vld [vmem:[#allocation14 + $0x548] sm:$0xff]  ;;  %v3685_v44 = vld [vmem:[#allocation14 + $0x5d0] sm:$0xff]  ;;  %v3686_v48 = vld [vmem:[#allocation14 + $0x5d8] sm:$0xff] }
 0x2a8   :  { %v2983_v58 = vpop.f32.mrb[14].mxu0  ;;  %6538 = vmatprep.subr.bf16.mxu0 %v6537_v31  ;;  %v3636_v31 = vld [vmem:[#allocation14 + $0x448] sm:$0xff]  ;;  %v6577_v9 = vpack.c.bf16 %v3684_v59, %v3683_v30  ;;  %v3637_v49 = vld [vmem:[#allocation14 + $0x450] sm:$0xff]  ;;  %v3658_v18 = vld [vmem:[#allocation14 + $0x4f8] sm:$0xff] }
 0x2a9   :  { %6568 = vmatpush3.bf16.msra.mxu1 %v6567_v46  ;;  %v3263_v62 = vadd.f32 %v3193_v8, %v2983_v58  ;;  %v3054_v61 = vpop.f32.mrb[14].mxu1  ;;  %v2985_v5 = vpop.f32.mrb[15].mxu0  ;;  %v3635_v46 = vld [vmem:[#allocation14 + $0x440] sm:$0xff]  ;;  %v3638_v58 = vld [vmem:[#allocation14 + $0x458] sm:$0xff]  ;;  %v3657_v36 = vld [vmem:[#allocation14 + $0x4f0] sm:$0xff] }
 0x2aa   :  { %v3265_v15 = vadd.f32 %v3200_v29, %v3054_v61  ;;  %v3264_v2 = vadd.f32 %v3201_v32, %v2985_v5  ;;  %v3056_v40 = vpop.f32.mrb[15].mxu1  ;;  %6570 = vmatprep.subr.bf16.mxu1 %v6569_v39  ;;  %v6575_v29 = vpack.c.bf16 %v3666_v19, %v3665_v35  ;;  %v3653_v32 = vld [vmem:[#allocation14 + $0x4d0] sm:$0xff]  ;;  %v3654_v39 = vld [vmem:[#allocation14 + $0x4d8] sm:$0xff]  ;;  %v3656_v61 = vld [vmem:[#allocation14 + $0x4e8] sm:$0xff]  ;;  %v3338_v5 = vrot.slane %v7595_v54, %v7581_v41 }
 0x2ab   :  { %v7807_v21 = vadd.f32 %v3390_v53, %v3263_v62  ;;  %v3266_v8 = vadd.f32 %v3202_v52, %v3056_v40  ;;  %6540 = vmatpush3.bf16.msra.mxu0 %v6539_v12  ;;  %v6547_v53 = vpack.c.bf16 %v3636_v31, %v3635_v46  ;;  %v6579_v52 = vpack.c.bf16 %v3668_v3, %v3667_v14  ;;  %v3655_v62 = vld [vmem:[#allocation14 + $0x4e0] sm:$0xff]  ;;  %v3672_v19 = vld [vmem:[#allocation14 + $0x568] sm:$0xff]  ;;  %v3674_v31 = vld [vmem:[#allocation14 + $0x578] sm:$0xff] }
 0x2ac   :  { %v7809_v10 = vadd.f32 %v3398_v63, %v3265_v15  ;;  %v7811_v16 = vadd.f32 %v3394_v6, %v3264_v2  ;;  %6542 = vmatprep.subr.bf16.mxu0 %v6541_v0  ;;  %v6549_v7 = vpack.c.bf16 %v3654_v39, %v3653_v32  ;;  %v3669_v63 = vld [vmem:[#allocation14 + $0x550] sm:$0xff]  ;;  %v3330_v6 = vrot.slane %v7595_v54, %v7578_v38  ;;  %v3688_v0 = vld [vmem:[#allocation14 + $0x5e8] sm:$0xff]  ;;  %v3639_v15 = vld [vmem:[#allocation14 + $0x460] sm:$0xff] }
 0x2ad   :  { %v7813_v23 = vadd.f32 %v3402_v28, %v3266_v8  ;;  %6572 = vmatpush3.bf16.msra.mxu1 %v6571_v45  ;;  %v6581_v12 = vpack.c.bf16 %v3686_v48, %v3685_v44  ;;  %v3670_v45 = vld [vmem:[#allocation14 + $0x558] sm:$0xff]  ;;  %v3687_v28 = vld [vmem:[#allocation14 + $0x5e0] sm:$0xff]  ;;  %v6551_v17 = vpack.c.bf16 %v3638_v58, %v3637_v49  ;;  %v6553_v35 = vpack.c.bf16 %v3656_v61, %v3655_v62  ;;  %v3640_v2 = vld [vmem:[#allocation14 + $0x468] sm:$0xff] }
 0x2ae   :  { %6574 = vmatprep.subr.bf16.mxu1 %v6573_v25  ;;  %v6583_v47 = vpack.c.bf16 %v3670_v45, %v3669_v63  ;;  %v3671_v40 = vld [vmem:[#allocation14 + $0x560] sm:$0xff]  ;;  %v3448_v38 = vadd.f32 %v3330_v6, %v7664_v51  ;;  %v6585_v25 = vpack.c.bf16 %v3688_v0, %v3687_v28  ;;  %v3450_v41 = vadd.f32 %v3338_v5, %v7679_v56  ;;  %v3689_v54 = vld [vmem:[#allocation14 + $0x5f0] sm:$0xff]  ;;  %v3690_v8 = vld [vmem:[#allocation14 + $0x5f8] sm:$0xff]  ;;  %v6990_v5 = vpop.eup %6989 }
 0x2af   :  { %6544 = vmatpush3.bf16.msra.mxu0 %v6543_v20  ;;  %v6555_v30 = vpack.c.bf16 %v3640_v2, %v3639_v15  ;;  %v6587_v59 = vpack.c.bf16 %v3672_v19, %v3671_v40  ;;  %v6557_v20 = vpack.c.bf16 %v3658_v18, %v3657_v36  ;;  %v3641_v51 = vld [vmem:[#allocation14 + $0x470] sm:$0xff]  ;;  %v6589_v46 = vpack.c.bf16 %v3690_v8, %v3689_v54  ;;  %v3707_v56 = vld [vmem:[#allocation14 + $0x680] sm:$0xff]  ;;  %v3708_v14 = vld [vmem:[#allocation14 + $0x688] sm:$0xff] }
 0x2b0   :  { %6546 = vmatprep.subr.bf16.mxu0 %v6545_v24  ;;  %v3673_v24 = vld [vmem:[#allocation14 + $0x570] sm:$0xff]  ;;  %6993 = vtanh.f32 %v3448_v38  ;;  %v6593_v32 = vpack.c.bf16 %v3708_v14, %v3707_v56  ;;  %v3691_v39 = vld [vmem:[#allocation14 + $0x600] sm:$0xff]  ;;  %v3692_v44 = vld [vmem:[#allocation14 + $0x608] sm:$0xff] }
 0x2b1   :  { %6576 = vmatpush3.bf16.msra.mxu1 %v6575_v29  ;;  %v3642_v29 = vld [vmem:[#allocation14 + $0x478] sm:$0xff]  ;;  %6995 = vtanh.f32 %v3450_v41  ;;  %v6591_v50 = vpack.c.bf16 %v3674_v31, %v3673_v24  ;;  %v6595_v58 = vpack.c.bf16 %v3692_v44, %v3691_v39  ;;  %v3741_v63 = vld [vmem:[#allocation14 + $0x790] sm:$0xff]  ;;  %v3743_v2 = vld [vmem:[#allocation14 + $0x7a0] sm:$0xff] }
 0x2b2   :  { %6578 = vmatprep.subr.bf16.mxu1 %v6577_v9  ;;  %v3739_v9 = vld [vmem:[#allocation14 + $0x780] sm:$0xff]  ;;  %v6559_v3 = vpack.c.bf16 %v3642_v29, %v3641_v51  ;;  %v3710_v49 = vld [vmem:[#allocation14 + $0x698] sm:$0xff]  ;;  %v3693_v45 = vld [vmem:[#allocation14 + $0x610] sm:$0xff]  ;;  %6997 = vtanh.f32 %v7677_v43 }
 0x2b3   :  { %6548 = vmatpush3.bf16.msra.mxu0 %v6547_v53  ;;  %v6625_v48 = vpack.c.bf16 %v3740_v42, %v3739_v9  ;;  %v3723_v53 = vld [vmem:[#allocation14 + $0x700] sm:$0xff]  ;;  %v3742_v6 = vld [vmem:[#allocation14 + $0x798] sm:$0xff]  ;;  %v3725_v61 = vld [vmem:[#allocation14 + $0x710] sm:$0xff]  ;;  %6999 = vtanh.f32 %v7689_v1 }
 0x2b4   :  { %6550 = vmatprep.subr.bf16.mxu0 %v6549_v7  ;;  %v3709_v7 = vld [vmem:[#allocation14 + $0x690] sm:$0xff]  ;;  %v3694_v62 = vld [vmem:[#allocation14 + $0x618] sm:$0xff]  ;;  %v6629_v15 = vpack.c.bf16 %v3742_v6, %v3741_v63  ;;  %v3744_v40 = vld [vmem:[#allocation14 + $0x7a8] sm:$0xff]  ;;  %7001 = vtanh.f32 %v7748_v13 }
 0x2b5   :  { %6580 = vmatpush3.bf16.msra.mxu1 %v6579_v52  ;;  %v3724_v52 = vld [vmem:[#allocation14 + $0x708] sm:$0xff]  ;;  %v6597_v28 = vpack.c.bf16 %v3710_v49, %v3709_v7  ;;  %v3726_v0 = vld [vmem:[#allocation14 + $0x718] sm:$0xff]  ;;  %v3695_v41 = vld [vmem:[#allocation14 + $0x620] sm:$0xff]  ;;  %7003 = vtanh.f32 %v7755_v26 }
 0x2b6   :  { %6582 = vmatprep.subr.bf16.mxu1 %v6581_v12  ;;  %v6627_v12 = vpack.c.bf16 %v3724_v52, %v3723_v53  ;;  %v6631_v36 = vpack.c.bf16 %v3726_v0, %v3725_v61  ;;  %v3696_v54 = vld [vmem:[#allocation14 + $0x628] sm:$0xff]  ;;  %v3727_v8 = vld [vmem:[#allocation14 + $0x720] sm:$0xff]  ;;  %v3714_v51 = vld [vmem:[#allocation14 + $0x6b8] sm:$0xff]  ;;  %7005 = vtanh.f32 %v7740_v27 }
 0x2b7   :  { %6552 = vmatpush3.bf16.msra.mxu0 %v6551_v17  ;;  %v3711_v17 = vld [vmem:[#allocation14 + $0x6a0] sm:$0xff]  ;;  %v3745_v29 = vld [vmem:[#allocation14 + $0x7b0] sm:$0xff]  ;;  %v3746_v24 = vld [vmem:[#allocation14 + $0x7b8] sm:$0xff]  ;;  %7007 = vtanh.f32 %v7746_v34 }
 0x2b8   :  { %6554 = vmatprep.subr.bf16.mxu0 %v6553_v35  ;;  %v6992_v35 = vpop.eup %6991  ;;  %v3697_v14 = vld [vmem:[#allocation14 + $0x630] sm:$0xff]  ;;  %v3698_v9 = vld [vmem:[#allocation14 + $0x638] sm:$0xff]  ;;  %v3716_v39 = vld [vmem:[#allocation14 + $0x6c8] sm:$0xff]  ;;  %7009 = vtanh.f32 %v7775_v55 }
 0x2b9   :  { %6584 = vmatpush3.bf16.msra.mxu1 %v6583_v47  ;;  %v3712_v47 = vld [vmem:[#allocation14 + $0x6a8] sm:$0xff]  ;;  %v3729_v42 = vld [vmem:[#allocation14 + $0x730] sm:$0xff]  ;;  %v3747_v44 = vld [vmem:[#allocation14 + $0x7c0] sm:$0xff]  ;;  %v6607_v53 = vpack.c.bf16 %v3698_v9, %v3697_v14  ;;  %7011 = vtanh.f32 %v7779_v4 }
 0x2ba   :  { %6586 = vmatprep.subr.bf16.mxu1 %v6585_v25  ;;  %v6994_v38 = vpop.eup %6993  ;;  %v6599_v25 = vpack.c.bf16 %v3694_v62, %v3693_v45  ;;  %v6601_v18 = vpack.c.bf16 %v3712_v47, %v3711_v17  ;;  %v3699_v49 = vld [vmem:[#allocation14 + $0x640] sm:$0xff]  ;;  %v3717_v45 = vld [vmem:[#allocation14 + $0x6d0] sm:$0xff]  ;;  %v3718_v62 = vld [vmem:[#allocation14 + $0x6d8] sm:$0xff]  ;;  %7013 = vtanh.f32 %v7770_v33 }
 0x2bb   :  { %6556 = vmatpush3.bf16.msra.mxu0 %v6555_v30  ;;  %v6996_v19 = vpop.eup %6995  ;;  %v6633_v30 = vpack.c.bf16 %v3744_v40, %v3743_v2  ;;  %v3731_v63 = vld [vmem:[#allocation14 + $0x740] sm:$0xff]  ;;  %v3749_v61 = vld [vmem:[#allocation14 + $0x7d0] sm:$0xff]  ;;  %v6613_v17 = vpack.c.bf16 %v3718_v62, %v3717_v45  ;;  %v3734_v40 = vld [vmem:[#allocation14 + $0x758] sm:$0xff]  ;;  %7015 = vtanh.f32 %v7773_v60 }
 0x2bc   :  { %6558 = vmatprep.subr.bf16.mxu0 %v6557_v20  ;;  %v3713_v20 = vld [vmem:[#allocation14 + $0x6b0] sm:$0xff]  ;;  %v3803_v43 = vld [vmem:[#allocation14 + $0x980] sm:$0xff]  ;;  %v3774_v45 = vld [vmem:[#allocation14 + $0x898] sm:$0xff]  ;;  %7017 = vtanh.f32 %v7795_v22 }
 0x2bd   :  { %6588 = vmatpush3.bf16.msra.mxu1 %v6587_v59  ;;  %v3728_v59 = vld [vmem:[#allocation14 + $0x728] sm:$0xff]  ;;  %v6605_v56 = vpack.c.bf16 %v3714_v51, %v3713_v20  ;;  %v3701_v47 = vld [vmem:[#allocation14 + $0x650] sm:$0xff]  ;;  %v3787_v13 = vld [vmem:[#allocation14 + $0x900] sm:$0xff]  ;;  %7019 = vtanh.f32 %v7797_v37 }
 0x2be   :  { %6590 = vmatprep.subr.bf16.mxu1 %v6589_v46  ;;  %v6603_v46 = vpack.c.bf16 %v3696_v54, %v3695_v41  ;;  %v6635_v31 = vpack.c.bf16 %v3728_v59, %v3727_v8  ;;  %v3703_v8 = vld [vmem:[#allocation14 + $0x660] sm:$0xff]  ;;  %v3736_v51 = vld [vmem:[#allocation14 + $0x768] sm:$0xff]  ;;  %v3806_v26 = vld [vmem:[#allocation14 + $0x998] sm:$0xff]  ;;  %7021 = vtanh.f32 %v7790_v57 }
 0x2bf   :  { %6560 = vmatpush3.bf16.msra.mxu0 %v6559_v3  ;;  %v6637_v3 = vpack.c.bf16 %v3746_v24, %v3745_v29  ;;  %v3735_v59 = vld [vmem:[#allocation14 + $0x760] sm:$0xff]  ;;  %v3721_v29 = vld [vmem:[#allocation14 + $0x6f0] sm:$0xff]  ;;  %v3722_v24 = vld [vmem:[#allocation14 + $0x6f8] sm:$0xff]  ;;  %7023 = vtanh.f32 %v7793_v11 }
 0x2c0   :  { %6594 = vmatprep.subr.bf16.mxu0 %v6593_v32  ;;  %v3715_v32 = vld [vmem:[#allocation14 + $0x6c0] sm:$0xff]  ;;  %v6651_v14 = vpack.c.bf16 %v3736_v51, %v3735_v59  ;;  %v6621_v9 = vpack.c.bf16 %v3722_v24, %v3721_v29  ;;  %v3792_v24 = vld [vmem:[#allocation14 + $0x928] sm:$0xff]  ;;  %v3870_v4 = vld [vmem:[#allocation14 + $0xb98] sm:$0xff]  ;;  %7025 = vtanh.f32 %v7811_v16 }
 0x2c1   :  { %6592 = vmatpush3.bf16.msra.mxu1 %v6591_v50  ;;  %v3730_v50 = vld [vmem:[#allocation14 + $0x738] sm:$0xff]  ;;  %v6609_v7 = vpack.c.bf16 %v3716_v39, %v3715_v32  ;;  %v3759_v59 = vld [vmem:[#allocation14 + $0x820] sm:$0xff]  ;;  %7027 = vtanh.f32 %v7813_v23 }
 0x2c2   :  { %6626 = vmatprep.subr.bf16.mxu1 %v6625_v48  ;;  %4356 = vmatmul.mubr.f32.vlgmr.msra.gmra.mrb[20].mxu0 %v6990_v5  ;;  %v3748_v48 = vld [vmem:[#allocation14 + $0x7c8] sm:$0xff]  ;;  %v6639_v52 = vpack.c.bf16 %v3730_v50, %v3729_v42  ;;  %v3750_v5 = vld [vmem:[#allocation14 + $0x7d8] sm:$0xff]  ;;  %v3705_v42 = vld [vmem:[#allocation14 + $0x670] sm:$0xff] }
 0x2c3   :  { %6596 = vmatpush3.bf16.msra.mxu0 %v6595_v58  ;;  %4495 = vmatprep.mubr.f32.mxu0 %v6994_v38  ;;  %v3700_v58 = vld [vmem:[#allocation14 + $0x648] sm:$0xff]  ;;  %v6641_v6 = vpack.c.bf16 %v3748_v48, %v3747_v44  ;;  %v6645_v2 = vpack.c.bf16 %v3750_v5, %v3749_v61  ;;  %v3719_v38 = vld [vmem:[#allocation14 + $0x6e0] sm:$0xff]  ;;  %v3737_v50 = vld [vmem:[#allocation14 + $0x770] sm:$0xff] }
 0x2c4   :  { %4426 = vmatmul.mubr.f32.vlgmr.msra.gmra.mrb[20].mxu1 %v6992_v35  ;;  %6598 = vmatprep.subr.bf16.mxu0 %v6597_v28  ;;  %v6611_v28 = vpack.c.bf16 %v3700_v58, %v3699_v49  ;;  %v3702_v35 = vld [vmem:[#allocation14 + $0x658] sm:$0xff]  ;;  %v3771_v44 = vld [vmem:[#allocation14 + $0x880] sm:$0xff]  ;;  %v3772_v48 = vld [vmem:[#allocation14 + $0x888] sm:$0xff] }
 0x2c5   :  { %6628 = vmatpush3.bf16.msra.mxu1 %v6627_v12  ;;  %4565 = vmatprep.mubr.f32.mxu1 %v6996_v19  ;;  %v3732_v12 = vld [vmem:[#allocation14 + $0x748] sm:$0xff]  ;;  %v3751_v19 = vld [vmem:[#allocation14 + $0x7e0] sm:$0xff]  ;;  %v3738_v39 = vld [vmem:[#allocation14 + $0x778] sm:$0xff] }
 0x2c6   :  { %6630 = vmatprep.subr.bf16.mxu1 %v6629_v15  ;;  %v6643_v0 = vpack.c.bf16 %v3732_v12, %v3731_v63  ;;  %v3733_v15 = vld [vmem:[#allocation14 + $0x750] sm:$0xff]  ;;  %v3755_v49 = vld [vmem:[#allocation14 + $0x800] sm:$0xff]  ;;  %v3756_v58 = vld [vmem:[#allocation14 + $0x808] sm:$0xff] }
 0x2c7   :  { %6600 = vmatpush3.bf16.msra.mxu0 %v6599_v25  ;;  %v3720_v25 = vld [vmem:[#allocation14 + $0x6e8] sm:$0xff]  ;;  %v6647_v41 = vpack.c.bf16 %v3734_v40, %v3733_v15  ;;  %v3773_v12 = vld [vmem:[#allocation14 + $0x890] sm:$0xff]  ;;  %v6659_v62 = vpack.c.bf16 %v3756_v58, %v3755_v49  ;;  %v3790_v15 = vld [vmem:[#allocation14 + $0x918] sm:$0xff] }
 0x2c8   :  { %6602 = vmatprep.subr.bf16.mxu0 %v6601_v18  ;;  %v6615_v18 = vpack.c.bf16 %v3702_v35, %v3701_v47  ;;  %v6617_v54 = vpack.c.bf16 %v3720_v25, %v3719_v38  ;;  %v3805_v61 = vld [vmem:[#allocation14 + $0x990] sm:$0xff]  ;;  %v6998_v47 = vpop.eup %6997  ;;  %v6661_v35 = vpack.c.bf16 %v3774_v45, %v3773_v12  ;;  %v3776_v40 = vld [vmem:[#allocation14 + $0x8a8] sm:$0xff]  ;;  %v3791_v51 = vld [vmem:[#allocation14 + $0x920] sm:$0xff]  ;;  %7029 = vtanh.f32 %v7807_v21 }
 0x2c9   :  { %6632 = vmatpush3.bf16.msra.mxu1 %v6631_v36  ;;  %v3752_v36 = vld [vmem:[#allocation14 + $0x7e8] sm:$0xff]  ;;  %v7000_v38 = vpop.eup %6999  ;;  %v6693_v25 = vpack.c.bf16 %v3806_v26, %v3805_v61  ;;  %v3782_v61 = vld [vmem:[#allocation14 + $0x8d8] sm:$0xff]  ;;  %v3813_v26 = vld [vmem:[#allocation14 + $0x9d0] sm:$0xff]  ;;  %7031 = vtanh.f32 %v7809_v10 }
 0x2ca   :  { %6634 = vmatprep.subr.bf16.mxu1 %v6633_v30  ;;  %v3704_v30 = vld [vmem:[#allocation14 + $0x668] sm:$0xff]  ;;  %v6649_v20 = vpack.c.bf16 %v3752_v36, %v3751_v19  ;;  %v3807_v19 = vld [vmem:[#allocation14 + $0x9a0] sm:$0xff]  ;;  %v3934_v37 = vld [vmem:[#allocation14 + $0xd98] sm:$0xff] }
 0x2cb   :  { %6604 = vmatpush3.bf16.msra.mxu0 %v6603_v46  ;;  %v3753_v46 = vld [vmem:[#allocation14 + $0x7f0] sm:$0xff]  ;;  %v3808_v36 = vld [vmem:[#allocation14 + $0x9a8] sm:$0xff]  ;;  %v3867_v27 = vld [vmem:[#allocation14 + $0xb80] sm:$0xff] }
 0x2cc   :  { %6606 = vmatprep.subr.bf16.mxu0 %v6605_v56  ;;  %v6619_v56 = vpack.c.bf16 %v3704_v30, %v3703_v8  ;;  %v6697_v29 = vpack.c.bf16 %v3808_v36, %v3807_v19  ;;  %v3796_v45 = vld [vmem:[#allocation14 + $0x948] sm:$0xff]  ;;  %v3815_v19 = vld [vmem:[#allocation14 + $0x9e0] sm:$0xff]  ;;  %v3998_v23 = vld [vmem:[#allocation14 + $0xf98] sm:$0xff] }
 0x2cd   :  { %6636 = vmatpush3.bf16.msra.mxu1 %v6635_v31  ;;  %v3754_v31 = vld [vmem:[#allocation14 + $0x7f8] sm:$0xff]  ;;  %v3816_v36 = vld [vmem:[#allocation14 + $0x9e8] sm:$0xff]  ;;  %v3851_v55 = vld [vmem:[#allocation14 + $0xb00] sm:$0xff] }
 0x2ce   :  { %6638 = vmatprep.subr.bf16.mxu1 %v6637_v3  ;;  %v3706_v3 = vld [vmem:[#allocation14 + $0x678] sm:$0xff]  ;;  %v6653_v32 = vpack.c.bf16 %v3754_v31, %v3753_v46  ;;  %v3777_v46 = vld [vmem:[#allocation14 + $0x8b0] sm:$0xff]  ;;  %v3931_v33 = vld [vmem:[#allocation14 + $0xd80] sm:$0xff] }
 0x2cf   :  { %6608 = vmatpush3.bf16.msra.mxu0 %v6607_v53  ;;  %v3804_v53 = vld [vmem:[#allocation14 + $0x988] sm:$0xff]  ;;  %v6623_v1 = vpack.c.bf16 %v3706_v3, %v3705_v42  ;;  %v3778_v31 = vld [vmem:[#allocation14 + $0x8b8] sm:$0xff]  ;;  %v6699_v42 = vpack.c.bf16 %v3792_v24, %v3791_v51  ;;  %v3915_v22 = vld [vmem:[#allocation14 + $0xd00] sm:$0xff] }
 0x2d0   :  { %6610 = vmatprep.subr.bf16.mxu0 %v6609_v7  ;;  %v6657_v7 = vpack.c.bf16 %v3772_v48, %v3771_v44  ;;  %v6689_v63 = vpack.c.bf16 %v3804_v53, %v3803_v43  ;;  %v6669_v3 = vpack.c.bf16 %v3778_v31, %v3777_v46  ;;  %v3794_v48 = vld [vmem:[#allocation14 + $0x938] sm:$0xff]  ;;  %v3779_v43 = vld [vmem:[#allocation14 + $0x8c0] sm:$0xff]  ;;  %v3780_v53 = vld [vmem:[#allocation14 + $0x8c8] sm:$0xff] }
 0x2d1   :  { %6640 = vmatpush3.bf16.msra.mxu1 %v6639_v52  ;;  %v6655_v52 = vpack.c.bf16 %v3738_v39, %v3737_v50  ;;  %v3761_v50 = vld [vmem:[#allocation14 + $0x830] sm:$0xff]  ;;  %v6673_v58 = vpack.c.bf16 %v3780_v53, %v3779_v43  ;;  %v3800_v51 = vld [vmem:[#allocation14 + $0x968] sm:$0xff]  ;;  %v3786_v24 = vld [vmem:[#allocation14 + $0x8f8] sm:$0xff] }
 0x2d2   :  { %6642 = vmatprep.subr.bf16.mxu1 %v6641_v6  ;;  %v3788_v6 = vld [vmem:[#allocation14 + $0x908] sm:$0xff]  ;;  %v3793_v39 = vld [vmem:[#allocation14 + $0x930] sm:$0xff]  ;;  %v3818_v31 = vld [vmem:[#allocation14 + $0x9f8] sm:$0xff] }
 0x2d3   :  { %6612 = vmatpush3.bf16.msra.mxu0 %v6611_v28  ;;  %v6691_v5 = vpack.c.bf16 %v3788_v6, %v3787_v13  ;;  %v3757_v28 = vld [vmem:[#allocation14 + $0x810] sm:$0xff]  ;;  %v6703_v49 = vpack.c.bf16 %v3794_v48, %v3793_v39  ;;  %v3764_v13 = vld [vmem:[#allocation14 + $0x848] sm:$0xff]  ;;  %v3795_v6 = vld [vmem:[#allocation14 + $0x940] sm:$0xff] }
 0x2d4   :  { %6614 = vmatprep.subr.bf16.mxu0 %v6613_v17  ;;  %v3789_v17 = vld [vmem:[#allocation14 + $0x910] sm:$0xff]  ;;  %v3802_v39 = vld [vmem:[#allocation14 + $0x978] sm:$0xff]  ;;  %v3836_v48 = vld [vmem:[#allocation14 + $0xa88] sm:$0xff] }
 0x2d5   :  { %6644 = vmatpush3.bf16.msra.mxu1 %v6643_v0  ;;  %v3758_v0 = vld [vmem:[#allocation14 + $0x818] sm:$0xff]  ;;  %v6695_v8 = vpack.c.bf16 %v3790_v15, %v3789_v17  ;;  %v3797_v15 = vld [vmem:[#allocation14 + $0x950] sm:$0xff]  ;;  %v3868_v43 = vld [vmem:[#allocation14 + $0xb88] sm:$0xff] }
 0x2d6   :  { %6646 = vmatprep.subr.bf16.mxu1 %v6645_v2  ;;  %v3775_v2 = vld [vmem:[#allocation14 + $0x8a0] sm:$0xff]  ;;  %v3817_v46 = vld [vmem:[#allocation14 + $0x9f0] sm:$0xff] }
 0x2d7   :  { %6616 = vmatpush3.bf16.msra.mxu0 %v6615_v18  ;;  %v7002_v18 = vpop.eup %7001  ;;  %v6665_v30 = vpack.c.bf16 %v3776_v40, %v3775_v2  ;;  %v3798_v40 = vld [vmem:[#allocation14 + $0x958] sm:$0xff]  ;;  %v3995_v57 = vld [vmem:[#allocation14 + $0xf80] sm:$0xff] }
 0x2d8   :  { %6618 = vmatprep.subr.bf16.mxu0 %v6617_v54  ;;  %v7004_v54 = vpop.eup %7003  ;;  %v3979_v16 = vld [vmem:[#allocation14 + $0xf00] sm:$0xff] }
 0x2d9   :  { %6648 = vmatpush3.bf16.msra.mxu1 %v6647_v41  ;;  %v6663_v41 = vpack.c.bf16 %v3758_v0, %v3757_v28  ;;  %v6707_v0 = vpack.c.bf16 %v3796_v45, %v3795_v6 }
 0x2da   :  { %6650 = vmatprep.subr.bf16.mxu1 %v6649_v20  ;;  %v3760_v20 = vld [vmem:[#allocation14 + $0x828] sm:$0xff] }
 0x2db   :  { %6620 = vmatpush3.bf16.msra.mxu0 %v6619_v56  ;;  %v3809_v56 = vld [vmem:[#allocation14 + $0x9b0] sm:$0xff] }
 0x2dc   :  { %6622 = vmatprep.subr.bf16.mxu0 %v6621_v9  ;;  %v6667_v9 = vpack.c.bf16 %v3760_v20, %v3759_v59  ;;  %v3799_v59 = vld [vmem:[#allocation14 + $0x960] sm:$0xff]  ;;  %v6713_v20 = vpack.c.bf16 %v3816_v36, %v3815_v19 }
 0x2dd   :  { %6652 = vmatpush3.bf16.msra.mxu1 %v6651_v14  ;;  %v3810_v14 = vld [vmem:[#allocation14 + $0x9b8] sm:$0xff] }
 0x2de   :  { %6654 = vmatprep.subr.bf16.mxu1 %v6653_v32  ;;  %v3762_v32 = vld [vmem:[#allocation14 + $0x838] sm:$0xff]  ;;  %v6701_v44 = vpack.c.bf16 %v3810_v14, %v3809_v56  ;;  %v6715_v14 = vpack.c.bf16 %v3800_v51, %v3799_v59  ;;  %v3856_v59 = vld [vmem:[#allocation14 + $0xb28] sm:$0xff] }
 0x2df   :  { %6624 = vmatpush3.bf16.msra.mxu0 %v6623_v1  ;;  %v3811_v1 = vld [vmem:[#allocation14 + $0x9c0] sm:$0xff]  ;;  %v3842_v51 = vld [vmem:[#allocation14 + $0xab8] sm:$0xff] }
 0x2e0   :  { %6658 = vmatprep.subr.bf16.mxu0 %v6657_v7  ;;  %v6671_v7 = vpack.c.bf16 %v3762_v32, %v3761_v50  ;;  %v3801_v50 = vld [vmem:[#allocation14 + $0x970] sm:$0xff]  ;;  %v6717_v32 = vpack.c.bf16 %v3818_v31, %v3817_v46 }
 0x2e1   :  { %6656 = vmatpush3.bf16.msra.mxu1 %v6655_v52  ;;  %v3812_v52 = vld [vmem:[#allocation14 + $0x9c8] sm:$0xff]  ;;  %v6719_v53 = vpack.c.bf16 %v3802_v39, %v3801_v50  ;;  %v3858_v50 = vld [vmem:[#allocation14 + $0xb38] sm:$0xff] }
 0x2e2   :  { %6690 = vmatprep.subr.bf16.mxu1 %v6689_v63  ;;  %4496 = vmatmul.mubr.f32.vlgmr.msra.gmra.mrb[22].mxu0 %v6998_v47  ;;  %v3763_v63 = vld [vmem:[#allocation14 + $0x840] sm:$0xff]  ;;  %v6705_v12 = vpack.c.bf16 %v3812_v52, %v3811_v1  ;;  %v3765_v47 = vld [vmem:[#allocation14 + $0x850] sm:$0xff]  ;;  %v3844_v39 = vld [vmem:[#allocation14 + $0xac8] sm:$0xff] }
 0x2e3   :  { %6660 = vmatpush3.bf16.msra.mxu0 %v6659_v62  ;;  %4635 = vmatprep.mubr.f32.mxu0 %v7002_v18  ;;  %v3781_v62 = vld [vmem:[#allocation14 + $0x8d0] sm:$0xff]  ;;  %v6675_v28 = vpack.c.bf16 %v3764_v13, %v3763_v63  ;;  %v3819_v52 = vld [vmem:[#allocation14 + $0xa00] sm:$0xff]  ;;  %v3838_v13 = vld [vmem:[#allocation14 + $0xa98] sm:$0xff] }
 0x2e4   :  { %4566 = vmatmul.mubr.f32.vlgmr.msra.gmra.mrb[22].mxu1 %v7000_v38  ;;  %6662 = vmatprep.subr.bf16.mxu0 %v6661_v35  ;;  %v6677_v17 = vpack.c.bf16 %v3782_v61, %v3781_v62  ;;  %v3766_v35 = vld [vmem:[#allocation14 + $0x858] sm:$0xff]  ;;  %v3783_v38 = vld [vmem:[#allocation14 + $0x8e0] sm:$0xff]  ;;  %v3837_v63 = vld [vmem:[#allocation14 + $0xa90] sm:$0xff] }
 0x2e5   :  { %6692 = vmatpush3.bf16.msra.mxu1 %v6691_v5  ;;  %4705 = vmatprep.mubr.f32.mxu1 %v7004_v54  ;;  %v3814_v5 = vld [vmem:[#allocation14 + $0x9d8] sm:$0xff]  ;;  %v6679_v18 = vpack.c.bf16 %v3766_v35, %v3765_v47  ;;  %v3821_v62 = vld [vmem:[#allocation14 + $0xa10] sm:$0xff]  ;;  %v3840_v47 = vld [vmem:[#allocation14 + $0xaa8] sm:$0xff] }
 0x2e6   :  { %6694 = vmatprep.subr.bf16.mxu1 %v6693_v25  ;;  %v6709_v2 = vpack.c.bf16 %v3814_v5, %v3813_v26  ;;  %v3784_v25 = vld [vmem:[#allocation14 + $0x8e8] sm:$0xff]  ;;  %v3822_v61 = vld [vmem:[#allocation14 + $0xa18] sm:$0xff]  ;;  %v3853_v26 = vld [vmem:[#allocation14 + $0xb10] sm:$0xff]  ;;  %v7006_v5 = vpop.eup %7005 }
 0x2e7   :  { %6664 = vmatpush3.bf16.msra.mxu0 %v6663_v41  ;;  %v6711_v41 = vpack.c.bf16 %v3798_v40, %v3797_v15  ;;  %v6681_v54 = vpack.c.bf16 %v3784_v25, %v3783_v38  ;;  %v7008_v35 = vpop.eup %7007  ;;  %v3872_v40 = vld [vmem:[#allocation14 + $0xba8] sm:$0xff]  ;;  %v6727_v25 = vpack.c.bf16 %v3822_v61, %v3821_v62  ;;  %v3830_v62 = vld [vmem:[#allocation14 + $0xa58] sm:$0xff]  ;;  %v3861_v61 = vld [vmem:[#allocation14 + $0xb50] sm:$0xff] }
 0x2e8   :  { %6666 = vmatprep.subr.bf16.mxu0 %v6665_v30  ;;  %v3768_v30 = vld [vmem:[#allocation14 + $0x868] sm:$0xff]  ;;  %v7010_v38 = vpop.eup %7009 }
 0x2e9   :  { %6696 = vmatpush3.bf16.msra.mxu1 %v6695_v8  ;;  %v3767_v8 = vld [vmem:[#allocation14 + $0x860] sm:$0xff]  ;;  %v7012_v19 = vpop.eup %7011 }
 0x2ea   :  { %6698 = vmatprep.subr.bf16.mxu1 %v6697_v29  ;;  %v3785_v29 = vld [vmem:[#allocation14 + $0x8f0] sm:$0xff]  ;;  %v6683_v56 = vpack.c.bf16 %v3768_v30, %v3767_v8  ;;  %v3855_v8 = vld [vmem:[#allocation14 + $0xb20] sm:$0xff] }
 0x2eb   :  { %6668 = vmatpush3.bf16.msra.mxu0 %v6667_v9  ;;  %v6685_v9 = vpack.c.bf16 %v3786_v24, %v3785_v29  ;;  %v3873_v29 = vld [vmem:[#allocation14 + $0xbb0] sm:$0xff]  ;;  %v3874_v24 = vld [vmem:[#allocation14 + $0xbb8] sm:$0xff]  ;;  %v6763_v31 = vpack.c.bf16 %v3856_v59, %v3855_v8 }
 0x2ec   :  { %6670 = vmatprep.subr.bf16.mxu0 %v6669_v3  ;;  %v3770_v3 = vld [vmem:[#allocation14 + $0x878] sm:$0xff] }
 0x2ed   :  { %6700 = vmatpush3.bf16.msra.mxu1 %v6699_v42  ;;  %v3769_v42 = vld [vmem:[#allocation14 + $0x870] sm:$0xff]  ;;  %v3882_v8 = vld [vmem:[#allocation14 + $0xbf8] sm:$0xff] }
 0x2ee   :  { %6702 = vmatprep.subr.bf16.mxu1 %v6701_v44  ;;  %v3835_v44 = vld [vmem:[#allocation14 + $0xa80] sm:$0xff]  ;;  %v6687_v34 = vpack.c.bf16 %v3770_v3, %v3769_v42  ;;  %v3857_v42 = vld [vmem:[#allocation14 + $0xb30] sm:$0xff]  ;;  %v6765_v3 = vpack.c.bf16 %v3874_v24, %v3873_v29  ;;  %v3834_v29 = vld [vmem:[#allocation14 + $0xa78] sm:$0xff] }
 0x2ef   :  { %6672 = vmatpush3.bf16.msra.mxu0 %v6671_v7  ;;  %v6721_v1 = vpack.c.bf16 %v3836_v48, %v3835_v44  ;;  %v3820_v7 = vld [vmem:[#allocation14 + $0xa08] sm:$0xff]  ;;  %v3875_v44 = vld [vmem:[#allocation14 + $0xbc0] sm:$0xff]  ;;  %v3865_v24 = vld [vmem:[#allocation14 + $0xb70] sm:$0xff] }
 0x2f0   :  { %6674 = vmatprep.subr.bf16.mxu0 %v6673_v58  ;;  %v3852_v58 = vld [vmem:[#allocation14 + $0xb08] sm:$0xff]  ;;  %v6723_v6 = vpack.c.bf16 %v3820_v7, %v3819_v52  ;;  %v3859_v52 = vld [vmem:[#allocation14 + $0xb40] sm:$0xff] }
 0x2f1   :  { %6704 = vmatpush3.bf16.msra.mxu1 %v6703_v49  ;;  %v6753_v49 = vpack.c.bf16 %v3868_v43, %v3867_v27  ;;  %v6755_v45 = vpack.c.bf16 %v3852_v58, %v3851_v55  ;;  %v3876_v48 = vld [vmem:[#allocation14 + $0xbc8] sm:$0xff]  ;;  %v6767_v43 = vpack.c.bf16 %v3858_v50, %v3857_v42  ;;  %v3845_v55 = vld [vmem:[#allocation14 + $0xad0] sm:$0xff]  ;;  %v3846_v58 = vld [vmem:[#allocation14 + $0xad8] sm:$0xff] }
 0x2f2   :  { %6706 = vmatprep.subr.bf16.mxu1 %v6705_v12  ;;  %v3869_v12 = vld [vmem:[#allocation14 + $0xb90] sm:$0xff]  ;;  %v6769_v7 = vpack.c.bf16 %v3876_v48, %v3875_v44  ;;  %v3883_v50 = vld [vmem:[#allocation14 + $0xc00] sm:$0xff]  ;;  %v3916_v44 = vld [vmem:[#allocation14 + $0xd08] sm:$0xff] }
 0x2f3   :  { %6676 = vmatpush3.bf16.msra.mxu0 %v6675_v28  ;;  %v6725_v28 = vpack.c.bf16 %v3838_v13, %v3837_v63  ;;  %v6757_v15 = vpack.c.bf16 %v3870_v4, %v3869_v12  ;;  %v3877_v63 = vld [vmem:[#allocation14 + $0xbd0] sm:$0xff]  ;;  %v3878_v13 = vld [vmem:[#allocation14 + $0xbd8] sm:$0xff]  ;;  %v6741_v4 = vpack.c.bf16 %v3846_v58, %v3845_v55 }
 0x2f4   :  { %6678 = vmatprep.subr.bf16.mxu0 %v6677_v17  ;;  %v3839_v17 = vld [vmem:[#allocation14 + $0xaa0] sm:$0xff]  ;;  %v3901_v48 = vld [vmem:[#allocation14 + $0xc90] sm:$0xff]  ;;  %v3918_v58 = vld [vmem:[#allocation14 + $0xd18] sm:$0xff] }
 0x2f5   :  { %6708 = vmatpush3.bf16.msra.mxu1 %v6707_v0  ;;  %v3854_v0 = vld [vmem:[#allocation14 + $0xb18] sm:$0xff] }
 0x2f6   :  { %6710 = vmatprep.subr.bf16.mxu1 %v6709_v2  ;;  %v3871_v2 = vld [vmem:[#allocation14 + $0xba0] sm:$0xff]  ;;  %v6759_v36 = vpack.c.bf16 %v3854_v0, %v3853_v26  ;;  %v6773_v26 = vpack.c.bf16 %v3878_v13, %v3877_v63  ;;  %v3848_v0 = vld [vmem:[#allocation14 + $0xae8] sm:$0xff] }
 0x2f7   :  { %6680 = vmatpush3.bf16.msra.mxu0 %v6679_v18  ;;  %v6729_v18 = vpack.c.bf16 %v3840_v47, %v3839_v17  ;;  %v6761_v30 = vpack.c.bf16 %v3872_v40, %v3871_v2  ;;  %v3879_v17 = vld [vmem:[#allocation14 + $0xbe0] sm:$0xff]  ;;  %v3880_v47 = vld [vmem:[#allocation14 + $0xbe8] sm:$0xff] }
 0x2f8   :  { %6682 = vmatprep.subr.bf16.mxu0 %v6681_v54  ;;  %v3824_v54 = vld [vmem:[#allocation14 + $0xa28] sm:$0xff]  ;;  %v3831_v40 = vld [vmem:[#allocation14 + $0xa60] sm:$0xff] }
 0x2f9   :  { %6712 = vmatpush3.bf16.msra.mxu1 %v6711_v41  ;;  %v3823_v41 = vld [vmem:[#allocation14 + $0xa20] sm:$0xff]  ;;  %v3904_v13 = vld [vmem:[#allocation14 + $0xca8] sm:$0xff] }
 0x2fa   :  { %6714 = vmatprep.subr.bf16.mxu1 %v6713_v20  ;;  %v3841_v20 = vld [vmem:[#allocation14 + $0xab0] sm:$0xff]  ;;  %v6731_v46 = vpack.c.bf16 %v3824_v54, %v3823_v41  ;;  %v3850_v41 = vld [vmem:[#allocation14 + $0xaf8] sm:$0xff]  ;;  %v3903_v63 = vld [vmem:[#allocation14 + $0xca0] sm:$0xff] }
 0x2fb   :  { %6684 = vmatpush3.bf16.msra.mxu0 %v6683_v56  ;;  %v6733_v56 = vpack.c.bf16 %v3842_v51, %v3841_v20  ;;  %v3881_v54 = vld [vmem:[#allocation14 + $0xbf0] sm:$0xff] }
 0x2fc   :  { %6686 = vmatprep.subr.bf16.mxu0 %v6685_v9  ;;  %v3826_v9 = vld [vmem:[#allocation14 + $0xa38] sm:$0xff]  ;;  %v3833_v51 = vld [vmem:[#allocation14 + $0xa70] sm:$0xff] }
 0x2fd   :  { %6716 = vmatpush3.bf16.msra.mxu1 %v6715_v14  ;;  %v3825_v14 = vld [vmem:[#allocation14 + $0xa30] sm:$0xff]  ;;  %v6751_v60 = vpack.c.bf16 %v3834_v29, %v3833_v51  ;;  %v3908_v51 = vld [vmem:[#allocation14 + $0xcc8] sm:$0xff]  ;;  %v3939_v29 = vld [vmem:[#allocation14 + $0xdc0] sm:$0xff] }
 0x2fe   :  { %6718 = vmatprep.subr.bf16.mxu1 %v6717_v32  ;;  %v3843_v32 = vld [vmem:[#allocation14 + $0xac0] sm:$0xff]  ;;  %v6735_v27 = vpack.c.bf16 %v3826_v9, %v3825_v14  ;;  %v3900_v14 = vld [vmem:[#allocation14 + $0xc88] sm:$0xff] }
 0x2ff   :  { %6688 = vmatpush3.bf16.msra.mxu0 %v6687_v34  ;;  %v6737_v34 = vpack.c.bf16 %v3844_v39, %v3843_v32  ;;  %v3932_v9 = vld [vmem:[#allocation14 + $0xd88] sm:$0xff] }
 0x300   :  { %6722 = vmatprep.subr.bf16.mxu0 %v6721_v1  ;;  %v3828_v1 = vld [vmem:[#allocation14 + $0xa48] sm:$0xff]  ;;  %v6817_v39 = vpack.c.bf16 %v3932_v9, %v3931_v33  ;;  %v3923_v9 = vld [vmem:[#allocation14 + $0xd40] sm:$0xff] }
 0x301   :  { %6720 = vmatpush3.bf16.msra.mxu1 %v6719_v53  ;;  %v3827_v53 = vld [vmem:[#allocation14 + $0xa40] sm:$0xff]  ;;  %v3884_v32 = vld [vmem:[#allocation14 + $0xc08] sm:$0xff] }
 0x302   :  { %6754 = vmatprep.subr.bf16.mxu1 %v6753_v49  ;;  %4636 = vmatmul.mubr.f32.vlgmr.msra.gmra.mrb[24].mxu0 %v7006_v5  ;;  %v3860_v49 = vld [vmem:[#allocation14 + $0xb48] sm:$0xff]  ;;  %v3862_v5 = vld [vmem:[#allocation14 + $0xb58] sm:$0xff] }
 0x303   :  { %6724 = vmatpush3.bf16.msra.mxu0 %v6723_v6  ;;  %4775 = vmatprep.mubr.f32.mxu0 %v7010_v38  ;;  %v6739_v6 = vpack.c.bf16 %v3828_v1, %v3827_v53  ;;  %v6771_v12 = vpack.c.bf16 %v3860_v49, %v3859_v52  ;;  %v3832_v38 = vld [vmem:[#allocation14 + $0xa68] sm:$0xff]  ;;  %v6819_v53 = vpack.c.bf16 %v3916_v44, %v3915_v22  ;;  %v3885_v1 = vld [vmem:[#allocation14 + $0xc10] sm:$0xff]  ;;  %v3886_v52 = vld [vmem:[#allocation14 + $0xc18] sm:$0xff]  ;;  %v7014_v49 = vpop.eup %7013 }
 0x304   :  { %4706 = vmatmul.mubr.f32.vlgmr.msra.gmra.mrb[24].mxu1 %v7008_v35  ;;  %6726 = vmatprep.subr.bf16.mxu0 %v6725_v28  ;;  %v3847_v28 = vld [vmem:[#allocation14 + $0xae0] sm:$0xff]  ;;  %v3892_v33 = vld [vmem:[#allocation14 + $0xc48] sm:$0xff] }
 0x305   :  { %6756 = vmatpush3.bf16.msra.mxu1 %v6755_v45  ;;  %4845 = vmatprep.mubr.f32.mxu1 %v7012_v19  ;;  %v3829_v45 = vld [vmem:[#allocation14 + $0xa50] sm:$0xff]  ;;  %v6745_v2 = vpack.c.bf16 %v3848_v0, %v3847_v28  ;;  %v6777_v19 = vpack.c.bf16 %v3880_v47, %v3879_v17  ;;  %v6793_v28 = vpack.c.bf16 %v3904_v13, %v3903_v63  ;;  %v3887_v0 = vld [vmem:[#allocation14 + $0xc20] sm:$0xff]  ;;  %v3888_v17 = vld [vmem:[#allocation14 + $0xc28] sm:$0xff] }
 0x306   :  { %6758 = vmatprep.subr.bf16.mxu1 %v6757_v15  ;;  %v6743_v35 = vpack.c.bf16 %v3830_v62, %v3829_v45  ;;  %v6775_v15 = vpack.c.bf16 %v3862_v5, %v3861_v61  ;;  %v3936_v45 = vld [vmem:[#allocation14 + $0xda8] sm:$0xff]  ;;  %v6791_v61 = vpack.c.bf16 %v3886_v52, %v3885_v1  ;;  %v3919_v47 = vld [vmem:[#allocation14 + $0xd20] sm:$0xff] }
 0x307   :  { %6728 = vmatpush3.bf16.msra.mxu0 %v6727_v25  ;;  %v3863_v25 = vld [vmem:[#allocation14 + $0xb60] sm:$0xff]  ;;  %v3912_v52 = vld [vmem:[#allocation14 + $0xce8] sm:$0xff] }
 0x308   :  { %6730 = vmatprep.subr.bf16.mxu0 %v6729_v18  ;;  %v3849_v18 = vld [vmem:[#allocation14 + $0xaf0] sm:$0xff]  ;;  %v3911_v1 = vld [vmem:[#allocation14 + $0xce0] sm:$0xff] }
 0x309   :  { %6760 = vmatpush3.bf16.msra.mxu1 %v6759_v36  ;;  %v3864_v36 = vld [vmem:[#allocation14 + $0xb68] sm:$0xff]  ;;  %v6749_v20 = vpack.c.bf16 %v3850_v41, %v3849_v18  ;;  %v3889_v41 = vld [vmem:[#allocation14 + $0xc30] sm:$0xff]  ;;  %v6809_v63 = vpack.c.bf16 %v3912_v52, %v3911_v1  ;;  %v3895_v13 = vld [vmem:[#allocation14 + $0xc60] sm:$0xff] }
 0x30a   :  { %6762 = vmatprep.subr.bf16.mxu1 %v6761_v30  ;;  %v6747_v30 = vpack.c.bf16 %v3832_v38, %v3831_v40  ;;  %v6779_v59 = vpack.c.bf16 %v3864_v36, %v3863_v25  ;;  %v3906_v40 = vld [vmem:[#allocation14 + $0xcb8] sm:$0xff]  ;;  %v3937_v38 = vld [vmem:[#allocation14 + $0xdb0] sm:$0xff]  ;;  %v3984_v52 = vld [vmem:[#allocation14 + $0xf28] sm:$0xff] }
 0x30b   :  { %6732 = vmatpush3.bf16.msra.mxu0 %v6731_v46  ;;  %v6781_v46 = vpack.c.bf16 %v3882_v8, %v3881_v54  ;;  %v3938_v25 = vld [vmem:[#allocation14 + $0xdb8] sm:$0xff]  ;;  %v3921_v8 = vld [vmem:[#allocation14 + $0xd30] sm:$0xff] }
 0x30c   :  { %6734 = vmatprep.subr.bf16.mxu0 %v6733_v56  ;;  %v3899_v56 = vld [vmem:[#allocation14 + $0xc80] sm:$0xff]  ;;  %v3890_v54 = vld [vmem:[#allocation14 + $0xc38] sm:$0xff] }
 0x30d   :  { %6764 = vmatpush3.bf16.msra.mxu1 %v6763_v31  ;;  %v3866_v31 = vld [vmem:[#allocation14 + $0xb78] sm:$0xff] }
 0x30e   :  { %6766 = vmatprep.subr.bf16.mxu1 %v6765_v3  ;;  %v6783_v42 = vpack.c.bf16 %v3866_v31, %v3865_v24  ;;  %v6785_v3 = vpack.c.bf16 %v3900_v14, %v3899_v56  ;;  %v3940_v24 = vld [vmem:[#allocation14 + $0xdc8] sm:$0xff]  ;;  %v3891_v14 = vld [vmem:[#allocation14 + $0xc40] sm:$0xff] }
 0x30f   :  { %6736 = vmatpush3.bf16.msra.mxu0 %v6735_v27  ;;  %v3902_v27 = vld [vmem:[#allocation14 + $0xc98] sm:$0xff]  ;;  %v6803_v22 = vpack.c.bf16 %v3892_v33, %v3891_v14 }
 0x310   :  { %6738 = vmatprep.subr.bf16.mxu0 %v6737_v34  ;;  %v3933_v34 = vld [vmem:[#allocation14 + $0xd90] sm:$0xff]  ;;  %v6789_v55 = vpack.c.bf16 %v3902_v27, %v3901_v48 }
 0x311   :  { %6768 = vmatpush3.bf16.msra.mxu1 %v6767_v43  ;;  %v6787_v43 = vpack.c.bf16 %v3884_v32, %v3883_v50  ;;  %v3910_v50 = vld [vmem:[#allocation14 + $0xcd8] sm:$0xff]  ;;  %v3941_v32 = vld [vmem:[#allocation14 + $0xdd0] sm:$0xff] }
 0x312   :  { %6770 = vmatprep.subr.bf16.mxu1 %v6769_v7  ;;  %v3917_v7 = vld [vmem:[#allocation14 + $0xd10] sm:$0xff] }
 0x313   :  { %6740 = vmatpush3.bf16.msra.mxu0 %v6739_v6  ;;  %v7016_v6 = vpop.eup %7015  ;;  %v6823_v5 = vpack.c.bf16 %v3918_v58, %v3917_v7  ;;  %v3893_v27 = vld [vmem:[#allocation14 + $0xc50] sm:$0xff]  ;;  %v3943_v7 = vld [vmem:[#allocation14 + $0xde0] sm:$0xff] }
 0x314   :  { %6742 = vmatprep.subr.bf16.mxu0 %v6741_v4  ;;  %v3935_v4 = vld [vmem:[#allocation14 + $0xda0] sm:$0xff]  ;;  %v7018_v62 = vpop.eup %7017 }
 0x315   :  { %6772 = vmatpush3.bf16.msra.mxu1 %v6771_v12  ;;  %v6821_v12 = vpack.c.bf16 %v3934_v37, %v3933_v34  ;;  %v3925_v34 = vld [vmem:[#allocation14 + $0xd50] sm:$0xff] }
 0x316   :  { %6774 = vmatprep.subr.bf16.mxu1 %v6773_v26  ;;  %v7020_v26 = vpop.eup %7019 }
 0x317   :  { %6744 = vmatpush3.bf16.msra.mxu0 %v6743_v35  ;;  %v6825_v35 = vpack.c.bf16 %v3936_v45, %v3935_v4  ;;  %v3928_v45 = vld [vmem:[#allocation14 + $0xd68] sm:$0xff]  ;;  %v7022_v14 = vpop.eup %7021 }
 0x318   :  { %6746 = vmatprep.subr.bf16.mxu0 %v6745_v2  ;;  %v3905_v2 = vld [vmem:[#allocation14 + $0xcb0] sm:$0xff] }
 0x319   :  { %6776 = vmatpush3.bf16.msra.mxu1 %v6775_v15  ;;  %v3920_v15 = vld [vmem:[#allocation14 + $0xd28] sm:$0xff]  ;;  %v6797_v18 = vpack.c.bf16 %v3906_v40, %v3905_v2  ;;  %v3930_v40 = vld [vmem:[#allocation14 + $0xd78] sm:$0xff] }
 0x31a   :  { %6778 = vmatprep.subr.bf16.mxu1 %v6777_v19  ;;  %v6795_v19 = vpack.c.bf16 %v3888_v17, %v3887_v0  ;;  %v6827_v36 = vpack.c.bf16 %v3920_v15, %v3919_v47  ;;  %v3897_v47 = vld [vmem:[#allocation14 + $0xc70] sm:$0xff] }
 0x31b   :  { %6748 = vmatpush3.bf16.msra.mxu0 %v6747_v30  ;;  %v6829_v30 = vpack.c.bf16 %v3938_v25, %v3937_v38  ;;  %v3929_v15 = vld [vmem:[#allocation14 + $0xd70] sm:$0xff]  ;;  %v3963_v38 = vld [vmem:[#allocation14 + $0xe80] sm:$0xff]  ;;  %v3964_v25 = vld [vmem:[#allocation14 + $0xe88] sm:$0xff] }
 0x31c   :  { %6750 = vmatprep.subr.bf16.mxu0 %v6749_v20  ;;  %v3907_v20 = vld [vmem:[#allocation14 + $0xcc0] sm:$0xff] }
 0x31d   :  { %6780 = vmatpush3.bf16.msra.mxu1 %v6779_v59  ;;  %v3922_v59 = vld [vmem:[#allocation14 + $0xd38] sm:$0xff]  ;;  %v6801_v56 = vpack.c.bf16 %v3908_v51, %v3907_v20 }
 0x31e   :  { %6782 = vmatprep.subr.bf16.mxu1 %v6781_v46  ;;  %v6799_v46 = vpack.c.bf16 %v3890_v54, %v3889_v41  ;;  %v6831_v31 = vpack.c.bf16 %v3922_v59, %v3921_v8  ;;  %v3947_v41 = vld [vmem:[#allocation14 + $0xe00] sm:$0xff]  ;;  %v3948_v54 = vld [vmem:[#allocation14 + $0xe08] sm:$0xff]  ;;  %v3965_v59 = vld [vmem:[#allocation14 + $0xe90] sm:$0xff] }
 0x31f   :  { %6752 = vmatpush3.bf16.msra.mxu0 %v6751_v60  ;;  %v6833_v60 = vpack.c.bf16 %v3940_v24, %v3939_v29  ;;  %v3966_v20 = vld [vmem:[#allocation14 + $0xe98] sm:$0xff]  ;;  %v6851_v51 = vpack.c.bf16 %v3948_v54, %v3947_v41  ;;  %v3997_v29 = vld [vmem:[#allocation14 + $0xf90] sm:$0xff] }
 0x320   :  { %6786 = vmatprep.subr.bf16.mxu0 %v6785_v3  ;;  %v3909_v3 = vld [vmem:[#allocation14 + $0xcd0] sm:$0xff]  ;;  %v6853_v33 = vpack.c.bf16 %v3966_v20, %v3965_v59  ;;  %v3990_v20 = vld [vmem:[#allocation14 + $0xf58] sm:$0xff] }
 0x321   :  { %6784 = vmatpush3.bf16.msra.mxu1 %v6783_v42  ;;  %v3924_v42 = vld [vmem:[#allocation14 + $0xd48] sm:$0xff]  ;;  %v6805_v48 = vpack.c.bf16 %v3910_v50, %v3909_v3  ;;  %v7024_v3 = vpop.eup %7023  ;;  %v6885_v50 = vpack.c.bf16 %v3998_v23, %v3997_v29  ;;  %v4007_v23 = vld [vmem:[#allocation14 + $0xfe0] sm:$0xff] }
 0x322   :  { %6818 = vmatprep.subr.bf16.mxu1 %v6817_v39  ;;  %4776 = vmatmul.mubr.f32.vlgmr.msra.gmra.mrb[26].mxu0 %v7014_v49  ;;  %v3942_v39 = vld [vmem:[#allocation14 + $0xdd8] sm:$0xff]  ;;  %v6835_v44 = vpack.c.bf16 %v3924_v42, %v3923_v9  ;;  %v3944_v49 = vld [vmem:[#allocation14 + $0xde8] sm:$0xff] }
 0x323   :  { %6788 = vmatpush3.bf16.msra.mxu0 %v6787_v43  ;;  %4915 = vmatprep.mubr.f32.mxu0 %v7018_v62  ;;  %v3894_v43 = vld [vmem:[#allocation14 + $0xc58] sm:$0xff]  ;;  %v6837_v37 = vpack.c.bf16 %v3942_v39, %v3941_v32  ;;  %v6841_v4 = vpack.c.bf16 %v3944_v49, %v3943_v7  ;;  %v3913_v62 = vld [vmem:[#allocation14 + $0xcf0] sm:$0xff]  ;;  %v3968_v42 = vld [vmem:[#allocation14 + $0xea8] sm:$0xff] }
 0x324   :  { %4846 = vmatmul.mubr.f32.vlgmr.msra.gmra.mrb[26].mxu1 %v7016_v6  ;;  %6790 = vmatprep.subr.bf16.mxu0 %v6789_v55  ;;  %v6807_v55 = vpack.c.bf16 %v3894_v43, %v3893_v27  ;;  %v3896_v6 = vld [vmem:[#allocation14 + $0xc68] sm:$0xff]  ;;  %v3982_v9 = vld [vmem:[#allocation14 + $0xf18] sm:$0xff]  ;;  %v3999_v32 = vld [vmem:[#allocation14 + $0xfa0] sm:$0xff] }
 0x325   :  { %6820 = vmatpush3.bf16.msra.mxu1 %v6819_v53  ;;  %4985 = vmatprep.mubr.f32.mxu1 %v7020_v26  ;;  %v3926_v53 = vld [vmem:[#allocation14 + $0xd58] sm:$0xff]  ;;  %v3945_v26 = vld [vmem:[#allocation14 + $0xdf0] sm:$0xff]  ;;  %v4000_v39 = vld [vmem:[#allocation14 + $0xfa8] sm:$0xff] }
 0x326   :  { %6822 = vmatprep.subr.bf16.mxu1 %v6821_v12  ;;  %v6839_v58 = vpack.c.bf16 %v3926_v53, %v3925_v34  ;;  %v3927_v12 = vld [vmem:[#allocation14 + $0xd60] sm:$0xff]  ;;  %v6889_v1 = vpack.c.bf16 %v4000_v39, %v3999_v32  ;;  %v3969_v7 = vld [vmem:[#allocation14 + $0xeb0] sm:$0xff]  ;;  %v3970_v49 = vld [vmem:[#allocation14 + $0xeb8] sm:$0xff] }
 0x327   :  { %6792 = vmatpush3.bf16.msra.mxu0 %v6791_v61  ;;  %v3914_v61 = vld [vmem:[#allocation14 + $0xcf8] sm:$0xff]  ;;  %v6843_v0 = vpack.c.bf16 %v3928_v45, %v3927_v12  ;;  %v3951_v34 = vld [vmem:[#allocation14 + $0xe20] sm:$0xff]  ;;  %v3953_v12 = vld [vmem:[#allocation14 + $0xe30] sm:$0xff] }
 0x328   :  { %6794 = vmatprep.subr.bf16.mxu0 %v6793_v28  ;;  %v6811_v28 = vpack.c.bf16 %v3896_v6, %v3895_v13  ;;  %v6813_v17 = vpack.c.bf16 %v3914_v61, %v3913_v62  ;;  %v3983_v53 = vld [vmem:[#allocation14 + $0xf20] sm:$0xff]  ;;  %v6861_v6 = vpack.c.bf16 %v3970_v49, %v3969_v7  ;;  %v3985_v45 = vld [vmem:[#allocation14 + $0xf30] sm:$0xff]  ;;  %v3986_v61 = vld [vmem:[#allocation14 + $0xf38] sm:$0xff] }
 0x329   :  { %6824 = vmatpush3.bf16.msra.mxu1 %v6823_v5  ;;  %v3946_v5 = vld [vmem:[#allocation14 + $0xdf8] sm:$0xff]  ;;  %v6891_v13 = vpack.c.bf16 %v3984_v52, %v3983_v53  ;;  %v3976_v29 = vld [vmem:[#allocation14 + $0xee8] sm:$0xff]  ;;  %v3961_v52 = vld [vmem:[#allocation14 + $0xe70] sm:$0xff] }
 0x32a   :  { %6826 = vmatprep.subr.bf16.mxu1 %v6825_v35  ;;  %v3898_v35 = vld [vmem:[#allocation14 + $0xc78] sm:$0xff]  ;;  %v6845_v2 = vpack.c.bf16 %v3946_v5, %v3945_v26  ;;  %v3971_v26 = vld [vmem:[#allocation14 + $0xec0] sm:$0xff]  ;;  %v3972_v5 = vld [vmem:[#allocation14 + $0xec8] sm:$0xff] }
 0x32b   :  { %6796 = vmatpush3.bf16.msra.mxu0 %v6795_v19  ;;  %v3996_v19 = vld [vmem:[#allocation14 + $0xf88] sm:$0xff]  ;;  %v6815_v11 = vpack.c.bf16 %v3898_v35, %v3897_v47  ;;  %v6895_v47 = vpack.c.bf16 %v3986_v61, %v3985_v45  ;;  %v6865_v35 = vpack.c.bf16 %v3972_v5, %v3971_v26  ;;  %v3978_v32 = vld [vmem:[#allocation14 + $0xef8] sm:$0xff] }
 0x32c   :  { %6798 = vmatprep.subr.bf16.mxu0 %v6797_v18  ;;  %v6849_v18 = vpack.c.bf16 %v3964_v25, %v3963_v38  ;;  %v6881_v8 = vpack.c.bf16 %v3996_v19, %v3995_v57  ;;  %v3988_v25 = vld [vmem:[#allocation14 + $0xf48] sm:$0xff]  ;;  %v3973_v57 = vld [vmem:[#allocation14 + $0xed0] sm:$0xff]  ;;  %v3974_v19 = vld [vmem:[#allocation14 + $0xed8] sm:$0xff] }
 0x32d   :  { %6828 = vmatpush3.bf16.msra.mxu1 %v6827_v36  ;;  %v6847_v36 = vpack.c.bf16 %v3930_v40, %v3929_v15  ;;  %v3955_v15 = vld [vmem:[#allocation14 + $0xe40] sm:$0xff]  ;;  %v6869_v54 = vpack.c.bf16 %v3974_v19, %v3973_v57  ;;  %v3962_v7 = vld [vmem:[#allocation14 + $0xe78] sm:$0xff] }
 0x32e   :  { %6830 = vmatprep.subr.bf16.mxu1 %v6829_v30  ;;  %v3980_v30 = vld [vmem:[#allocation14 + $0xf08] sm:$0xff]  ;;  %v3987_v40 = vld [vmem:[#allocation14 + $0xf40] sm:$0xff]  ;;  %v6879_v21 = vpack.c.bf16 %v3962_v7, %v3961_v52  ;;  %v7877_v52 = vlaneseq }
 0x32f   :  { %6800 = vmatpush3.bf16.msra.mxu0 %v6799_v46  ;;  %v6883_v24 = vpack.c.bf16 %v3980_v30, %v3979_v16  ;;  %v3949_v46 = vld [vmem:[#allocation14 + $0xe10] sm:$0xff]  ;;  %v6899_v41 = vpack.c.bf16 %v3988_v25, %v3987_v40  ;;  %v3958_v16 = vld [vmem:[#allocation14 + $0xe58] sm:$0xff] }
 0x330   :  { %6802 = vmatprep.subr.bf16.mxu0 %v6801_v56  ;;  %v3981_v56 = vld [vmem:[#allocation14 + $0xf10] sm:$0xff]  ;;  %v5134_v7 = vand.u32 127, %v7877_v52 }
 0x331   :  { %6832 = vmatpush3.bf16.msra.mxu1 %v6831_v31  ;;  %v3950_v31 = vld [vmem:[#allocation14 + $0xe18] sm:$0xff]  ;;  %v6887_v27 = vpack.c.bf16 %v3982_v9, %v3981_v56  ;;  %v3989_v30 = vld [vmem:[#allocation14 + $0xf50] sm:$0xff]  ;;  %v3991_v9 = vld [vmem:[#allocation14 + $0xf60] sm:$0xff] }
 0x332   :  { %6834 = vmatprep.subr.bf16.mxu1 %v6833_v60  ;;  %v3967_v60 = vld [vmem:[#allocation14 + $0xea0] sm:$0xff]  ;;  %vm5135_vm2 = vcmp.lt.s32.totalorder %v5134_v7, 16 }
 0x333   :  { %6804 = vmatpush3.bf16.msra.mxu0 %v6803_v22  ;;  %v7026_v22 = vpop.eup %7025  ;;  %v6857_v43 = vpack.c.bf16 %v3968_v42, %v3967_v60 }
 0x334   :  { %6806 = vmatprep.subr.bf16.mxu0 %v6805_v48  ;;  %v7028_v48 = vpop.eup %7027 }
 0x335   :  { %6836 = vmatpush3.bf16.msra.mxu1 %v6835_v44  ;;  %v6855_v44 = vpack.c.bf16 %v3950_v31, %v3949_v46  ;;  %v6903_v31 = vpack.c.bf16 %v3990_v20, %v3989_v30  ;;  %v7030_v10 = vpop.eup %7029 }
 0x336   :  { %6838 = vmatprep.subr.bf16.mxu1 %v6837_v37  ;;  %v3952_v37 = vld [vmem:[#allocation14 + $0xe28] sm:$0xff] }
 0x337   :  { %6808 = vmatpush3.bf16.msra.mxu0 %v6807_v55  ;;  %v4001_v55 = vld [vmem:[#allocation14 + $0xfb0] sm:$0xff] }
 0x338   :  { %6810 = vmatprep.subr.bf16.mxu0 %v6809_v63  ;;  %v6859_v63 = vpack.c.bf16 %v3952_v37, %v3951_v34 }
 0x339   :  { %6840 = vmatpush3.bf16.msra.mxu1 %v6839_v58  ;;  %v4002_v58 = vld [vmem:[#allocation14 + $0xfb8] sm:$0xff] }
 0x33a   :  { %6842 = vmatprep.subr.bf16.mxu1 %v6841_v4  ;;  %v3954_v4 = vld [vmem:[#allocation14 + $0xe38] sm:$0xff]  ;;  %v6893_v62 = vpack.c.bf16 %v4002_v58, %v4001_v55  ;;  %v3993_v55 = vld [vmem:[#allocation14 + $0xf70] sm:$0xff] }
 0x33b   :  { %6812 = vmatpush3.bf16.msra.mxu0 %v6811_v28  ;;  %v4003_v28 = vld [vmem:[#allocation14 + $0xfc0] sm:$0xff]  ;;  %v3994_v58 = vld [vmem:[#allocation14 + $0xf78] sm:$0xff] }
 0x33c   :  { %6814 = vmatprep.subr.bf16.mxu0 %v6813_v17  ;;  %v6863_v17 = vpack.c.bf16 %v3954_v4, %v3953_v12 }
 0x33d   :  { %6844 = vmatpush3.bf16.msra.mxu1 %v6843_v0  ;;  %v4004_v0 = vld [vmem:[#allocation14 + $0xfc8] sm:$0xff] }
 0x33e   :  { %6846 = vmatprep.subr.bf16.mxu1 %v6845_v2  ;;  %v3956_v2 = vld [vmem:[#allocation14 + $0xe48] sm:$0xff]  ;;  %v6897_v38 = vpack.c.bf16 %v4004_v0, %v4003_v28 }
 0x33f   :  { %6816 = vmatpush3.bf16.msra.mxu0 %v6815_v11  ;;  %v4005_v11 = vld [vmem:[#allocation14 + $0xfd0] sm:$0xff] }
 0x340   :  { %6850 = vmatprep.subr.bf16.mxu0 %v6849_v18  ;;  %v6867_v18 = vpack.c.bf16 %v3956_v2, %v3955_v15 }
 0x341   :  { %6848 = vmatpush3.bf16.msra.mxu1 %v6847_v36  ;;  %v4006_v36 = vld [vmem:[#allocation14 + $0xfd8] sm:$0xff] }
 0x342   :  { %6882 = vmatprep.subr.bf16.mxu1 %v6881_v8  ;;  %4916 = vmatmul.mubr.f32.vlgmr.msra.gmra.mrb[28].mxu0 %v7022_v14  ;;  %v3957_v8 = vld [vmem:[#allocation14 + $0xe50] sm:$0xff]  ;;  %v6901_v59 = vpack.c.bf16 %v4006_v36, %v4005_v11  ;;  %v3959_v14 = vld [vmem:[#allocation14 + $0xe60] sm:$0xff] }
 0x343   :  { %6852 = vmatpush3.bf16.msra.mxu0 %v6851_v51  ;;  %5055 = vmatprep.mubr.f32.mxu0 %v7026_v22  ;;  %v3975_v51 = vld [vmem:[#allocation14 + $0xee0] sm:$0xff]  ;;  %v6871_v46 = vpack.c.bf16 %v3958_v16, %v3957_v8 }
 0x344   :  { %4986 = vmatmul.mubr.f32.vlgmr.msra.gmra.mrb[28].mxu1 %v7024_v3  ;;  %6854 = vmatprep.subr.bf16.mxu0 %v6853_v33  ;;  %v6873_v56 = vpack.c.bf16 %v3976_v29, %v3975_v51  ;;  %v3960_v33 = vld [vmem:[#allocation14 + $0xe68] sm:$0xff] }
 0x345   :  { %6884 = vmatpush3.bf16.msra.mxu1 %v6883_v24  ;;  %5125 = vmatprep.mubr.f32.mxu1 %v7028_v48  ;;  %v4008_v24 = vld [vmem:[#allocation14 + $0xfe8] sm:$0xff]  ;;  %v4010_v48 = vld [vmem:[#allocation14 + $0xff8] sm:$0xff]  ;;  %v6875_v34 = vpack.c.bf16 %v3960_v33, %v3959_v14 }
 0x346   :  { %6886 = vmatprep.subr.bf16.mxu1 %v6885_v50  ;;  %v6905_v42 = vpack.c.bf16 %v4008_v24, %v4007_v23  ;;  %v3992_v3 = vld [vmem:[#allocation14 + $0xf68] sm:$0xff]  ;;  %v3977_v50 = vld [vmem:[#allocation14 + $0xef0] sm:$0xff] }
 0x347   :  { %6856 = vmatpush3.bf16.msra.mxu0 %v6855_v44  ;;  %v4009_v44 = vld [vmem:[#allocation14 + $0xff0] sm:$0xff]  ;;  %v6907_v53 = vpack.c.bf16 %v3992_v3, %v3991_v9 }
 0x348   :  { %6858 = vmatprep.subr.bf16.mxu0 %v6857_v43  ;;  %v6909_v49 = vpack.c.bf16 %v4010_v48, %v4009_v44 }
 0x349   :  { %6888 = vmatpush3.bf16.msra.mxu1 %v6887_v27 }
 0x34a   :  { %6890 = vmatprep.subr.bf16.mxu1 %v6889_v1  ;;  %v6877_v1 = vpack.c.bf16 %v3978_v32, %v3977_v50 }
 0x34b   :  { %6860 = vmatpush3.bf16.msra.mxu0 %v6859_v63 }
 0x34c   :  { %6862 = vmatprep.subr.bf16.mxu0 %v6861_v6  ;;  %v7032_v6 = vpop.eup %7031 }
 0x34d   :  { %6892 = vmatpush3.bf16.msra.mxu1 %v6891_v13  ;;  %v6911_v13 = vpack.c.bf16 %v3994_v58, %v3993_v55 }
 0x34e   :  { %6894 = vmatprep.subr.bf16.mxu1 %v6893_v62 }
 0x34f   :  { %6864 = vmatpush3.bf16.msra.mxu0 %v6863_v17 }
 0x350   :  { %6866 = vmatprep.subr.bf16.mxu0 %v6865_v35 }
 0x351   :  { %6896 = vmatpush3.bf16.msra.mxu1 %v6895_v47 }
 0x352   :  { %6898 = vmatprep.subr.bf16.mxu1 %v6897_v38 }
 0x353   :  { %6868 = vmatpush3.bf16.msra.mxu0 %v6867_v18 }
 0x354   :  { %6870 = vmatprep.subr.bf16.mxu0 %v6869_v54 }
 0x355   :  { %6900 = vmatpush3.bf16.msra.mxu1 %v6899_v41  ;;  %v5233_v60 = vpop.f32.mrb[16].mxu0 }
 0x356   :  { %6902 = vmatprep.subr.bf16.mxu1 %v6901_v59  ;;  %v5234_v22 = vpop.f32.mrb[17].mxu0 }
 0x357   :  { %v5268_v39 = vpop.f32.mrb[16].mxu1  ;;  %v5235_v27 = vadd.f32 %v5234_v22, %v5233_v60  ;;  %6872 = vmatpush3.bf16.msra.mxu0 %v6871_v46 }
 0x358   :  { %v5269_v43 = vpop.f32.mrb[17].mxu1  ;;  %6874 = vmatprep.subr.bf16.mxu0 %v6873_v56 }
 0x359   :  { %v5270_v37 = vadd.f32 %v5269_v43, %v5268_v39  ;;  %6904 = vmatpush3.bf16.msra.mxu1 %v6903_v31 }
 0x35a   :  { %6906 = vmatprep.subr.bf16.mxu1 %v6905_v42 }
 0x35b   :  { %v4148_v63 = vadd.f32 %v5270_v37, %v5235_v27  ;;  %6876 = vmatpush3.bf16.msra.mxu0 %v6875_v34 }
 0x35c   :  { %6878 = vmatprep.subr.bf16.mxu0 %v6877_v1  ;;  %v142_v1 = vld [vmem:[#allocation8] sm:$0x3] }
 0x35d   :  { %6908 = vmatpush3.bf16.msra.mxu1 %v6907_v53  ;;  %vm5131_vm1 = vcmp.ne.s32.totalorder %v142_v1, 0 }
 0x35e   :  { %6910 = vmatprep.subr.bf16.mxu1 %v6909_v49 }
 0x35f   :  { %6880 = vmatpush3.bf16.msra.mxu0 %v6879_v21 }
 0x361   :  { %6912 = vmatpush3.bf16.msra.mxu1 %v6911_v13 }
 0x362   :  { %5056 = vmatmul.mubr.f32.vlgmr.msra.gmra.mrb[30].mxu0 %v7030_v10 }
 0x364   :  { %5126 = vmatmul.mubr.f32.vlgmr.msra.gmra.mrb[30].mxu1 %v7032_v6 }
 0x375   :  { %v5303_v12 = vpop.f32.mrb[18].mxu0 }
 0x376   :  { %v5304_v45 = vpop.f32.mrb[19].mxu0 }
 0x377   :  { %v5338_v4 = vpop.f32.mrb[18].mxu1  ;;  %v5305_v62 = vadd.f32 %v5304_v45, %v5303_v12 }
 0x378   :  { %v5339_v61 = vpop.f32.mrb[19].mxu1 }
 0x379   :  { %v5340_v26 = vadd.f32 %v5339_v61, %v5338_v4  ;;  %v4218_v5 = vadd.f32 %v5305_v62, %v4148_v63 }
 0x37b   :  { %v4288_v28 = vadd.f32 %v5340_v26, %v4218_v5  ;;  %v7038_v5 = vld [vmem:[#allocation7] sm:$0x3] }
 0x395   :  { %v5373_v0 = vpop.f32.mrb[20].mxu0 }
 0x396   :  { %v5374_v47 = vpop.f32.mrb[21].mxu0 }
 0x397   :  { %v5408_v17 = vpop.f32.mrb[20].mxu1  ;;  %v5375_v35 = vadd.f32 %v5374_v47, %v5373_v0 }
 0x398   :  { %v5409_v15 = vpop.f32.mrb[21].mxu1 }
 0x399   :  { %v5410_v2 = vadd.f32 %v5409_v15, %v5408_v17  ;;  %v4358_v40 = vadd.f32 %v5375_v35, %v4288_v28 }
 0x39b   :  { %v4428_v38 = vadd.f32 %v5410_v2, %v4358_v40 }
 0x3b5   :  { %v5443_v25 = vpop.f32.mrb[22].mxu0 }
 0x3b6   :  { %v5444_v19 = vpop.f32.mrb[23].mxu0 }
 0x3b7   :  { %v5478_v57 = vpop.f32.mrb[22].mxu1  ;;  %v5445_v11 = vadd.f32 %v5444_v19, %v5443_v25 }
 0x3b8   :  { %v5479_v36 = vpop.f32.mrb[23].mxu1 }
 0x3b9   :  { %v5480_v18 = vadd.f32 %v5479_v36, %v5478_v57  ;;  %v4498_v41 = vadd.f32 %v5445_v11, %v4428_v38 }
 0x3bb   :  { %v4568_v54 = vadd.f32 %v5480_v18, %v4498_v41 }
 0x3d5   :  { %v5513_v8 = vpop.f32.mrb[24].mxu0 }
 0x3d6   :  { %v5514_v30 = vpop.f32.mrb[25].mxu0 }
 0x3d7   :  { %v5548_v16 = vpop.f32.mrb[24].mxu1  ;;  %v5515_v59 = vadd.f32 %v5514_v30, %v5513_v8 }
 0x3d8   :  { %v5549_v20 = vpop.f32.mrb[25].mxu1 }
 0x3d9   :  { %v5550_v51 = vadd.f32 %v5549_v20, %v5548_v16  ;;  %v4638_v29 = vadd.f32 %v5515_v59, %v4568_v54 }
 0x3db   :  { %v4708_v23 = vadd.f32 %v5550_v51, %v4638_v29 }
 0x3f5   :  { %v5583_v24 = vpop.f32.mrb[26].mxu0 }
 0x3f6   :  { %v5584_v31 = vpop.f32.mrb[27].mxu0 }
 0x3f7   :  { %v5618_v46 = vpop.f32.mrb[26].mxu1  ;;  %v5585_v56 = vadd.f32 %v5584_v31, %v5583_v24 }
 0x3f8   :  { %v5619_v14 = vpop.f32.mrb[27].mxu1 }
 0x3f9   :  { %v5620_v33 = vadd.f32 %v5619_v14, %v5618_v46  ;;  %v4778_v9 = vadd.f32 %v5585_v56, %v4708_v23 }
 0x3fb   :  { %v4848_v60 = vadd.f32 %v5620_v33, %v4778_v9 }
 0x415   :  { %v5653_v42 = vpop.f32.mrb[28].mxu0 }
 0x416   :  { %v5654_v50 = vpop.f32.mrb[29].mxu0 }
 0x417   :  { %v5688_v3 = vpop.f32.mrb[28].mxu1  ;;  %v5655_v32 = vadd.f32 %v5654_v50, %v5653_v42 }
 0x418   :  { %v5689_v39 = vpop.f32.mrb[29].mxu1 }
 0x419   :  { %v5690_v22 = vadd.f32 %v5689_v39, %v5688_v3  ;;  %v4918_v44 = vadd.f32 %v5655_v32, %v4848_v60 }
 0x41b   :  { %v4988_v48 = vadd.f32 %v5690_v22, %v4918_v44 }
 0x435   :  { %v5723_v27 = vpop.f32.mrb[30].mxu0 }
 0x436   :  { %v5724_v34 = vpop.f32.mrb[31].mxu0 }
 0x437   :  { %v5758_v43 = vpop.f32.mrb[30].mxu1  ;;  %v5725_v37 = vadd.f32 %v5724_v34, %v5723_v27 }
 0x438   :  { %v5759_v53 = vpop.f32.mrb[31].mxu1 }
 0x439   :  { %v5760_v49 = vadd.f32 %v5759_v53, %v5758_v43  ;;  %v5058_v55 = vadd.f32 %v5725_v37, %v4988_v48 }
 0x43b   :  { %v5128_v58 = vadd.f32 %v5760_v49, %v5058_v55 }
 0x43d   :  { %v5132_v63 = vsel %vm5131_vm1, %v5128_v58, 0.0 }
 0x43e   :  { %v5136_v21 = vsel %vm5135_vm2, %v5132_v63, -1e+30 }
 0x43f   :  { %v5138_v13 = vsel %vm5137_vm3, %v5136_v21, -inf }
 0x440   :  { %5139 = vmax.xlane.f32.xlu0 %v5138_v13 }
 0x4cd   :  { %v5140_v10 = vpop.xlane.xlu0 %5139 }
 0x4ce   :  { %v5141_v6 = vsub.f32 %v5136_v21, %v5140_v10 }
 0x4d0   :  { %v5142_v12 = vmul.f32 1.442695, %v5141_v6 }
 0x4d2   :  { %7033 = vpow2.f32 %v5142_v12 }
 0x4dc   :  { %v7034_v4 = vpop.eup %7033 }
 0x4dd   :  { %v5144_v45 = vsel %vm5137_vm3, %v7034_v4, 0.0 }
 0x4de   :  { %5145 = vadd.xlane.f32.xlu0 %v5144_v45 }
 0x56b   :  { %v5146_v62 = vpop.xlane.xlu0 %5145 }
 0x56c   :  { %7035 = vrcp.f32 %v5146_v62 }
 0x576   :  { %v7036_v61 = vpop.eup %7035 }
 0x577   :  { %v5148_v26 = vmul.f32 %v7036_v61, %v7034_v4 }
 0x579   :  { %5149 = vst [vmem:[#allocation16] sm:$0x3] %v5148_v26  ;;  %v5150_v28 = vadd.f32 %v7038_v5, %v5148_v26 }
 0x57a   :  { %7226 = shalt.err (!%p7223_p12)
}
 0x57b   :  { %s7227_s20 = scalar_lea.hbm %s7874_s8, 32 }
 0x57c   :  { %p7228_p13 = scmp.ne.s32.totalorder %s7874_s8, %s7227_s20  ;;  %p7231_p0 = scmp.lt.u32.totalorder %s7227_s20, %s7874_s8 }
 0x57e   :  { %p7233_p1 = pnand %p7231_p0, %p7228_p13 }
 0x580   :  { %7236 = shalt.err (!%p7233_p1)
}
 0x581   :  { %5161 = dma.vmem_to_hbm [thread:$0]  %s5159_s2, 32, %s7874_s8, [#allocation4]   ;;  %5151 = vst [vmem:[#allocation17] sm:$0x3] %v5150_v28 }
 0x582   :  { %s7237_s4 = scalar_lea.vmem %s5169_s14, 32  ;;  %p7242_p3 = scmp.lt.s32.totalorder %s5169_s14, %s5169_s14 }
 0x583   :  { %p7238_p2 = scmp.ne.s32.totalorder %s5169_s14, %s7237_s4  ;;  %p7243_p4 = scmp.lt.s32.totalorder %s7237_s4, %s7237_s4 }
 0x585   :  { %p7244_p5 = por %p7243_p4, %p7242_p3 }
 0x587   :  { %p7245_p6 = pnand %p7244_p5, %p7238_p2 }
 0x589   :  { %7248 = shalt.err (!%p7245_p6)
}
 0x58a   :  { %s7249_s18 = scalar_lea.hbm %s7875_s9, 32 }
 0x58b   :  { %p7250_p7 = scmp.ne.s32.totalorder %s7875_s9, %s7249_s18  ;;  %p7253_p8 = scmp.lt.u32.totalorder %s7249_s18, %s7875_s9 }
 0x58d   :  { %p7255_p9 = pnand %p7253_p8, %p7250_p7 }
 0x58f   :  { %7258 = shalt.err (!%p7255_p9)
}
 0x590   :  { %5171 = dma.vmem_to_hbm [thread:$0]  %s5169_s14, 32, %s7875_s9, [#allocation18]  }
 0x591   :  { %7269 = dma.done.wait [#allocation4], 32  }
 0x592   :  { %7270 = vsyncadd [#allocation4], 4294967264 }
 0x593   :  { %7271 = dma.done.wait [#allocation18], 32  }
 0x594   :  { %7272 = vsyncadd [#allocation18], 4294967264 }
 0x595   :  { %5178 = vsyncpa [#allocation3], 1 }
 0x596   :  { %5179 = vsyncpa [#allocation6], 1 }
 0x597   :  { %5180 = vsyncpa [#allocation9], 1 }
 0x598   :  { %5181 = vsyncpa [#allocation12], 1 }
 0x599   :  { %5182 = vsyncpa [#allocation15], 1 }
 0x59a   :  { %5183 = vsyncpa [#allocation4], 1 }
 0x59b   :  { %5184 = vsyncpa [#allocation18], 1 }

</bundles_post_ra>
